<compile_context>
chip_gen: v6e
topology: v6e:2x2x1
jax: 0.10.0
libtpu: 0.0.40
codegen_flags: <defaults>
</compile_context>

<pallas_src>
import functools

import jax
import jax.numpy as jnp
from jax.experimental import pallas as pl
from jax.experimental.pallas import tpu as pltpu


# ----------------------------------------------------------------------------
# Fused kernel: Conv1d(k=8)+ReLU  ->  2-layer LSTM  ->  Linear(H -> 128-padded)
#   inputs  : x (B,S,Cin), conv_w (K,Cin,64), conv_b (1,64),
#             wih0 (64,4H), whh0 (H,4H), b0 (1,4H),
#             w1cat (2H,4H) = [wih1; whh1], b1 (1,4H),
#             fc_w_pad (H,128), fc_b_pad (1,128)
#   outputs : logits_pad (B,128), h_n (2,L,H), c_n (2,L,H)
# ----------------------------------------------------------------------------
def fused_forward_kernel(x_ref, cw_ref, cb_ref,
                         wih0_ref, whh0_ref, b0_ref,
                         w1cat_ref, b1_ref,
                         fcw_ref, fcb_ref,
                         logits_ref, hn_ref, cn_ref):
    B, S, _ = x_ref.shape
    K, _, Cout = cw_ref.shape
    L = S - K + 1
    H = whh0_ref.shape[0]

    cb = cb_ref[...]          # (1, Cout)
    wih0 = wih0_ref[...]      # (Cout, 4H)
    whh0 = whh0_ref[...]      # (H, 4H)
    b0 = b0_ref[...]          # (1, 4H)
    w1cat = w1cat_ref[...]    # (2H, 4H)
    b1 = b1_ref[...]          # (1, 4H)

    # --- Stage 1 + 2a: conv (unrolled K taps) + ReLU + layer-0 input
    # projection, per original-batch element b (== LSTM time step).
    # All rank-2 matmuls; no recurrent dependence, so this sits entirely
    # outside the serial chain and the scheduler can overlap it freely.
    xp = []
    for b in range(B):
        acc = jnp.zeros((L, Cout), jnp.float32)
        for k in range(K):
            acc = acc + jnp.dot(x_ref[b, pl.ds(k, L), :], cw_ref[k],
                                preferred_element_type=jnp.float32)
        conv = jnp.maximum(acc + cb, 0.0)          # ReLU; dropout == identity
        xp.append(jnp.dot(conv, wih0, preferred_element_type=jnp.float32) + b0)

    def gates(g):
        # contiguous activation blocks: one sigmoid covers both i and f.
        i_f = jax.nn.sigmoid(g[:, :2 * H])
        gg = jnp.tanh(g[:, 2 * H:3 * H])
        o = jax.nn.sigmoid(g[:, 3 * H:])
        return i_f[:, :H], i_f[:, H:], gg, o

    # --- Stage 2b: 2-layer LSTM recurrence (PyTorch gate order i,f,g,o).
    # nn.LSTM(batch_first=False): time axis = original batch B, batch = L.
    zeros = jnp.zeros((L, H), jnp.float32)
    h0, c0, h1, c1 = zeros, zeros, zeros, zeros
    last_rows = []
    # TODO(synk): switch to lax.fori_loop + a (B,H) VMEM scratch if B ever
    # grows large enough for the unrolled time loop to spill vregs.
    for t in range(B):
        # layer 0: only the recurrent matmul remains in the loop.
        g0 = xp[t] + jnp.dot(h0, whh0, preferred_element_type=jnp.float32)
        i, f, gg, o = gates(g0)
        c0 = f * c0 + i * gg
        h0 = o * jnp.tanh(c0)
        # layer 1: ih & hh fused into one matmul via a lane-aligned concat
        # (H = 128, so both operands sit on 128-lane boundaries).
        g1 = jnp.dot(jnp.concatenate([h0, h1], axis=-1), w1cat,
                     preferred_element_type=jnp.float32) + b1
        i, f, gg, o = gates(g1)
        c1 = f * c1 + i * gg
        h1 = o * jnp.tanh(c1)
        # Only out[t, -1, :] is consumed downstream -> keep just that row.
        last_rows.append(h1[L - 1:L, :])

    # --- Stage 3: fc on out[:, -1, :]; lane-dense (128-wide padded) output.
    lasth = jnp.concatenate(last_rows, axis=0)      # (B, H), vreg-resident
    logits_ref[...] = (
        jnp.dot(lasth, fcw_ref[...], preferred_element_type=jnp.float32)
        + fcb_ref[...]
    ).astype(logits_ref.dtype)

    hn_ref[0] = h0.astype(hn_ref.dtype)
    hn_ref[1] = h1.astype(hn_ref.dtype)
    cn_ref[0] = c0.astype(cn_ref.dtype)
    cn_ref[1] = c1.astype(cn_ref.dtype)


# ----------------------------------------------------------------------------
# Parameter init (deterministic; xavier-normal weights, zero biases), already
# in kernel-ready layouts: transposed, ih/hh of layer 1 pre-concatenated,
# fc weight pre-padded to a 128-lane output slab.
# ----------------------------------------------------------------------------
def xavier_normal(key, shape, fan_in, fan_out):
    std = (2.0 / (fan_in + fan_out)) ** 0.5
    return std * jax.random.normal(key, shape, dtype=jnp.float32)


def init_params(key, input_dim, hidden_dim=128, output_dim=3, kernel_size=8,
                conv_out=64, fc_pad=128):
    keys = jax.random.split(key, 6)
    H = hidden_dim

    # Conv1d weight (torch layout (64, C_in, K)) -> kernel layout (K, C_in, 64).
    conv_w_t = xavier_normal(keys[0], (conv_out, input_dim, kernel_size),
                             fan_in=input_dim * kernel_size,
                             fan_out=conv_out * kernel_size)
    conv_w = jnp.transpose(conv_w_t, (2, 1, 0))
    conv_b = jnp.zeros((1, conv_out), jnp.float32)

    # LSTM layer 0: torch weight_ih_l0 (4H,64), weight_hh_l0 (4H,H); biases 0.
    wih0 = xavier_normal(keys[1], (4 * H, conv_out), conv_out, 4 * H).T  # (64,4H)
    whh0 = xavier_normal(keys[2], (4 * H, H), H, 4 * H).T                # (H,4H)
    b0 = jnp.zeros((1, 4 * H), jnp.float32)      # b_ih + b_hh, hoisted with xp

    # LSTM layer 1: ih/hh pre-concatenated for the fused recurrent matmul.
    wih1 = xavier_normal(keys[3], (4 * H, H), H, 4 * H).T                # (H,4H)
    whh1 = xavier_normal(keys[4], (4 * H, H), H, 4 * H).T                # (H,4H)
    w1cat = jnp.concatenate([wih1, whh1], axis=0)                        # (2H,4H)
    b1 = jnp.zeros((1, 4 * H), jnp.float32)

    # fc: weight (O, H) -> (H, O), zero-padded to a lane-dense 128-wide slab.
    fc_w = xavier_normal(keys[5], (output_dim, H), H, output_dim).T      # (H,O)
    fc_w_pad = jnp.zeros((H, fc_pad), jnp.float32).at[:, :output_dim].set(fc_w)
    fc_b_pad = jnp.zeros((1, fc_pad), jnp.float32)

    return dict(conv_w=conv_w, conv_b=conv_b,
                wih0=wih0, whh0=whh0, b0=b0,
                w1cat=w1cat, b1=b1,
                fc_w_pad=fc_w_pad, fc_b_pad=fc_b_pad)


# ----------------------------------------------------------------------------
# Full forward (mirrors TrendMarketAnalyzer.forward, hidden_state=None).
# One jit -> one dispatch; one pallas_call -> one TPU custom call.
# ----------------------------------------------------------------------------
@functools.partial(jax.jit, static_argnames=("output_dim",))
def trend_market_analyzer_forward(x, params, output_dim=3):
    B, S, _ = x.shape
    K = params["conv_w"].shape[0]
    L = S - K + 1
    H = params["whh0"].shape[0]
    OP = params["fc_w_pad"].shape[1]

    vmem = pl.BlockSpec(memory_space=pltpu.MemorySpace.VMEM)
    logits_pad, h_n, c_n = pl.pallas_call(
        fused_forward_kernel,
        out_shape=(
            jax.ShapeDtypeStruct((B, OP), jnp.float32),    # padded logits
            jax.ShapeDtypeStruct((2, L, H), jnp.float32),  # h_n
            jax.ShapeDtypeStruct((2, L, H), jnp.float32),  # c_n
        ),
        in_specs=[vmem] * 10,
        out_specs=(vmem, vmem, vmem),
    )(x, params["conv_w"], params["conv_b"],
      params["wih0"], params["whh0"], params["b0"],
      params["w1cat"], params["b1"],
      params["fc_w_pad"], params["fc_b_pad"])

    logit = logits_pad[:, :output_dim]
    return logit, logit, (h_n, c_n)


# ----------------------------------------------------------------------------
# Pure-JAX reference (same math, no Pallas) for a numerical sanity check.
# ----------------------------------------------------------------------------
def reference_forward(x, params, output_dim=3):
    hp = jax.lax.Precision.HIGHEST
    B, S, _ = x.shape
    cw = params["conv_w"]
    K, _, Cout = cw.shape
    L = S - K + 1
    H = params["whh0"].shape[0]

    conv = jnp.zeros((B, L, Cout), jnp.float32)
    for k in range(K):
        conv = conv + jnp.einsum("blc,co->blo", x[:, k:k + L, :], cw[k],
                                 precision=hp)
    conv = jnp.maximum(conv + params["conv_b"], 0.0)
    xp = jnp.einsum("blc,cg->blg", conv, params["wih0"],
                    precision=hp) + params["b0"]

    def gates(g):
        return (jax.nn.sigmoid(g[:, :H]), jax.nn.sigmoid(g[:, H:2 * H]),
                jnp.tanh(g[:, 2 * H:3 * H]), jax.nn.sigmoid(g[:, 3 * H:]))

    zeros = jnp.zeros((L, H), jnp.float32)
    h0, c0, h1, c1 = zeros, zeros, zeros, zeros
    rows = []
    for t in range(B):
        g0 = xp[t] + jnp.dot(h0, params["whh0"], precision=hp)
        i, f, g, o = gates(g0)
        c0 = f * c0 + i * g
        h0 = o * jnp.tanh(c0)
        g1 = jnp.dot(jnp.concatenate([h0, h1], -1), params["w1cat"],
                     precision=hp) + params["b1"]
        i, f, g, o = gates(g1)
        c1 = f * c1 + i * g
        h1 = o * jnp.tanh(c1)
        rows.append(h1[L - 1])
    lasth = jnp.stack(rows, 0)
    logit = (jnp.dot(lasth, params["fc_w_pad"][:, :output_dim], precision=hp)
             + params["fc_b_pad"][:, :output_dim])
    return logit, (jnp.stack([h0, h1], 0), jnp.stack([c0, c1], 0))


if __name__ == "__main__":
    B, S, input_dim = 2, 16, 4
    hidden_dim, output_dim = 128, 3

    key = jax.random.PRNGKey(0)
    k_x, k_p = jax.random.split(key)
    x = jax.random.normal(k_x, (B, S, input_dim), dtype=jnp.float32)
    params = init_params(k_p, input_dim, hidden_dim, output_dim)

    logit, logit2, (h_n, c_n) = trend_market_analyzer_forward(
        x, params, output_dim=output_dim)
    jax.block_until_ready((logit, logit2, h_n, c_n))

    L = S - 8 + 1
    assert logit.shape == (B, output_dim)
    assert logit2.shape == (B, output_dim)
    assert h_n.shape == (2, L, hidden_dim)
    assert c_n.shape == (2, L, hidden_dim)

    ref_logit, (ref_hn, ref_cn) = reference_forward(x, params, output_dim)
    assert jnp.allclose(logit, ref_logit, atol=2e-2), "logit mismatch"
    assert jnp.allclose(h_n, ref_hn, atol=2e-2), "h_n mismatch"
    assert jnp.allclose(c_n, ref_cn, atol=2e-2), "c_n mismatch"

    print("KERNEL_OK")
</pallas_src>

<mosaic_0001>
module attributes {stable_mosaic.version = 11 : i64} {
  func.func @fused_forward_kernel(%arg0: memref<2x16x4xf32, #tpu.memory_space<vmem>>, %arg1: memref<8x4x64xf32, #tpu.memory_space<vmem>>, %arg2: memref<1x64xf32, #tpu.memory_space<vmem>>, %arg3: memref<64x512xf32, #tpu.memory_space<vmem>>, %arg4: memref<128x512xf32, #tpu.memory_space<vmem>>, %arg5: memref<1x512xf32, #tpu.memory_space<vmem>>, %arg6: memref<256x512xf32, #tpu.memory_space<vmem>>, %arg7: memref<1x512xf32, #tpu.memory_space<vmem>>, %arg8: memref<128x128xf32, #tpu.memory_space<vmem>>, %arg9: memref<1x128xf32, #tpu.memory_space<vmem>>, %arg10: memref<2x128xf32, #tpu.memory_space<vmem>>, %arg11: memref<2x9x128xf32, #tpu.memory_space<vmem>>, %arg12: memref<2x9x128xf32, #tpu.memory_space<vmem>>) attributes {dimension_semantics = [], scalar_prefetch = 0 : i64, scratch_operands = 0 : i64, tpu.core_type = #tpu.core_type<tc>} {
    %c0 = arith.constant 0 : index
    %c0_0 = arith.constant 0 : index
    %0 = vector.load %arg2[%c0, %c0_0] : memref<1x64xf32, #tpu.memory_space<vmem>>, vector<1x64xf32>
    %c0_1 = arith.constant 0 : index
    %c0_2 = arith.constant 0 : index
    %1 = vector.load %arg3[%c0_1, %c0_2] : memref<64x512xf32, #tpu.memory_space<vmem>>, vector<64x512xf32>
    %c0_3 = arith.constant 0 : index
    %c0_4 = arith.constant 0 : index
    %2 = vector.load %arg4[%c0_3, %c0_4] : memref<128x512xf32, #tpu.memory_space<vmem>>, vector<128x512xf32>
    %c0_5 = arith.constant 0 : index
    %c0_6 = arith.constant 0 : index
    %3 = vector.load %arg5[%c0_5, %c0_6] : memref<1x512xf32, #tpu.memory_space<vmem>>, vector<1x512xf32>
    %c0_7 = arith.constant 0 : index
    %c0_8 = arith.constant 0 : index
    %4 = vector.load %arg6[%c0_7, %c0_8] : memref<256x512xf32, #tpu.memory_space<vmem>>, vector<256x512xf32>
    %c0_9 = arith.constant 0 : index
    %c0_10 = arith.constant 0 : index
    %5 = vector.load %arg7[%c0_9, %c0_10] : memref<1x512xf32, #tpu.memory_space<vmem>>, vector<1x512xf32>
    %cst = arith.constant 0.000000e+00 : f32
    %6 = vector.broadcast %cst : f32 to vector<9x64xf32>
    %c0_11 = arith.constant 0 : index
    %c0_12 = arith.constant 0 : index
    %c0_13 = arith.constant 0 : index
    %7 = vector.load %arg0[%c0_11, %c0_12, %c0_13] : memref<2x16x4xf32, #tpu.memory_space<vmem>>, vector<1x9x4xf32>
    %8 = vector.shape_cast %7 : vector<1x9x4xf32> to vector<9x4xf32>
    %c0_14 = arith.constant 0 : index
    %c0_15 = arith.constant 0 : index
    %c0_16 = arith.constant 0 : index
    %9 = vector.load %arg1[%c0_14, %c0_15, %c0_16] : memref<8x4x64xf32, #tpu.memory_space<vmem>>, vector<1x4x64xf32>
    %10 = vector.shape_cast %9 : vector<1x4x64xf32> to vector<4x64xf32>
    %cst_17 = arith.constant dense<0.000000e+00> : vector<9x64xf32>
    %11 = tpu.matmul %8, %10, %cst_17 {dimension_numbers = #tpu.dot_dimension_numbers<[1], [0], [0], [1], [0, 0, 1, 1], [], []>} : vector<9x4xf32>, vector<4x64xf32>, vector<9x64xf32> -> vector<9x64xf32>
    %12 = arith.addf %6, %11 : vector<9x64xf32>
    %c0_18 = arith.constant 0 : index
    %c1 = arith.constant 1 : index
    %c0_19 = arith.constant 0 : index
    %13 = vector.load %arg0[%c0_18, %c1, %c0_19] : memref<2x16x4xf32, #tpu.memory_space<vmem>>, vector<1x9x4xf32>
    %14 = vector.shape_cast %13 : vector<1x9x4xf32> to vector<9x4xf32>
    %c1_20 = arith.constant 1 : index
    %c0_21 = arith.constant 0 : index
    %c0_22 = arith.constant 0 : index
    %15 = vector.load %arg1[%c1_20, %c0_21, %c0_22] : memref<8x4x64xf32, #tpu.memory_space<vmem>>, vector<1x4x64xf32>
    %16 = vector.shape_cast %15 : vector<1x4x64xf32> to vector<4x64xf32>
    %cst_23 = arith.constant dense<0.000000e+00> : vector<9x64xf32>
    %17 = tpu.matmul %14, %16, %cst_23 {dimension_numbers = #tpu.dot_dimension_numbers<[1], [0], [0], [1], [0, 0, 1, 1], [], []>} : vector<9x4xf32>, vector<4x64xf32>, vector<9x64xf32> -> vector<9x64xf32>
    %18 = arith.addf %12, %17 : vector<9x64xf32>
    %c0_24 = arith.constant 0 : index
    %c2 = arith.constant 2 : index
    %c0_25 = arith.constant 0 : index
    %19 = vector.load %arg0[%c0_24, %c2, %c0_25] : memref<2x16x4xf32, #tpu.memory_space<vmem>>, vector<1x9x4xf32>
    %20 = vector.shape_cast %19 : vector<1x9x4xf32> to vector<9x4xf32>
    %c2_26 = arith.constant 2 : index
    %c0_27 = arith.constant 0 : index
    %c0_28 = arith.constant 0 : index
    %21 = vector.load %arg1[%c2_26, %c0_27, %c0_28] : memref<8x4x64xf32, #tpu.memory_space<vmem>>, vector<1x4x64xf32>
    %22 = vector.shape_cast %21 : vector<1x4x64xf32> to vector<4x64xf32>
    %cst_29 = arith.constant dense<0.000000e+00> : vector<9x64xf32>
    %23 = tpu.matmul %20, %22, %cst_29 {dimension_numbers = #tpu.dot_dimension_numbers<[1], [0], [0], [1], [0, 0, 1, 1], [], []>} : vector<9x4xf32>, vector<4x64xf32>, vector<9x64xf32> -> vector<9x64xf32>
    %24 = arith.addf %18, %23 : vector<9x64xf32>
    %c0_30 = arith.constant 0 : index
    %c3 = arith.constant 3 : index
    %c0_31 = arith.constant 0 : index
    %25 = vector.load %arg0[%c0_30, %c3, %c0_31] : memref<2x16x4xf32, #tpu.memory_space<vmem>>, vector<1x9x4xf32>
    %26 = vector.shape_cast %25 : vector<1x9x4xf32> to vector<9x4xf32>
    %c3_32 = arith.constant 3 : index
    %c0_33 = arith.constant 0 : index
    %c0_34 = arith.constant 0 : index
    %27 = vector.load %arg1[%c3_32, %c0_33, %c0_34] : memref<8x4x64xf32, #tpu.memory_space<vmem>>, vector<1x4x64xf32>
    %28 = vector.shape_cast %27 : vector<1x4x64xf32> to vector<4x64xf32>
    %cst_35 = arith.constant dense<0.000000e+00> : vector<9x64xf32>
    %29 = tpu.matmul %26, %28, %cst_35 {dimension_numbers = #tpu.dot_dimension_numbers<[1], [0], [0], [1], [0, 0, 1, 1], [], []>} : vector<9x4xf32>, vector<4x64xf32>, vector<9x64xf32> -> vector<9x64xf32>
    %30 = arith.addf %24, %29 : vector<9x64xf32>
    %c0_36 = arith.constant 0 : index
    %c4 = arith.constant 4 : index
    %c0_37 = arith.constant 0 : index
    %31 = vector.load %arg0[%c0_36, %c4, %c0_37] : memref<2x16x4xf32, #tpu.memory_space<vmem>>, vector<1x9x4xf32>
    %32 = vector.shape_cast %31 : vector<1x9x4xf32> to vector<9x4xf32>
    %c4_38 = arith.constant 4 : index
    %c0_39 = arith.constant 0 : index
    %c0_40 = arith.constant 0 : index
    %33 = vector.load %arg1[%c4_38, %c0_39, %c0_40] : memref<8x4x64xf32, #tpu.memory_space<vmem>>, vector<1x4x64xf32>
    %34 = vector.shape_cast %33 : vector<1x4x64xf32> to vector<4x64xf32>
    %cst_41 = arith.constant dense<0.000000e+00> : vector<9x64xf32>
    %35 = tpu.matmul %32, %34, %cst_41 {dimension_numbers = #tpu.dot_dimension_numbers<[1], [0], [0], [1], [0, 0, 1, 1], [], []>} : vector<9x4xf32>, vector<4x64xf32>, vector<9x64xf32> -> vector<9x64xf32>
    %36 = arith.addf %30, %35 : vector<9x64xf32>
    %c0_42 = arith.constant 0 : index
    %c5 = arith.constant 5 : index
    %c0_43 = arith.constant 0 : index
    %37 = vector.load %arg0[%c0_42, %c5, %c0_43] : memref<2x16x4xf32, #tpu.memory_space<vmem>>, vector<1x9x4xf32>
    %38 = vector.shape_cast %37 : vector<1x9x4xf32> to vector<9x4xf32>
    %c5_44 = arith.constant 5 : index
    %c0_45 = arith.constant 0 : index
    %c0_46 = arith.constant 0 : index
    %39 = vector.load %arg1[%c5_44, %c0_45, %c0_46] : memref<8x4x64xf32, #tpu.memory_space<vmem>>, vector<1x4x64xf32>
    %40 = vector.shape_cast %39 : vector<1x4x64xf32> to vector<4x64xf32>
    %cst_47 = arith.constant dense<0.000000e+00> : vector<9x64xf32>
    %41 = tpu.matmul %38, %40, %cst_47 {dimension_numbers = #tpu.dot_dimension_numbers<[1], [0], [0], [1], [0, 0, 1, 1], [], []>} : vector<9x4xf32>, vector<4x64xf32>, vector<9x64xf32> -> vector<9x64xf32>
    %42 = arith.addf %36, %41 : vector<9x64xf32>
    %c0_48 = arith.constant 0 : index
    %c6 = arith.constant 6 : index
    %c0_49 = arith.constant 0 : index
    %43 = vector.load %arg0[%c0_48, %c6, %c0_49] : memref<2x16x4xf32, #tpu.memory_space<vmem>>, vector<1x9x4xf32>
    %44 = vector.shape_cast %43 : vector<1x9x4xf32> to vector<9x4xf32>
    %c6_50 = arith.constant 6 : index
    %c0_51 = arith.constant 0 : index
    %c0_52 = arith.constant 0 : index
    %45 = vector.load %arg1[%c6_50, %c0_51, %c0_52] : memref<8x4x64xf32, #tpu.memory_space<vmem>>, vector<1x4x64xf32>
    %46 = vector.shape_cast %45 : vector<1x4x64xf32> to vector<4x64xf32>
    %cst_53 = arith.constant dense<0.000000e+00> : vector<9x64xf32>
    %47 = tpu.matmul %44, %46, %cst_53 {dimension_numbers = #tpu.dot_dimension_numbers<[1], [0], [0], [1], [0, 0, 1, 1], [], []>} : vector<9x4xf32>, vector<4x64xf32>, vector<9x64xf32> -> vector<9x64xf32>
    %48 = arith.addf %42, %47 : vector<9x64xf32>
    %c0_54 = arith.constant 0 : index
    %c7 = arith.constant 7 : index
    %c0_55 = arith.constant 0 : index
    %49 = vector.load %arg0[%c0_54, %c7, %c0_55] : memref<2x16x4xf32, #tpu.memory_space<vmem>>, vector<1x9x4xf32>
    %50 = vector.shape_cast %49 : vector<1x9x4xf32> to vector<9x4xf32>
    %c7_56 = arith.constant 7 : index
    %c0_57 = arith.constant 0 : index
    %c0_58 = arith.constant 0 : index
    %51 = vector.load %arg1[%c7_56, %c0_57, %c0_58] : memref<8x4x64xf32, #tpu.memory_space<vmem>>, vector<1x4x64xf32>
    %52 = vector.shape_cast %51 : vector<1x4x64xf32> to vector<4x64xf32>
    %cst_59 = arith.constant dense<0.000000e+00> : vector<9x64xf32>
    %53 = tpu.matmul %50, %52, %cst_59 {dimension_numbers = #tpu.dot_dimension_numbers<[1], [0], [0], [1], [0, 0, 1, 1], [], []>} : vector<9x4xf32>, vector<4x64xf32>, vector<9x64xf32> -> vector<9x64xf32>
    %54 = arith.addf %48, %53 : vector<9x64xf32>
    %55 = vector.broadcast %0 : vector<1x64xf32> to vector<9x64xf32>
    %56 = arith.addf %54, %55 : vector<9x64xf32>
    %cst_60 = arith.constant 0.000000e+00 : f32
    %57 = vector.broadcast %cst_60 : f32 to vector<9x64xf32>
    %58 = arith.maximumf %56, %57 : vector<9x64xf32>
    %cst_61 = arith.constant dense<0.000000e+00> : vector<9x512xf32>
    %59 = tpu.matmul %58, %1, %cst_61 {dimension_numbers = #tpu.dot_dimension_numbers<[1], [0], [0], [1], [0, 0, 1, 1], [], []>} : vector<9x64xf32>, vector<64x512xf32>, vector<9x512xf32> -> vector<9x512xf32>
    %60 = vector.broadcast %3 : vector<1x512xf32> to vector<9x512xf32>
    %61 = arith.addf %59, %60 : vector<9x512xf32>
    %cst_62 = arith.constant 0.000000e+00 : f32
    %62 = vector.broadcast %cst_62 : f32 to vector<9x64xf32>
    %c1_63 = arith.constant 1 : index
    %c0_64 = arith.constant 0 : index
    %c0_65 = arith.constant 0 : index
    %63 = vector.load %arg0[%c1_63, %c0_64, %c0_65] : memref<2x16x4xf32, #tpu.memory_space<vmem>>, vector<1x9x4xf32>
    %64 = vector.shape_cast %63 : vector<1x9x4xf32> to vector<9x4xf32>
    %c0_66 = arith.constant 0 : index
    %c0_67 = arith.constant 0 : index
    %c0_68 = arith.constant 0 : index
    %65 = vector.load %arg1[%c0_66, %c0_67, %c0_68] : memref<8x4x64xf32, #tpu.memory_space<vmem>>, vector<1x4x64xf32>
    %66 = vector.shape_cast %65 : vector<1x4x64xf32> to vector<4x64xf32>
    %cst_69 = arith.constant dense<0.000000e+00> : vector<9x64xf32>
    %67 = tpu.matmul %64, %66, %cst_69 {dimension_numbers = #tpu.dot_dimension_numbers<[1], [0], [0], [1], [0, 0, 1, 1], [], []>} : vector<9x4xf32>, vector<4x64xf32>, vector<9x64xf32> -> vector<9x64xf32>
    %68 = arith.addf %62, %67 : vector<9x64xf32>
    %c1_70 = arith.constant 1 : index
    %c1_71 = arith.constant 1 : index
    %c0_72 = arith.constant 0 : index
    %69 = vector.load %arg0[%c1_70, %c1_71, %c0_72] : memref<2x16x4xf32, #tpu.memory_space<vmem>>, vector<1x9x4xf32>
    %70 = vector.shape_cast %69 : vector<1x9x4xf32> to vector<9x4xf32>
    %c1_73 = arith.constant 1 : index
    %c0_74 = arith.constant 0 : index
    %c0_75 = arith.constant 0 : index
    %71 = vector.load %arg1[%c1_73, %c0_74, %c0_75] : memref<8x4x64xf32, #tpu.memory_space<vmem>>, vector<1x4x64xf32>
    %72 = vector.shape_cast %71 : vector<1x4x64xf32> to vector<4x64xf32>
    %cst_76 = arith.constant dense<0.000000e+00> : vector<9x64xf32>
    %73 = tpu.matmul %70, %72, %cst_76 {dimension_numbers = #tpu.dot_dimension_numbers<[1], [0], [0], [1], [0, 0, 1, 1], [], []>} : vector<9x4xf32>, vector<4x64xf32>, vector<9x64xf32> -> vector<9x64xf32>
    %74 = arith.addf %68, %73 : vector<9x64xf32>
    %c1_77 = arith.constant 1 : index
    %c2_78 = arith.constant 2 : index
    %c0_79 = arith.constant 0 : index
    %75 = vector.load %arg0[%c1_77, %c2_78, %c0_79] : memref<2x16x4xf32, #tpu.memory_space<vmem>>, vector<1x9x4xf32>
    %76 = vector.shape_cast %75 : vector<1x9x4xf32> to vector<9x4xf32>
    %c2_80 = arith.constant 2 : index
    %c0_81 = arith.constant 0 : index
    %c0_82 = arith.constant 0 : index
    %77 = vector.load %arg1[%c2_80, %c0_81, %c0_82] : memref<8x4x64xf32, #tpu.memory_space<vmem>>, vector<1x4x64xf32>
    %78 = vector.shape_cast %77 : vector<1x4x64xf32> to vector<4x64xf32>
    %cst_83 = arith.constant dense<0.000000e+00> : vector<9x64xf32>
    %79 = tpu.matmul %76, %78, %cst_83 {dimension_numbers = #tpu.dot_dimension_numbers<[1], [0], [0], [1], [0, 0, 1, 1], [], []>} : vector<9x4xf32>, vector<4x64xf32>, vector<9x64xf32> -> vector<9x64xf32>
    %80 = arith.addf %74, %79 : vector<9x64xf32>
    %c1_84 = arith.constant 1 : index
    %c3_85 = arith.constant 3 : index
    %c0_86 = arith.constant 0 : index
    %81 = vector.load %arg0[%c1_84, %c3_85, %c0_86] : memref<2x16x4xf32, #tpu.memory_space<vmem>>, vector<1x9x4xf32>
    %82 = vector.shape_cast %81 : vector<1x9x4xf32> to vector<9x4xf32>
    %c3_87 = arith.constant 3 : index
    %c0_88 = arith.constant 0 : index
    %c0_89 = arith.constant 0 : index
    %83 = vector.load %arg1[%c3_87, %c0_88, %c0_89] : memref<8x4x64xf32, #tpu.memory_space<vmem>>, vector<1x4x64xf32>
    %84 = vector.shape_cast %83 : vector<1x4x64xf32> to vector<4x64xf32>
    %cst_90 = arith.constant dense<0.000000e+00> : vector<9x64xf32>
    %85 = tpu.matmul %82, %84, %cst_90 {dimension_numbers = #tpu.dot_dimension_numbers<[1], [0], [0], [1], [0, 0, 1, 1], [], []>} : vector<9x4xf32>, vector<4x64xf32>, vector<9x64xf32> -> vector<9x64xf32>
    %86 = arith.addf %80, %85 : vector<9x64xf32>
    %c1_91 = arith.constant 1 : index
    %c4_92 = arith.constant 4 : index
    %c0_93 = arith.constant 0 : index
    %87 = vector.load %arg0[%c1_91, %c4_92, %c0_93] : memref<2x16x4xf32, #tpu.memory_space<vmem>>, vector<1x9x4xf32>
    %88 = vector.shape_cast %87 : vector<1x9x4xf32> to vector<9x4xf32>
    %c4_94 = arith.constant 4 : index
    %c0_95 = arith.constant 0 : index
    %c0_96 = arith.constant 0 : index
    %89 = vector.load %arg1[%c4_94, %c0_95, %c0_96] : memref<8x4x64xf32, #tpu.memory_space<vmem>>, vector<1x4x64xf32>
    %90 = vector.shape_cast %89 : vector<1x4x64xf32> to vector<4x64xf32>
    %cst_97 = arith.constant dense<0.000000e+00> : vector<9x64xf32>
    %91 = tpu.matmul %88, %90, %cst_97 {dimension_numbers = #tpu.dot_dimension_numbers<[1], [0], [0], [1], [0, 0, 1, 1], [], []>} : vector<9x4xf32>, vector<4x64xf32>, vector<9x64xf32> -> vector<9x64xf32>
    %92 = arith.addf %86, %91 : vector<9x64xf32>
    %c1_98 = arith.constant 1 : index
    %c5_99 = arith.constant 5 : index
    %c0_100 = arith.constant 0 : index
    %93 = vector.load %arg0[%c1_98, %c5_99, %c0_100] : memref<2x16x4xf32, #tpu.memory_space<vmem>>, vector<1x9x4xf32>
    %94 = vector.shape_cast %93 : vector<1x9x4xf32> to vector<9x4xf32>
    %c5_101 = arith.constant 5 : index
    %c0_102 = arith.constant 0 : index
    %c0_103 = arith.constant 0 : index
    %95 = vector.load %arg1[%c5_101, %c0_102, %c0_103] : memref<8x4x64xf32, #tpu.memory_space<vmem>>, vector<1x4x64xf32>
    %96 = vector.shape_cast %95 : vector<1x4x64xf32> to vector<4x64xf32>
    %cst_104 = arith.constant dense<0.000000e+00> : vector<9x64xf32>
    %97 = tpu.matmul %94, %96, %cst_104 {dimension_numbers = #tpu.dot_dimension_numbers<[1], [0], [0], [1], [0, 0, 1, 1], [], []>} : vector<9x4xf32>, vector<4x64xf32>, vector<9x64xf32> -> vector<9x64xf32>
    %98 = arith.addf %92, %97 : vector<9x64xf32>
    %c1_105 = arith.constant 1 : index
    %c6_106 = arith.constant 6 : index
    %c0_107 = arith.constant 0 : index
    %99 = vector.load %arg0[%c1_105, %c6_106, %c0_107] : memref<2x16x4xf32, #tpu.memory_space<vmem>>, vector<1x9x4xf32>
    %100 = vector.shape_cast %99 : vector<1x9x4xf32> to vector<9x4xf32>
    %c6_108 = arith.constant 6 : index
    %c0_109 = arith.constant 0 : index
    %c0_110 = arith.constant 0 : index
    %101 = vector.load %arg1[%c6_108, %c0_109, %c0_110] : memref<8x4x64xf32, #tpu.memory_space<vmem>>, vector<1x4x64xf32>
    %102 = vector.shape_cast %101 : vector<1x4x64xf32> to vector<4x64xf32>
    %cst_111 = arith.constant dense<0.000000e+00> : vector<9x64xf32>
    %103 = tpu.matmul %100, %102, %cst_111 {dimension_numbers = #tpu.dot_dimension_numbers<[1], [0], [0], [1], [0, 0, 1, 1], [], []>} : vector<9x4xf32>, vector<4x64xf32>, vector<9x64xf32> -> vector<9x64xf32>
    %104 = arith.addf %98, %103 : vector<9x64xf32>
    %c1_112 = arith.constant 1 : index
    %c7_113 = arith.constant 7 : index
    %c0_114 = arith.constant 0 : index
    %105 = vector.load %arg0[%c1_112, %c7_113, %c0_114] : memref<2x16x4xf32, #tpu.memory_space<vmem>>, vector<1x9x4xf32>
    %106 = vector.shape_cast %105 : vector<1x9x4xf32> to vector<9x4xf32>
    %c7_115 = arith.constant 7 : index
    %c0_116 = arith.constant 0 : index
    %c0_117 = arith.constant 0 : index
    %107 = vector.load %arg1[%c7_115, %c0_116, %c0_117] : memref<8x4x64xf32, #tpu.memory_space<vmem>>, vector<1x4x64xf32>
    %108 = vector.shape_cast %107 : vector<1x4x64xf32> to vector<4x64xf32>
    %cst_118 = arith.constant dense<0.000000e+00> : vector<9x64xf32>
    %109 = tpu.matmul %106, %108, %cst_118 {dimension_numbers = #tpu.dot_dimension_numbers<[1], [0], [0], [1], [0, 0, 1, 1], [], []>} : vector<9x4xf32>, vector<4x64xf32>, vector<9x64xf32> -> vector<9x64xf32>
    %110 = arith.addf %104, %109 : vector<9x64xf32>
    %111 = vector.broadcast %0 : vector<1x64xf32> to vector<9x64xf32>
    %112 = arith.addf %110, %111 : vector<9x64xf32>
    %cst_119 = arith.constant 0.000000e+00 : f32
    %113 = vector.broadcast %cst_119 : f32 to vector<9x64xf32>
    %114 = arith.maximumf %112, %113 : vector<9x64xf32>
    %cst_120 = arith.constant dense<0.000000e+00> : vector<9x512xf32>
    %115 = tpu.matmul %114, %1, %cst_120 {dimension_numbers = #tpu.dot_dimension_numbers<[1], [0], [0], [1], [0, 0, 1, 1], [], []>} : vector<9x64xf32>, vector<64x512xf32>, vector<9x512xf32> -> vector<9x512xf32>
    %116 = vector.broadcast %3 : vector<1x512xf32> to vector<9x512xf32>
    %117 = arith.addf %115, %116 : vector<9x512xf32>
    %cst_121 = arith.constant 0.000000e+00 : f32
    %118 = vector.broadcast %cst_121 : f32 to vector<9x128xf32>
    %cst_122 = arith.constant dense<0.000000e+00> : vector<9x512xf32>
    %119 = tpu.matmul %118, %2, %cst_122 {dimension_numbers = #tpu.dot_dimension_numbers<[1], [0], [0], [1], [0, 0, 1, 1], [], []>} : vector<9x128xf32>, vector<128x512xf32>, vector<9x512xf32> -> vector<9x512xf32>
    %120 = arith.addf %61, %119 : vector<9x512xf32>
    %121 = vector.extract_strided_slice %120 {offsets = [0, 0], sizes = [9, 256], strides = [1, 1]} : vector<9x512xf32> to vector<9x256xf32>
    %122 = arith.negf %121 : vector<9x256xf32>
    %123 = math.exp %122 : vector<9x256xf32>
    %cst_123 = arith.constant 1.000000e+00 : f32
    %124 = vector.broadcast %cst_123 : f32 to vector<9x256xf32>
    %125 = arith.addf %124, %123 : vector<9x256xf32>
    %126 = arith.divf %124, %125 : vector<9x256xf32>
    %127 = vector.extract_strided_slice %120 {offsets = [0, 256], sizes = [9, 128], strides = [1, 1]} : vector<9x512xf32> to vector<9x128xf32>
    %128 = math.tanh %127 : vector<9x128xf32>
    %129 = vector.extract_strided_slice %120 {offsets = [0, 384], sizes = [9, 128], strides = [1, 1]} : vector<9x512xf32> to vector<9x128xf32>
    %130 = arith.negf %129 : vector<9x128xf32>
    %131 = math.exp %130 : vector<9x128xf32>
    %cst_124 = arith.constant 1.000000e+00 : f32
    %132 = vector.broadcast %cst_124 : f32 to vector<9x128xf32>
    %133 = arith.addf %132, %131 : vector<9x128xf32>
    %134 = arith.divf %132, %133 : vector<9x128xf32>
    %135 = vector.extract_strided_slice %126 {offsets = [0, 0], sizes = [9, 128], strides = [1, 1]} : vector<9x256xf32> to vector<9x128xf32>
    %136 = vector.extract_strided_slice %126 {offsets = [0, 128], sizes = [9, 128], strides = [1, 1]} : vector<9x256xf32> to vector<9x128xf32>
    %137 = arith.mulf %136, %118 : vector<9x128xf32>
    %138 = arith.mulf %135, %128 : vector<9x128xf32>
    %139 = arith.addf %137, %138 : vector<9x128xf32>
    %140 = math.tanh %139 : vector<9x128xf32>
    %141 = arith.mulf %134, %140 : vector<9x128xf32>
    %142 = tpu.concatenate %141, %118 in 1 : vector<9x128xf32>, vector<9x128xf32> -> vector<9x256xf32>
    %cst_125 = arith.constant dense<0.000000e+00> : vector<9x512xf32>
    %143 = tpu.matmul %142, %4, %cst_125 {dimension_numbers = #tpu.dot_dimension_numbers<[1], [0], [0], [1], [0, 0, 1, 1], [], []>} : vector<9x256xf32>, vector<256x512xf32>, vector<9x512xf32> -> vector<9x512xf32>
    %144 = vector.broadcast %5 : vector<1x512xf32> to vector<9x512xf32>
    %145 = arith.addf %143, %144 : vector<9x512xf32>
    %146 = vector.extract_strided_slice %145 {offsets = [0, 0], sizes = [9, 256], strides = [1, 1]} : vector<9x512xf32> to vector<9x256xf32>
    %147 = arith.negf %146 : vector<9x256xf32>
    %148 = math.exp %147 : vector<9x256xf32>
    %cst_126 = arith.constant 1.000000e+00 : f32
    %149 = vector.broadcast %cst_126 : f32 to vector<9x256xf32>
    %150 = arith.addf %149, %148 : vector<9x256xf32>
    %151 = arith.divf %149, %150 : vector<9x256xf32>
    %152 = vector.extract_strided_slice %145 {offsets = [0, 256], sizes = [9, 128], strides = [1, 1]} : vector<9x512xf32> to vector<9x128xf32>
    %153 = math.tanh %152 : vector<9x128xf32>
    %154 = vector.extract_strided_slice %145 {offsets = [0, 384], sizes = [9, 128], strides = [1, 1]} : vector<9x512xf32> to vector<9x128xf32>
    %155 = arith.negf %154 : vector<9x128xf32>
    %156 = math.exp %155 : vector<9x128xf32>
    %cst_127 = arith.constant 1.000000e+00 : f32
    %157 = vector.broadcast %cst_127 : f32 to vector<9x128xf32>
    %158 = arith.addf %157, %156 : vector<9x128xf32>
    %159 = arith.divf %157, %158 : vector<9x128xf32>
    %160 = vector.extract_strided_slice %151 {offsets = [0, 0], sizes = [9, 128], strides = [1, 1]} : vector<9x256xf32> to vector<9x128xf32>
    %161 = vector.extract_strided_slice %151 {offsets = [0, 128], sizes = [9, 128], strides = [1, 1]} : vector<9x256xf32> to vector<9x128xf32>
    %162 = arith.mulf %161, %118 : vector<9x128xf32>
    %163 = arith.mulf %160, %153 : vector<9x128xf32>
    %164 = arith.addf %162, %163 : vector<9x128xf32>
    %165 = math.tanh %164 : vector<9x128xf32>
    %166 = arith.mulf %159, %165 : vector<9x128xf32>
    %167 = vector.extract_strided_slice %166 {offsets = [8, 0], sizes = [1, 128], strides = [1, 1]} : vector<9x128xf32> to vector<1x128xf32>
    %cst_128 = arith.constant dense<0.000000e+00> : vector<9x512xf32>
    %168 = tpu.matmul %141, %2, %cst_128 {dimension_numbers = #tpu.dot_dimension_numbers<[1], [0], [0], [1], [0, 0, 1, 1], [], []>} : vector<9x128xf32>, vector<128x512xf32>, vector<9x512xf32> -> vector<9x512xf32>
    %169 = arith.addf %117, %168 : vector<9x512xf32>
    %170 = vector.extract_strided_slice %169 {offsets = [0, 0], sizes = [9, 256], strides = [1, 1]} : vector<9x512xf32> to vector<9x256xf32>
    %171 = arith.negf %170 : vector<9x256xf32>
    %172 = math.exp %171 : vector<9x256xf32>
    %cst_129 = arith.constant 1.000000e+00 : f32
    %173 = vector.broadcast %cst_129 : f32 to vector<9x256xf32>
    %174 = arith.addf %173, %172 : vector<9x256xf32>
    %175 = arith.divf %173, %174 : vector<9x256xf32>
    %176 = vector.extract_strided_slice %169 {offsets = [0, 256], sizes = [9, 128], strides = [1, 1]} : vector<9x512xf32> to vector<9x128xf32>
    %177 = math.tanh %176 : vector<9x128xf32>
    %178 = vector.extract_strided_slice %169 {offsets = [0, 384], sizes = [9, 128], strides = [1, 1]} : vector<9x512xf32> to vector<9x128xf32>
    %179 = arith.negf %178 : vector<9x128xf32>
    %180 = math.exp %179 : vector<9x128xf32>
    %cst_130 = arith.constant 1.000000e+00 : f32
    %181 = vector.broadcast %cst_130 : f32 to vector<9x128xf32>
    %182 = arith.addf %181, %180 : vector<9x128xf32>
    %183 = arith.divf %181, %182 : vector<9x128xf32>
    %184 = vector.extract_strided_slice %175 {offsets = [0, 0], sizes = [9, 128], strides = [1, 1]} : vector<9x256xf32> to vector<9x128xf32>
    %185 = vector.extract_strided_slice %175 {offsets = [0, 128], sizes = [9, 128], strides = [1, 1]} : vector<9x256xf32> to vector<9x128xf32>
    %186 = arith.mulf %185, %139 : vector<9x128xf32>
    %187 = arith.mulf %184, %177 : vector<9x128xf32>
    %188 = arith.addf %186, %187 : vector<9x128xf32>
    %189 = math.tanh %188 : vector<9x128xf32>
    %190 = arith.mulf %183, %189 : vector<9x128xf32>
    %191 = tpu.concatenate %190, %166 in 1 : vector<9x128xf32>, vector<9x128xf32> -> vector<9x256xf32>
    %cst_131 = arith.constant dense<0.000000e+00> : vector<9x512xf32>
    %192 = tpu.matmul %191, %4, %cst_131 {dimension_numbers = #tpu.dot_dimension_numbers<[1], [0], [0], [1], [0, 0, 1, 1], [], []>} : vector<9x256xf32>, vector<256x512xf32>, vector<9x512xf32> -> vector<9x512xf32>
    %193 = vector.broadcast %5 : vector<1x512xf32> to vector<9x512xf32>
    %194 = arith.addf %192, %193 : vector<9x512xf32>
    %195 = vector.extract_strided_slice %194 {offsets = [0, 0], sizes = [9, 256], strides = [1, 1]} : vector<9x512xf32> to vector<9x256xf32>
    %196 = arith.negf %195 : vector<9x256xf32>
    %197 = math.exp %196 : vector<9x256xf32>
    %cst_132 = arith.constant 1.000000e+00 : f32
    %198 = vector.broadcast %cst_132 : f32 to vector<9x256xf32>
    %199 = arith.addf %198, %197 : vector<9x256xf32>
    %200 = arith.divf %198, %199 : vector<9x256xf32>
    %201 = vector.extract_strided_slice %194 {offsets = [0, 256], sizes = [9, 128], strides = [1, 1]} : vector<9x512xf32> to vector<9x128xf32>
    %202 = math.tanh %201 : vector<9x128xf32>
    %203 = vector.extract_strided_slice %194 {offsets = [0, 384], sizes = [9, 128], strides = [1, 1]} : vector<9x512xf32> to vector<9x128xf32>
    %204 = arith.negf %203 : vector<9x128xf32>
    %205 = math.exp %204 : vector<9x128xf32>
    %cst_133 = arith.constant 1.000000e+00 : f32
    %206 = vector.broadcast %cst_133 : f32 to vector<9x128xf32>
    %207 = arith.addf %206, %205 : vector<9x128xf32>
    %208 = arith.divf %206, %207 : vector<9x128xf32>
    %209 = vector.extract_strided_slice %200 {offsets = [0, 0], sizes = [9, 128], strides = [1, 1]} : vector<9x256xf32> to vector<9x128xf32>
    %210 = vector.extract_strided_slice %200 {offsets = [0, 128], sizes = [9, 128], strides = [1, 1]} : vector<9x256xf32> to vector<9x128xf32>
    %211 = arith.mulf %210, %164 : vector<9x128xf32>
    %212 = arith.mulf %209, %202 : vector<9x128xf32>
    %213 = arith.addf %211, %212 : vector<9x128xf32>
    %214 = math.tanh %213 : vector<9x128xf32>
    %215 = arith.mulf %208, %214 : vector<9x128xf32>
    %216 = vector.extract_strided_slice %215 {offsets = [8, 0], sizes = [1, 128], strides = [1, 1]} : vector<9x128xf32> to vector<1x128xf32>
    %217 = tpu.concatenate %167, %216 in 0 : vector<1x128xf32>, vector<1x128xf32> -> vector<2x128xf32>
    %c0_134 = arith.constant 0 : index
    %c0_135 = arith.constant 0 : index
    %218 = vector.load %arg8[%c0_134, %c0_135] : memref<128x128xf32, #tpu.memory_space<vmem>>, vector<128x128xf32>
    %cst_136 = arith.constant dense<0.000000e+00> : vector<2x128xf32>
    %219 = tpu.matmul %217, %218, %cst_136 {dimension_numbers = #tpu.dot_dimension_numbers<[1], [0], [0], [1], [0, 0, 1, 1], [], []>} : vector<2x128xf32>, vector<128x128xf32>, vector<2x128xf32> -> vector<2x128xf32>
    %c0_137 = arith.constant 0 : index
    %c0_138 = arith.constant 0 : index
    %220 = vector.load %arg9[%c0_137, %c0_138] : memref<1x128xf32, #tpu.memory_space<vmem>>, vector<1x128xf32>
    %221 = vector.broadcast %220 : vector<1x128xf32> to vector<2x128xf32>
    %222 = arith.addf %219, %221 : vector<2x128xf32>
    %c0_139 = arith.constant 0 : index
    %c0_140 = arith.constant 0 : index
    %223 = vector.load %arg10[%c0_139, %c0_140] : memref<2x128xf32, #tpu.memory_space<vmem>>, vector<2x128xf32>
    tpu.vector_store %arg10[%c0_139, %c0_140], %222 {strides = array<i32>} : memref<2x128xf32, #tpu.memory_space<vmem>>, vector<2x128xf32>,
    %c0_141 = arith.constant 0 : index
    %c0_142 = arith.constant 0 : index
    %c0_143 = arith.constant 0 : index
    %224 = vector.load %arg11[%c0_141, %c0_142, %c0_143] : memref<2x9x128xf32, #tpu.memory_space<vmem>>, vector<1x9x128xf32>
    %225 = vector.shape_cast %224 : vector<1x9x128xf32> to vector<9x128xf32>
    %226 = vector.shape_cast %190 : vector<9x128xf32> to vector<1x9x128xf32>
    tpu.vector_store %arg11[%c0_141, %c0_142, %c0_143], %226 {strides = array<i32>} : memref<2x9x128xf32, #tpu.memory_space<vmem>>, vector<1x9x128xf32>,
    %c1_144 = arith.constant 1 : index
    %c0_145 = arith.constant 0 : index
    %c0_146 = arith.constant 0 : index
    %227 = vector.load %arg11[%c1_144, %c0_145, %c0_146] : memref<2x9x128xf32, #tpu.memory_space<vmem>>, vector<1x9x128xf32>
    %228 = vector.shape_cast %227 : vector<1x9x128xf32> to vector<9x128xf32>
    %229 = vector.shape_cast %215 : vector<9x128xf32> to vector<1x9x128xf32>
    tpu.vector_store %arg11[%c1_144, %c0_145, %c0_146], %229 {strides = array<i32>} : memref<2x9x128xf32, #tpu.memory_space<vmem>>, vector<1x9x128xf32>,
    %c0_147 = arith.constant 0 : index
    %c0_148 = arith.constant 0 : index
    %c0_149 = arith.constant 0 : index
    %230 = vector.load %arg12[%c0_147, %c0_148, %c0_149] : memref<2x9x128xf32, #tpu.memory_space<vmem>>, vector<1x9x128xf32>
    %231 = vector.shape_cast %230 : vector<1x9x128xf32> to vector<9x128xf32>
    %232 = vector.shape_cast %188 : vector<9x128xf32> to vector<1x9x128xf32>
    tpu.vector_store %arg12[%c0_147, %c0_148, %c0_149], %232 {strides = array<i32>} : memref<2x9x128xf32, #tpu.memory_space<vmem>>, vector<1x9x128xf32>,
    %c1_150 = arith.constant 1 : index
    %c0_151 = arith.constant 0 : index
    %c0_152 = arith.constant 0 : index
    %233 = vector.load %arg12[%c1_150, %c0_151, %c0_152] : memref<2x9x128xf32, #tpu.memory_space<vmem>>, vector<1x9x128xf32>
    %234 = vector.shape_cast %233 : vector<1x9x128xf32> to vector<9x128xf32>
    %235 = vector.shape_cast %213 : vector<9x128xf32> to vector<1x9x128xf32>
    tpu.vector_store %arg12[%c1_150, %c0_151, %c0_152], %235 {strides = array<i32>} : memref<2x9x128xf32, #tpu.memory_space<vmem>>, vector<1x9x128xf32>,
    return
  }
}

</mosaic_0001>

<bundles_post_ra>
// kernel: trend_market_analyzer_forward.1
= control target key start
LH: loop header
LB: loop body
LE: loop exit
PB: predicated region body
PF: predicated region fallthrough
CT: control target
= control target key end

     0   :  { %18 = vsyncpa [#allocation3], 0  ;;  %s4890_s0 = inlined_call_operand.vmem [shape: f32[2,16,4], index: 0, kind: input, shape index: {}]   ;;  %s4891_s1 = inlined_call_operand.vmem [shape: f32[8,4,64], index: 1, kind: input, shape index: {}]   ;;  %s4892_s2 = inlined_call_operand.vmem [shape: f32[1,64], index: 2, kind: input, shape index: {}]   ;;  %s4893_s3 = inlined_call_operand.hbm [shape: f32[64,512], index: 3, kind: input, shape index: {}]   ;;  %s4894_s4 = inlined_call_operand.hbm [shape: f32[128,512], index: 4, kind: input, shape index: {}]   ;;  %s4895_s5 = inlined_call_operand.vmem [shape: f32[1,512], index: 5, kind: input, shape index: {}]   ;;  %s4896_s6 = inlined_call_operand.hbm [shape: f32[256,512], index: 6, kind: input, shape index: {}]   ;;  %s4897_s7 = inlined_call_operand.vmem [shape: f32[1,512], index: 7, kind: input, shape index: {}]   ;;  %s4898_s8 = inlined_call_operand.hbm [shape: f32[128,128], index: 8, kind: input, shape index: {}]   ;;  %s4899_s9 = inlined_call_operand.vmem [shape: f32[1,128], index: 9, kind: input, shape index: {}]   ;;  %s4900_s10 = inlined_call_operand.vmem [shape: f32[2,128], index: 10, kind: output, shape index: {0}]   ;;  %s4901_s11 = inlined_call_operand.vmem [shape: f32[2,9,128], index: 11, kind: output, shape index: {1}]   ;;  %s4902_s12 = inlined_call_operand.vmem [shape: f32[2,9,128], index: 12, kind: output, shape index: {2}]  }
   0x1   :  { %19 = vsyncpa [#allocation5], 0 }
   0x2   :  { %20 = vsyncpa [#allocation8], 0  ;;  %s3552_s21 = smov [#allocation4]   ;;  %s3553_s23 = smov [#allocation2]  }
   0x3   :  { %s44_s22 = sshll.u32 %s3552_s21, 4  ;;  %s32_s24 = sshll.u32 %s3553_s23, 4  ;;  %s45_s22 = int_to_ptr.vmem [resolvable:$true] %s44_s22  ;;  %s33_s24 = int_to_ptr.vmem [resolvable:$true] %s32_s24 }
   0x4   :  { %s3474_s25 = scalar_lea.vmem %s45_s22, 8192  ;;  %p3479_p1 = scmp.lt.s32.totalorder %s45_s22, %s45_s22 }
   0x5   :  { %p3475_p0 = scmp.ne.s32.totalorder %s45_s22, %s3474_s25  ;;  %p3480_p2 = scmp.lt.s32.totalorder %s3474_s25, %s3474_s25 }
   0x7   :  { %p3481_p3 = por %p3480_p2, %p3479_p1 }
   0x9   :  { %p3482_p4 = pnand %p3481_p3, %p3475_p0 }
   0xb   :  { %3485 = shalt.err (!%p3482_p4)
}
   0xc   :  { %s3554_s26 = smov 512   ;;  %s3555_s27 = smov 32  }
   0xd   :  { %50 = dma.hbm_to_vmem [thread:$0]  %s4894_s4, 8192, %s45_s22, [#allocation5], %s3554_s26, %s3554_s26, %s3555_s27  }
   0xe   :  { %s3494_s30 = scalar_lea.vmem %s33_s24, 4096  ;;  %p3499_p6 = scmp.lt.s32.totalorder %s33_s24, %s33_s24 }
   0xf   :  { %p3495_p5 = scmp.ne.s32.totalorder %s33_s24, %s3494_s30  ;;  %p3500_p7 = scmp.lt.s32.totalorder %s3494_s30, %s3494_s30 }
  0x11   :  { %p3501_p8 = por %p3500_p7, %p3499_p6 }
  0x13   :  { %p3502_p9 = pnand %p3501_p8, %p3495_p5 }
  0x15   :  { %3505 = shalt.err (!%p3502_p9)
}
  0x16   :  { %38 = dma.hbm_to_vmem [thread:$0]  %s4893_s3, 4096, %s33_s24, [#allocation3], %s3554_s26, %s3554_s26, %s3555_s27  }
  0x17   :  { %s3556_s15 = smov [#allocation6]   ;;  %s3557_s17 = smov [#allocation7]  }
  0x18   :  { %s58_s16 = sshll.u32 %s3556_s15, 4  ;;  %s72_s18 = sshll.u32 %s3557_s17, 4  ;;  %s59_s16 = int_to_ptr.vmem [resolvable:$true] %s58_s16  ;;  %s73_s18 = int_to_ptr.vmem [resolvable:$true] %s72_s18 }
  0x19   :  { %s3514_s19 = scalar_lea.vmem %s59_s16, 16384  ;;  %p3519_p11 = scmp.lt.s32.totalorder %s59_s16, %s59_s16 }
  0x1a   :  { %p3515_p10 = scmp.ne.s32.totalorder %s59_s16, %s3514_s19  ;;  %p3520_p12 = scmp.lt.s32.totalorder %s3514_s19, %s3514_s19 }
  0x1c   :  { %p3521_p13 = por %p3520_p12, %p3519_p11 }
  0x1e   :  { %p3522_p0 = pnand %p3521_p13, %p3515_p10 }
  0x20   :  { %3525 = shalt.err (!%p3522_p0)
}
  0x21   :  { %64 = dma.hbm_to_vmem [thread:$0]  %s4896_s6, 16384, %s59_s16, [#allocation5], %s3554_s26, %s3554_s26, %s3555_s27  }
  0x22   :  { %s3534_s21 = scalar_lea.vmem %s73_s18, 2048  ;;  %p3539_p2 = scmp.lt.s32.totalorder %s73_s18, %s73_s18 }
  0x23   :  { %p3535_p1 = scmp.ne.s32.totalorder %s73_s18, %s3534_s21  ;;  %p3540_p3 = scmp.lt.s32.totalorder %s3534_s21, %s3534_s21 }
  0x25   :  { %p3541_p4 = por %p3540_p3, %p3539_p2 }
  0x27   :  { %p3542_p5 = pnand %p3541_p4, %p3535_p1 }
  0x29   :  { %3545 = shalt.err (!%p3542_p5)
}
  0x2a   :  { %s3558_s3 = smov 128   ;;  %s3559_s22 = smov 8  }
  0x2b   :  { %78 = dma.hbm_to_vmem [thread:$0]  %s4898_s8, 2048, %s73_s18, [#allocation8], %s3558_s3, %s3558_s3, %s3559_s22  }
  0x2c   :  { %3546 = dma.done.wait [#allocation3], 4096  }
  0x2d   :  { %3547 = vsyncadd [#allocation3], 4294963200 }
  0x2e   :  { %3548 = dma.done.wait [#allocation5], 24576  }
  0x2f   :  { %3549 = vsyncadd [#allocation5], 4294942720 }
  0x30   :  { %3550 = dma.done.wait [#allocation8], 2048  }
  0x31   :  { %3551 = vsyncadd [#allocation8], 4294965248  ;;  %vm334_vm0 = vcmask 1043456   ;;  %vm327_vm1 = vcmask 31744   ;;  %v3039_v0 = vld [vmem:[%s4891_s1 + $0x4] sm:$0xf] }
  0x32   :  { %v323_v1 = vld [vmem:[%s4890_s0 + $0x1] sm:$0xff]  ;;  %v324_v2 = vld [vmem:[%s4890_s0 + $0x9] sm:$0x1]  ;;  %3213 = vmatprep.subr.msk.mxu0 %vm334_vm0, %v3039_v0  ;;  %v3667_v6 = vld [vmem:[%s4891_s1 + $0xc] sm:$0xf]  ;;  %v4903_v41 = vmov 0.0  }
  0x33   :  { %3215 = vmatprep.mubr.msk.f32.mxu0 %vm327_vm1, %v323_v1  ;;  %v3653_v3 = vld [vmem:[%s4891_s1] sm:$0xf]  ;;  %3214 = vmatpush3.msk.msra.mxu0 %vm334_vm0, %v3039_v0  ;;  %v3662_v5 = vld [vmem:[%s4891_s1 + $0x8] sm:$0xf]  ;;  %v3697_v11 = vld [vmem:[%s4891_s1 + $0x10] sm:$0xf] }
  0x34   :  { %v320_v4 = vld [vmem:[%s4890_s0] sm:$0xff]  ;;  %3216 = vmatmul.mubr.msk.f32.vlgmr.msra.gmra.mxu0 %vm327_vm1, %v324_v2  ;;  %3218 = vmatprep.subr.msk.mxu0 %vm334_vm0, %v3653_v3  ;;  %v321_v8 = vld [vmem:[%s4890_s0 + $0x8] sm:$0x1]  ;;  %v588_v9 = vld [vmem:[%s4890_s0 + $0xb] sm:$0x1]  ;;  %vm1068_vm2 = vcmask 523264  }
  0x35   :  { %v587_v7 = vld [vmem:[%s4890_s0 + $0x3] sm:$0xff]  ;;  %3219 = vmatpush3.msk.msra.mxu0 %vm334_vm0, %v3653_v3  ;;  %3220 = vmatprep.mubr.msk.f32.mxu0 %vm327_vm1, %v320_v4  ;;  %v3702_v12 = vld [vmem:[%s4891_s1 + $0x14] sm:$0xf]  ;;  %v768_v15 = vld [vmem:[%s4890_s0 + $0xd] sm:$0x1]  ;;  %vm3561_vm3 = vmmov 0  }
  0x36   :  { %3223 = vmatprep.subr.msk.mxu0 %vm334_vm0, %v3662_v5  ;;  %3228 = vmatprep.subr.msk.mxu1 %vm334_vm0, %v3667_v6  ;;  %v497_v10 = vld [vmem:[%s4890_s0 + $0x2] sm:$0xff]  ;;  %v498_v14 = vld [vmem:[%s4890_s0 + $0xa] sm:$0x1]  ;;  %v3731_v17 = vld [vmem:[%s4891_s1 + $0x18] sm:$0xf]  ;;  %vm2918_vm4 = vcmask 1040384  }
  0x37   :  { %3229 = vmatpush3.msk.msra.mxu1 %vm334_vm0, %v3667_v6  ;;  %3230 = vmatprep.mubr.msk.f32.mxu1 %vm327_vm1, %v587_v7  ;;  %v767_v13 = vld [vmem:[%s4890_s0 + $0x5] sm:$0xff]  ;;  %v3736_v18 = vld [vmem:[%s4891_s1 + $0x1c] sm:$0xf]  ;;  %v948_v21 = vld [vmem:[%s4890_s0 + $0xf] sm:$0x1] }
  0x38   :  { %3221 = vmatmul.mubr.msk.f32.vlgmr.msra.gmra.mxu0 %vm327_vm1, %v321_v8  ;;  %3231 = vmatmul.mubr.msk.f32.vlgmr.msra.gmra.mxu1 %vm327_vm1, %v588_v9  ;;  %v677_v16 = vld [vmem:[%s4890_s0 + $0x4] sm:$0xff]  ;;  %v678_v20 = vld [vmem:[%s4890_s0 + $0xc] sm:$0x1]  ;;  %v858_v23 = vld [vmem:[%s4890_s0 + $0xe] sm:$0x1] }
  0x39   :  { %3224 = vmatpush3.msk.msra.mxu0 %vm334_vm0, %v3662_v5  ;;  %3225 = vmatprep.mubr.msk.f32.mxu0 %vm327_vm1, %v497_v10  ;;  %v947_v19 = vld [vmem:[%s4890_s0 + $0x7] sm:$0xff]  ;;  %v3775_v40 = vld [vmem:[#allocation2 + $0xf8] sm:$0xff] }
  0x3a   :  { %3233 = vmatprep.subr.msk.mxu0 %vm334_vm0, %v3697_v11  ;;  %3238 = vmatprep.subr.msk.mxu1 %vm334_vm0, %v3702_v12  ;;  %v857_v22 = vld [vmem:[%s4890_s0 + $0x6] sm:$0xff]  ;;  %v3077_v42 = vld [vmem:[%s4890_s0 + $0x11] sm:$0xff]  ;;  %v3078_v43 = vld [vmem:[%s4890_s0 + $0x19] sm:$0x1] }
  0x3b   :  { %3239 = vmatpush3.msk.msra.mxu1 %vm334_vm0, %v3702_v12  ;;  %3240 = vmatprep.mubr.msk.f32.mxu1 %vm327_vm1, %v767_v13  ;;  %v123_v24 = vld [vmem:[#allocation2 + $0xe8] sm:$0xff]  ;;  %v122_v25 = vld [vmem:[#allocation2 + $0xe0] sm:$0xff]  ;;  %v3085_v44 = vld [vmem:[%s4890_s0 + $0x12] sm:$0xff] }
  0x3c   :  { %3226 = vmatmul.mubr.msk.f32.vlgmr.msra.gmra.mxu0 %vm327_vm1, %v498_v14  ;;  %3241 = vmatmul.mubr.msk.f32.vlgmr.msra.gmra.mxu1 %vm327_vm1, %v768_v15  ;;  %v119_v26 = vld [vmem:[#allocation2 + $0xc8] sm:$0xff]  ;;  %v118_v27 = vld [vmem:[#allocation2 + $0xc0] sm:$0xff]  ;;  %v3086_v45 = vld [vmem:[%s4890_s0 + $0x1a] sm:$0x1] }
  0x3d   :  { %3234 = vmatpush3.msk.msra.mxu0 %vm334_vm0, %v3697_v11  ;;  %3235 = vmatprep.mubr.msk.f32.mxu0 %vm327_vm1, %v677_v16  ;;  %v115_v28 = vld [vmem:[#allocation2 + $0xa8] sm:$0xff]  ;;  %v114_v29 = vld [vmem:[#allocation2 + $0xa0] sm:$0xff]  ;;  %v3095_v46 = vld [vmem:[%s4890_s0 + $0x14] sm:$0xff] }
  0x3e   :  { %3243 = vmatprep.subr.msk.mxu0 %vm334_vm0, %v3731_v17  ;;  %3248 = vmatprep.subr.msk.mxu1 %vm334_vm0, %v3736_v18  ;;  %v111_v30 = vld [vmem:[#allocation2 + $0x88] sm:$0xff]  ;;  %v110_v31 = vld [vmem:[#allocation2 + $0x80] sm:$0xff]  ;;  %v3096_v47 = vld [vmem:[%s4890_s0 + $0x1c] sm:$0x1] }
  0x3f   :  { %3249 = vmatpush3.msk.msra.mxu1 %vm334_vm0, %v3736_v18  ;;  %3250 = vmatprep.mubr.msk.f32.mxu1 %vm327_vm1, %v947_v19  ;;  %v107_v32 = vld [vmem:[#allocation2 + $0x68] sm:$0xff]  ;;  %v106_v33 = vld [vmem:[#allocation2 + $0x60] sm:$0xff]  ;;  %v3105_v48 = vld [vmem:[%s4890_s0 + $0x16] sm:$0xff] }
  0x40   :  { %3236 = vmatmul.mubr.msk.f32.vlgmr.msra.gmra.mxu0 %vm327_vm1, %v678_v20  ;;  %3251 = vmatmul.mubr.msk.f32.vlgmr.msra.gmra.mxu1 %vm327_vm1, %v948_v21  ;;  %v103_v34 = vld [vmem:[#allocation2 + $0x48] sm:$0xff]  ;;  %v102_v35 = vld [vmem:[#allocation2 + $0x40] sm:$0xff]  ;;  %v3106_v49 = vld [vmem:[%s4890_s0 + $0x1e] sm:$0x1] }
  0x41   :  { %3244 = vmatpush3.msk.msra.mxu0 %vm334_vm0, %v3731_v17  ;;  %3245 = vmatprep.mubr.msk.f32.mxu0 %vm327_vm1, %v857_v22  ;;  %v99_v36 = vld [vmem:[#allocation2 + $0x28] sm:$0xff]  ;;  %v98_v37 = vld [vmem:[#allocation2 + $0x20] sm:$0xff] }
  0x42   :  { %3253 = vmatprep.subr.msk.mxu0 %vm334_vm0, %v3039_v0  ;;  %1091 = vmatprep.subr.mxu1 %v123_v24  ;;  %v95_v38 = vld [vmem:[#allocation2 + $0x8] sm:$0xff]  ;;  %v94_v39 = vld [vmem:[#allocation2] sm:$0xff] }
  0x43   :  { %1092 = vmatpush1.msra.mxu1 %v122_v25  ;;  %1139 = vmatprep.mubr.f32.mxu1 %v4903_v41  ;;  %v3825_v20 = vld [vmem:[%s4892_s2] ss:$0 sm:$0xff] }
  0x44   :  { %3246 = vmatmul.mubr.msk.f32.vlgmr.msra.gmra.mxu0 %vm327_vm1, %v858_v23  ;;  %1093 = vmatprep.subr.mxu1 %v119_v26 }
  0x45   :  { %3254 = vmatpush3.msk.msra.mxu0 %vm334_vm0, %v3039_v0  ;;  %1094 = vmatpush1.msra.mxu1 %v118_v27 }
  0x46   :  { %3263 = vmatprep.subr.msk.mxu0 %vm334_vm0, %v3662_v5  ;;  %1095 = vmatprep.subr.mxu1 %v115_v28 }
  0x47   :  { %1096 = vmatpush1.msra.mxu1 %v114_v29  ;;  %3255 = vmatprep.mubr.msk.f32.mxu0 %vm327_vm1, %v3077_v42  ;;  %v3075_v42 = vld [vmem:[%s4890_s0 + $0x10] sm:$0xff] }
  0x48   :  { %1097 = vmatprep.subr.mxu1 %v111_v30  ;;  %3256 = vmatmul.mubr.msk.f32.vlgmr.msra.gmra.mxu0 %vm327_vm1, %v3078_v43  ;;  %v3076_v43 = vld [vmem:[%s4890_s0 + $0x18] sm:$0x1] }
  0x49   :  { %1098 = vmatpush1.msra.mxu1 %v110_v31  ;;  %3264 = vmatpush3.msk.msra.mxu0 %vm334_vm0, %v3662_v5 }
  0x4a   :  { %1099 = vmatprep.subr.mxu1 %v107_v32  ;;  %3273 = vmatprep.subr.msk.mxu0 %vm334_vm0, %v3697_v11 }
  0x4b   :  { %1100 = vmatpush1.msra.mxu1 %v106_v33  ;;  %3265 = vmatprep.mubr.msk.f32.mxu0 %vm327_vm1, %v3085_v44  ;;  %v3091_v44 = vld [vmem:[%s4890_s0 + $0x1b] sm:$0x1] }
  0x4c   :  { %1101 = vmatprep.subr.mxu1 %v103_v34  ;;  %3266 = vmatmul.mubr.msk.f32.vlgmr.msra.gmra.mxu0 %vm327_vm1, %v3086_v45  ;;  %v3100_v45 = vld [vmem:[%s4890_s0 + $0x15] sm:$0xff] }
  0x4d   :  { %1102 = vmatpush1.msra.mxu1 %v102_v35  ;;  %3274 = vmatpush3.msk.msra.mxu0 %vm334_vm0, %v3697_v11 }
  0x4e   :  { %1103 = vmatprep.subr.mxu1 %v99_v36  ;;  %3283 = vmatprep.subr.msk.mxu0 %vm334_vm0, %v3731_v17 }
  0x4f   :  { %1104 = vmatpush1.msra.mxu1 %v98_v37  ;;  %3275 = vmatprep.mubr.msk.f32.mxu0 %vm327_vm1, %v3095_v46  ;;  %v3110_v46 = vld [vmem:[%s4890_s0 + $0x17] sm:$0xff] }
  0x50   :  { %1105 = vmatprep.subr.mxu1 %v95_v38  ;;  %3276 = vmatmul.mubr.msk.f32.vlgmr.msra.gmra.mxu0 %vm327_vm1, %v3096_v47 }
  0x51   :  { %1106 = vmatpush1.msra.mxu1 %v94_v39  ;;  %3284 = vmatpush3.msk.msra.mxu0 %vm334_vm0, %v3731_v17 }
  0x52   :  { %1168 = vmatprep.subr.mxu1 %v3775_v40  ;;  %1932 = vmatprep.subr.mxu0 %v123_v24  ;;  %v3829_v24 = vld [vmem:[#allocation2 + $0xf0] sm:$0xff] }
  0x53   :  { %3285 = vmatprep.mubr.msk.f32.mxu0 %vm327_vm1, %v3105_v48 }
  0x54   :  { %3286 = vmatmul.mubr.msk.f32.vlgmr.msra.gmra.mxu0 %vm327_vm1, %v3106_v49 }
  0x55   :  { %1933 = vmatpush1.msra.mxu0 %v122_v25  ;;  %1980 = vmatprep.mubr.f32.mxu0 %v4903_v41  ;;  %v3831_v25 = vld [vmem:[#allocation2 + $0xd8] sm:$0xff] }
  0x56   :  { %1934 = vmatprep.subr.mxu0 %v119_v26  ;;  %v120_v26 = vld [vmem:[#allocation2 + $0xd0] sm:$0xff] }
  0x57   :  { %1935 = vmatpush1.msra.mxu0 %v118_v27  ;;  %v117_v27 = vld [vmem:[#allocation2 + $0xb8] sm:$0xff] }
  0x58   :  { %1936 = vmatprep.subr.mxu0 %v115_v28 }
  0x59   :  { %1937 = vmatpush1.msra.mxu0 %v114_v29  ;;  %v116_v29 = vld [vmem:[#allocation2 + $0xb0] sm:$0xff] }
  0x5a   :  { %1938 = vmatprep.subr.mxu0 %v111_v30  ;;  %v113_v30 = vld [vmem:[#allocation2 + $0x98] sm:$0xff] }
  0x5b   :  { %1939 = vmatpush1.msra.mxu0 %v110_v31  ;;  %v112_v31 = vld [vmem:[#allocation2 + $0x90] sm:$0xff] }
  0x5c   :  { %1940 = vmatprep.subr.mxu0 %v107_v32  ;;  %v109_v32 = vld [vmem:[#allocation2 + $0x78] sm:$0xff] }
  0x5d   :  { %1941 = vmatpush1.msra.mxu0 %v106_v33  ;;  %v108_v33 = vld [vmem:[#allocation2 + $0x70] sm:$0xff] }
  0x5e   :  { %1942 = vmatprep.subr.mxu0 %v103_v34  ;;  %v105_v34 = vld [vmem:[#allocation2 + $0x58] sm:$0xff] }
  0x5f   :  { %1943 = vmatpush1.msra.mxu0 %v102_v35  ;;  %v104_v35 = vld [vmem:[#allocation2 + $0x50] sm:$0xff] }
  0x60   :  { %1944 = vmatprep.subr.mxu0 %v99_v36  ;;  %v101_v36 = vld [vmem:[#allocation2 + $0x38] sm:$0xff] }
  0x61   :  { %1945 = vmatpush1.msra.mxu0 %v98_v37  ;;  %v100_v37 = vld [vmem:[#allocation2 + $0x30] sm:$0xff] }
  0x62   :  { %1946 = vmatprep.subr.mxu0 %v95_v38  ;;  %v97_v38 = vld [vmem:[#allocation2 + $0x18] sm:$0xff] }
  0x63   :  { %1947 = vmatpush1.msra.mxu0 %v94_v39  ;;  %v96_v39 = vld [vmem:[#allocation2 + $0x10] sm:$0xff] }
  0xf4   :  { %v3217_v50 = vpop.f32.mrf.mxu0 }
  0xf6   :  { %v404_v51 = vpop.f32.mrf.mxu0 }
  0xf8   :  { %v3222_v52 = vpop.f32.mrf.mxu0  ;;  %v3232_v53 = vpop.f32.mrf.mxu1 }
  0xf9   :  { %v494_v56 = vadd.f32 %v3222_v52, %v3217_v50 }
  0xfa   :  { %v488_v54 = vpop.f32.mrf.mxu0  ;;  %v666_v55 = vpop.f32.mrf.mxu1 }
  0xfb   :  { %v489_v59 = vadd.f32 %v488_v54, %v404_v51 }
  0xfc   :  { %v3227_v57 = vpop.f32.mrf.mxu0  ;;  %v3242_v58 = vpop.f32.mrf.mxu1 }
  0xfd   :  { %v586_v60 = vadd.f32 %v3227_v57, %v494_v56 }
  0xfe   :  { %v576_v61 = vpop.f32.mrf.mxu0  ;;  %v846_v1 = vpop.f32.mrf.mxu1 }
  0xff   :  { %v676_v62 = vadd.f32 %v3232_v53, %v586_v60  ;;  %v585_v63 = vadd.f32 %v576_v61, %v489_v59 }
 0x100   :  { %v3237_v0 = vpop.f32.mrf.mxu0  ;;  %v3252_v10 = vpop.f32.mrf.mxu1 }
 0x101   :  { %v675_v2 = vadd.f32 %v666_v55, %v585_v63  ;;  %v766_v4 = vadd.f32 %v3237_v0, %v676_v62 }
 0x102   :  { %v756_v5 = vpop.f32.mrf.mxu0  ;;  %v1026_v16 = vpop.f32.mrf.mxu1 }
 0x103   :  { %v856_v7 = vadd.f32 %v3242_v58, %v766_v4  ;;  %v765_v8 = vadd.f32 %v756_v5, %v675_v2 }
 0x104   :  { %v3247_v9 = vpop.f32.mrf.mxu0 }
 0x105   :  { %v855_v11 = vadd.f32 %v846_v1, %v765_v8  ;;  %v946_v13 = vadd.f32 %v3247_v9, %v856_v7 }
 0x106   :  { %v936_v14 = vpop.f32.mrf.mxu0 }
 0x107   :  { %v945_v15 = vadd.f32 %v936_v14, %v855_v11  ;;  %v1036_v17 = vadd.f32 %v3252_v10, %v946_v13 }
 0x108   :  { %v3257_v49 = vpop.f32.mrf.mxu0 }
 0x109   :  { %v1035_v19 = vadd.f32 %v1026_v16, %v945_v15  ;;  %v1044_v22 = vadd.f32 %v3825_v20, %v1036_v17 }
 0x10a   :  { %v1306_v51 = vpop.f32.mrf.mxu0 }
 0x10b   :  { %v1043_v21 = vadd.f32 %v3825_v20, %v1035_v19  ;;  %v1046_v28 = vmax.f32 %v1044_v22, 0.0 }
 0x10c   :  { %v3267_v54 = vpop.f32.mrf.mxu0 }
 0x10d   :  { %v1045_v23 = vmax.f32 %v1043_v21, 0.0 }
 0x10e   :  { %v1470_v57 = vpop.f32.mrf.mxu0 }
 0x10f   :  { %3071 = vmatmul.mubr.msk.f32.vlgmr.msra.gmra.mxu1 %vm1068_vm2, %v1045_v23 }
 0x110   :  { %1169 = vmatpush1.msra.mxu1 %v3829_v24  ;;  %1145 = vmatprep.mubr.f32.mxu1 %v4903_v41  ;;  %v3277_v60 = vpop.f32.mrf.mxu0 }
 0x111   :  { %1170 = vmatprep.subr.mxu1 %v3831_v25 }
 0x112   :  { %1171 = vmatpush1.msra.mxu1 %v120_v26  ;;  %v1640_v2 = vpop.f32.mrf.mxu0 }
 0x113   :  { %1172 = vmatprep.subr.mxu1 %v117_v27  ;;  %3072 = vmatmul.mubr.msk.f32.gmra.mxu1 %vm1068_vm2, %v1046_v28 }
 0x114   :  { %1173 = vmatpush1.msra.mxu1 %v116_v29  ;;  %1216 = vmatprep.mubr.f32.mxu1 %v4903_v41  ;;  %v3287_v11 = vpop.f32.mrf.mxu0 }
 0x115   :  { %1174 = vmatprep.subr.mxu1 %v113_v30 }
 0x116   :  { %1175 = vmatpush1.msra.mxu1 %v112_v31  ;;  %v1810_v17 = vpop.f32.mrf.mxu0 }
 0x117   :  { %1176 = vmatprep.subr.mxu1 %v109_v32 }
 0x118   :  { %1177 = vmatpush1.msra.mxu1 %v108_v33 }
 0x119   :  { %1178 = vmatprep.subr.mxu1 %v105_v34 }
 0x11a   :  { %1179 = vmatpush1.msra.mxu1 %v104_v35 }
 0x11b   :  { %1180 = vmatprep.subr.mxu1 %v101_v36 }
 0x11c   :  { %1181 = vmatpush1.msra.mxu1 %v100_v37 }
 0x11d   :  { %1182 = vmatprep.subr.mxu1 %v97_v38 }
 0x11e   :  { %1183 = vmatpush1.msra.mxu1 %v96_v39 }
 0x11f   :  { %3073 = vmatmul.mubr.msk.f32.vlgmr.msra.gmra.mxu1 %vm1068_vm2, %v1045_v23  ;;  %3258 = vmatprep.subr.msk.mxu1 %vm334_vm0, %v3653_v3 }
 0x120   :  { %3259 = vmatpush3.msk.msra.mxu1 %vm334_vm0, %v3653_v3  ;;  %1222 = vmatprep.mubr.f32.mxu1 %v4903_v41  ;;  %v3090_v3 = vld [vmem:[%s4890_s0 + $0x13] sm:$0xff] }
 0x121   :  { %3268 = vmatprep.subr.msk.mxu1 %vm334_vm0, %v3667_v6 }
 0x123   :  { %3074 = vmatmul.mubr.msk.f32.gmra.mxu1 %vm1068_vm2, %v1046_v28  ;;  %v3917_v28 = vld [vmem:[#allocation4 + $0x1e0] sm:$0xff] }
 0x124   :  { %3260 = vmatprep.mubr.msk.f32.mxu1 %vm327_vm1, %v3075_v42  ;;  %v3952_v42 = vld [vmem:[#allocation4 + $0x198] sm:$0xff] }
 0x127   :  { %3261 = vmatmul.mubr.msk.f32.vlgmr.msra.gmra.mxu1 %vm327_vm1, %v3076_v43  ;;  %v3956_v43 = vld [vmem:[#allocation4 + $0x180] sm:$0xff] }
 0x128   :  { %3269 = vmatpush3.msk.msra.mxu1 %vm334_vm0, %v3667_v6  ;;  %3270 = vmatprep.mubr.msk.f32.mxu1 %vm327_vm1, %v3090_v3  ;;  %v3101_v6 = vld [vmem:[%s4890_s0 + $0x1d] sm:$0x1]  ;;  %v3958_v3 = vld [vmem:[#allocation4 + $0x190] sm:$0xff] }
 0x129   :  { %3278 = vmatprep.subr.msk.mxu1 %vm334_vm0, %v3702_v12 }
 0x12b   :  { %3271 = vmatmul.mubr.msk.f32.vlgmr.msra.gmra.mxu1 %vm327_vm1, %v3091_v44  ;;  %v3962_v44 = vld [vmem:[#allocation4 + $0x168] sm:$0xff] }
 0x12c   :  { %3279 = vmatpush3.msk.msra.mxu1 %vm334_vm0, %v3702_v12  ;;  %3280 = vmatprep.mubr.msk.f32.mxu1 %vm327_vm1, %v3100_v45  ;;  %v3111_v12 = vld [vmem:[%s4890_s0 + $0x1f] sm:$0x1] }
 0x12d   :  { %3288 = vmatprep.subr.msk.mxu1 %vm334_vm0, %v3736_v18  ;;  %v3964_v45 = vld [vmem:[#allocation4 + $0x178] sm:$0xff] }
 0x12f   :  { %3281 = vmatmul.mubr.msk.f32.vlgmr.msra.gmra.mxu1 %vm327_vm1, %v3101_v6  ;;  %v3968_v6 = vld [vmem:[#allocation4 + $0x160] sm:$0xff] }
 0x130   :  { %3289 = vmatpush3.msk.msra.mxu1 %vm334_vm0, %v3736_v18  ;;  %3290 = vmatprep.mubr.msk.f32.mxu1 %vm327_vm1, %v3110_v46  ;;  %v3894_v18 = vld [vmem:[#allocation4 + $0x1e8] sm:$0xff]  ;;  %v3970_v46 = vld [vmem:[#allocation4 + $0x170] sm:$0xff] }
 0x131   :  { %2009 = vmatprep.subr.mxu1 %v3775_v40  ;;  %v3896_v40 = vld [vmem:[#allocation4 + $0x1f8] sm:$0xff]  ;;  %2070 = vmatprep.subr.mxu0 %v3894_v18 }
 0x133   :  { %3291 = vmatmul.mubr.msk.f32.vlgmr.msra.gmra.mxu1 %vm327_vm1, %v3111_v12  ;;  %v3974_v12 = vld [vmem:[#allocation4 + $0x148] sm:$0xff] }
 0x134   :  { %2010 = vmatpush1.msra.mxu1 %v3829_v24  ;;  %2057 = vmatprep.mubr.f32.mxu1 %v4903_v41 }
 0x135   :  { %2011 = vmatprep.subr.mxu1 %v3831_v25 }
 0x136   :  { %2012 = vmatpush1.msra.mxu1 %v120_v26 }
 0x137   :  { %2013 = vmatprep.subr.mxu1 %v117_v27 }
 0x138   :  { %2014 = vmatpush1.msra.mxu1 %v116_v29  ;;  %v3919_v29 = vld [vmem:[#allocation4 + $0x1f0] sm:$0xff] }
 0x139   :  { %2015 = vmatprep.subr.mxu1 %v113_v30  ;;  %v3921_v30 = vld [vmem:[#allocation4 + $0x1c8] sm:$0xff] }
 0x13a   :  { %2016 = vmatpush1.msra.mxu1 %v112_v31  ;;  %v3923_v31 = vld [vmem:[#allocation4 + $0x1d8] sm:$0xff] }
 0x13b   :  { %2017 = vmatprep.subr.mxu1 %v109_v32 }
 0x13c   :  { %2018 = vmatpush1.msra.mxu1 %v108_v33  ;;  %v3928_v33 = vld [vmem:[#allocation4 + $0x1c0] sm:$0xff] }
 0x13d   :  { %2019 = vmatprep.subr.mxu1 %v105_v34  ;;  %v3930_v34 = vld [vmem:[#allocation4 + $0x1d0] sm:$0xff] }
 0x13e   :  { %2020 = vmatpush1.msra.mxu1 %v104_v35  ;;  %v3936_v35 = vld [vmem:[#allocation4 + $0x1a8] sm:$0xff] }
 0x13f   :  { %2021 = vmatprep.subr.mxu1 %v101_v36  ;;  %v3938_v36 = vld [vmem:[#allocation4 + $0x1b8] sm:$0xff] }
 0x140   :  { %2022 = vmatpush1.msra.mxu1 %v100_v37  ;;  %v3944_v37 = vld [vmem:[#allocation4 + $0x1a0] sm:$0xff] }
 0x141   :  { %2023 = vmatprep.subr.mxu1 %v97_v38  ;;  %v3946_v38 = vld [vmem:[#allocation4 + $0x1b0] sm:$0xff] }
 0x142   :  { %2024 = vmatpush1.msra.mxu1 %v96_v39  ;;  %v3950_v39 = vld [vmem:[#allocation4 + $0x188] sm:$0xff] }
 0x143   :  { %2147 = vmatprep.subr.mxu1 %v3896_v40 }
 0x1cf   :  { %v3900_v47 = vpop.f32.mrf.mxu1 }
 0x1d1   :  { %v3902_v48 = vpop.f32.mrf.mxu1 }
 0x1d3   :  { %v3904_v50 = vpop.f32.mrf.mxu1 }
 0x1d5   :  { %v3906_v52 = vpop.f32.mrf.mxu1 }
 0x1df   :  { %v3908_v53 = vpop.f32.mrf.mxu1 }
 0x1e1   :  { %v3910_v55 = vpop.f32.mrf.mxu1 }
 0x1e3   :  { %v3912_v56 = vpop.f32.mrf.mxu1 }
 0x1e5   :  { %v3914_v58 = vpop.f32.mrf.mxu1 }
 0x1e7   :  { %v3262_v59 = vpop.f32.mrf.mxu1 }
 0x1e8   :  { %v1393_v61 = vadd.f32 %v3262_v59, %v3257_v49  ;;  %v3976_v49 = vld [vmem:[#allocation4 + $0x158] sm:$0xff] }
 0x1e9   :  { %v1387_v62 = vpop.f32.mrf.mxu1  ;;  %v3988_v59 = vld [vmem:[#allocation4 + $0x138] sm:$0xff] }
 0x1ea   :  { %v1480_v63 = vadd.f32 %v3267_v54, %v1393_v61  ;;  %v1388_v0 = vadd.f32 %v1387_v62, %v1306_v51  ;;  %v3980_v51 = vld [vmem:[#allocation4 + $0x140] sm:$0xff]  ;;  %v3982_v54 = vld [vmem:[#allocation4 + $0x150] sm:$0xff]  ;;  %v3998_v62 = vld [vmem:[#allocation4 + $0x108] sm:$0xff] }
 0x1eb   :  { %v3272_v1 = vpop.f32.mrf.mxu1  ;;  %v3994_v61 = vld [vmem:[#allocation4 + $0x130] sm:$0xff] }
 0x1ec   :  { %v1479_v4 = vadd.f32 %v1470_v57, %v1388_v0  ;;  %v1565_v5 = vadd.f32 %v3272_v1, %v1480_v63  ;;  %v3986_v57 = vld [vmem:[#allocation4 + $0x128] sm:$0xff]  ;;  %v4000_v63 = vld [vmem:[#allocation4 + $0x118] sm:$0xff]  ;;  %v4004_v0 = vld [vmem:[#allocation4 + $0x100] sm:$0xff] }
 0x1ed   :  { %v1555_v7 = vpop.f32.mrf.mxu1  ;;  %v4006_v1 = vld [vmem:[#allocation4 + $0x110] sm:$0xff] }
 0x1ee   :  { %v1650_v8 = vadd.f32 %v3277_v60, %v1565_v5  ;;  %v1564_v9 = vadd.f32 %v1555_v7, %v1479_v4  ;;  %v3992_v60 = vld [vmem:[#allocation4 + $0x120] sm:$0xff]  ;;  %v4012_v4 = vld [vmem:[#allocation4 + $0xf8] sm:$0xff]  ;;  %v4018_v7 = vld [vmem:[#allocation4 + $0xf0] sm:$0xff] }
 0x1ef   :  { %v3282_v10 = vpop.f32.mrf.mxu1  ;;  %v4016_v5 = vld [vmem:[#allocation4 + $0xe0] sm:$0xff] }
 0x1f0   :  { %v1649_v13 = vadd.f32 %v1640_v2, %v1564_v9  ;;  %v1735_v14 = vadd.f32 %v3282_v10, %v1650_v8  ;;  %v4010_v2 = vld [vmem:[#allocation4 + $0xe8] sm:$0xff]  ;;  %v4024_v9 = vld [vmem:[#allocation4 + $0xd8] sm:$0xff]  ;;  %v4028_v10 = vld [vmem:[#allocation4 + $0xc0] sm:$0xff] }
 0x1f1   :  { %v1725_v15 = vpop.f32.mrf.mxu1  ;;  %v4022_v8 = vld [vmem:[#allocation4 + $0xc8] sm:$0xff]  ;;  %5061 = vst [vmem:[#allocation12_spill] sm:$0xff] %v4028_v10 }
 0x1f2   :  { %v1734_v16 = vadd.f32 %v1725_v15, %v1649_v13  ;;  %v1820_v21 = vadd.f32 %v3287_v11, %v1735_v14  ;;  %v4030_v11 = vld [vmem:[#allocation4 + $0xd0] sm:$0xff]  ;;  %v4034_v13 = vld [vmem:[#allocation4 + $0xa8] sm:$0xff]  ;;  %v4036_v14 = vld [vmem:[#allocation4 + $0xb8] sm:$0xff] }
 0x1f3   :  { %v3292_v19 = vpop.f32.mrf.mxu1  ;;  %5062 = vst [vmem:[#allocation13_spill] sm:$0xff] %v4030_v11  ;;  %5063 = vst [vmem:[#allocation14_spill] sm:$0xff] %v4034_v13  ;;  %v4040_v15 = vld [vmem:[#allocation4 + $0xa0] sm:$0xff] }
 0x1f4   :  { %v1819_v22 = vadd.f32 %v1810_v17, %v1734_v16  ;;  %v1905_v25 = vadd.f32 %v3292_v19, %v1820_v21  ;;  %5064 = vst [vmem:[#allocation15_spill] sm:$0xff] %v4036_v14  ;;  %5065 = vst [vmem:[#allocation16_spill] sm:$0xff] %v4040_v15  ;;  %v4042_v16 = vld [vmem:[#allocation4 + $0xb0] sm:$0xff]  ;;  %v4046_v17 = vld [vmem:[#allocation4 + $0x88] sm:$0xff] }
 0x1f5   :  { %v1895_v23 = vpop.f32.mrf.mxu1  ;;  %5066 = vst [vmem:[#allocation17_spill] sm:$0xff] %v4042_v16  ;;  %5067 = vst [vmem:[#allocation18_spill] sm:$0xff] %v4046_v17  ;;  %v4048_v19 = vld [vmem:[#allocation4 + $0x98] sm:$0xff]  ;;  %v4052_v21 = vld [vmem:[#allocation4 + $0x80] sm:$0xff] }
 0x1f6   :  { %v1904_v24 = vadd.f32 %v1895_v23, %v1819_v22  ;;  %v1907_v32 = vadd.f32 %v3825_v20, %v1905_v25  ;;  %5068 = vst [vmem:[#allocation19_spill] sm:$0xff] %v4048_v19  ;;  %5069 = vst [vmem:[#allocation20_spill] sm:$0xff] %v4052_v21  ;;  %v4054_v22 = vld [vmem:[#allocation4 + $0x90] sm:$0xff]  ;;  %v4058_v23 = vld [vmem:[#allocation4 + $0x68] sm:$0xff] }
 0x1f7   :  { %5070 = vst [vmem:[#allocation21_spill] sm:$0xff] %v4054_v22  ;;  %5071 = vst [vmem:[#allocation22_spill] sm:$0xff] %v4058_v23  ;;  %v4064_v25 = vld [vmem:[#allocation4 + $0x60] sm:$0xff] }
 0x1f8   :  { %v1906_v26 = vadd.f32 %v3825_v20, %v1904_v24  ;;  %v1909_v20 = vmax.f32 %v1907_v32, 0.0  ;;  %v4060_v24 = vld [vmem:[#allocation4 + $0x78] sm:$0xff]  ;;  %5073 = vst [vmem:[#allocation24_spill] sm:$0xff] %v4064_v25 }
 0x1f9   :  { %5072 = vst [vmem:[#allocation23_spill] sm:$0xff] %v4060_v24  ;;  %v4072_v32 = vld [vmem:[#allocation4 + $0x58] sm:$0xff] }
 0x1fa   :  { %v1908_v27 = vmax.f32 %v1906_v26, 0.0  ;;  %v4066_v26 = vld [vmem:[#allocation4 + $0x70] sm:$0xff]  ;;  %5076 = vst [vmem:[#allocation27_spill] sm:$0xff] %v4072_v32 }
 0x1fb   :  { %5074 = vst [vmem:[#allocation25_spill] sm:$0xff] %v4066_v26 }
 0x1fc   :  { %3115 = vmatmul.mubr.msk.f32.vlgmr.msra.gmra.mxu0 %vm1068_vm2, %v1908_v27  ;;  %3117 = vmatmul.mubr.msk.f32.vlgmr.msra.gmra.mxu1 %vm1068_vm2, %v1908_v27  ;;  %v4070_v27 = vld [vmem:[#allocation4 + $0x48] sm:$0xff] }
 0x1fd   :  { %2071 = vmatpush1.msra.mxu0 %v3917_v28  ;;  %2148 = vmatpush1.msra.mxu1 %v3919_v29  ;;  %5075 = vst [vmem:[#allocation26_spill] sm:$0xff] %v4070_v27 }
 0x1fe   :  { %2072 = vmatprep.subr.mxu0 %v3921_v30  ;;  %2149 = vmatprep.subr.mxu1 %v3923_v31 }
 0x1ff   :  { %2073 = vmatpush1.msra.mxu0 %v3928_v33  ;;  %2150 = vmatpush1.msra.mxu1 %v3930_v34 }
 0x200   :  { %1986 = vmatprep.mubr.f32.mxu0 %v4903_v41  ;;  %2063 = vmatprep.mubr.f32.mxu1 %v4903_v41  ;;  %v4078_v41 = vld [vmem:[#allocation4 + $0x50] sm:$0xff] }
 0x201   :  { %2074 = vmatprep.subr.mxu0 %v3936_v35  ;;  %2151 = vmatprep.subr.mxu1 %v3938_v36  ;;  %5078 = vst [vmem:[#allocation29_spill] sm:$0xff] %v4078_v41 }
 0x202   :  { %3116 = vmatmul.mubr.msk.f32.gmra.mxu0 %vm1068_vm2, %v1909_v20  ;;  %3118 = vmatmul.mubr.msk.f32.gmra.mxu1 %vm1068_vm2, %v1909_v20  ;;  %v4076_v20 = vld [vmem:[#allocation4 + $0x40] sm:$0xff] }
 0x203   :  { %2075 = vmatpush1.msra.mxu0 %v3944_v37  ;;  %2152 = vmatpush1.msra.mxu1 %v3946_v38  ;;  %5077 = vst [vmem:[#allocation28_spill] sm:$0xff] %v4076_v20 }
 0x204   :  { %2076 = vmatprep.subr.mxu0 %v3950_v39  ;;  %2153 = vmatprep.subr.mxu1 %v3952_v42 }
 0x205   :  { %2077 = vmatpush1.msra.mxu0 %v3956_v43  ;;  %2154 = vmatpush1.msra.mxu1 %v3958_v3 }
 0x206   :  { %2078 = vmatprep.subr.mxu0 %v3962_v44  ;;  %2155 = vmatprep.subr.mxu1 %v3964_v45 }
 0x207   :  { %2079 = vmatpush1.msra.mxu0 %v3968_v6  ;;  %2156 = vmatpush1.msra.mxu1 %v3970_v46 }
 0x208   :  { %2080 = vmatprep.subr.mxu0 %v3974_v12  ;;  %2157 = vmatprep.subr.mxu1 %v3976_v49 }
 0x209   :  { %2081 = vmatpush1.msra.mxu0 %v3980_v51  ;;  %2158 = vmatpush1.msra.mxu1 %v3982_v54 }
 0x20a   :  { %2082 = vmatprep.subr.mxu0 %v3986_v57  ;;  %2159 = vmatprep.subr.mxu1 %v3988_v59 }
 0x20b   :  { %2083 = vmatpush1.msra.mxu0 %v3992_v60  ;;  %2160 = vmatpush1.msra.mxu1 %v3994_v61 }
 0x20c   :  { %2084 = vmatprep.subr.mxu0 %v3998_v62  ;;  %2161 = vmatprep.subr.mxu1 %v4000_v63 }
 0x20d   :  { %2085 = vmatpush1.msra.mxu0 %v4004_v0  ;;  %2162 = vmatpush1.msra.mxu1 %v4006_v1 }
 0x20e   :  { %2086 = vmatprep.subr.mxu0 %v4010_v2  ;;  %2163 = vmatprep.subr.mxu1 %v4012_v4 }
 0x20f   :  { %2087 = vmatpush1.msra.mxu0 %v4016_v5  ;;  %2164 = vmatpush1.msra.mxu1 %v4018_v7 }
 0x210   :  { %2088 = vmatprep.subr.mxu0 %v4022_v8  ;;  %2165 = vmatprep.subr.mxu1 %v4024_v9 }
 0x211   :  { %2089 = vmatpush1.msra.mxu0 %v4028_v10  ;;  %2166 = vmatpush1.msra.mxu1 %v4030_v11 }
 0x212   :  { %2090 = vmatprep.subr.mxu0 %v4034_v13  ;;  %2167 = vmatprep.subr.mxu1 %v4036_v14 }
 0x213   :  { %2091 = vmatpush1.msra.mxu0 %v4040_v15  ;;  %2168 = vmatpush1.msra.mxu1 %v4042_v16 }
 0x214   :  { %2092 = vmatprep.subr.mxu0 %v4046_v17  ;;  %2169 = vmatprep.subr.mxu1 %v4048_v19  ;;  %v4082_v19 = vld [vmem:[#allocation4 + $0x28] sm:$0xff]  ;;  %v4470_v17 = vld [vmem:[#allocation6 + $0x240] sm:$0xff] }
 0x215   :  { %2093 = vmatpush1.msra.mxu0 %v4052_v21  ;;  %2170 = vmatpush1.msra.mxu1 %v4054_v22  ;;  %5079 = vst [vmem:[#allocation30_spill] sm:$0xff] %v4082_v19  ;;  %v4084_v21 = vld [vmem:[#allocation4 + $0x38] sm:$0xff]  ;;  %v4088_v22 = vld [vmem:[#allocation4 + $0x20] sm:$0xff]  ;;  %5206 = vst [vmem:[#allocation156_spill] sm:$0xff] %v4470_v17 }
 0x216   :  { %2094 = vmatprep.subr.mxu0 %v4058_v23  ;;  %2171 = vmatprep.subr.mxu1 %v4060_v24  ;;  %5080 = vst [vmem:[#allocation31_spill] sm:$0xff] %v4084_v21  ;;  %5081 = vst [vmem:[#allocation32_spill] sm:$0xff] %v4088_v22  ;;  %v4090_v23 = vld [vmem:[#allocation4 + $0x30] sm:$0xff]  ;;  %v4094_v24 = vld [vmem:[#allocation4 + $0x8] sm:$0xff] }
 0x217   :  { %2095 = vmatpush1.msra.mxu0 %v4064_v25  ;;  %2172 = vmatpush1.msra.mxu1 %v4066_v26  ;;  %5082 = vst [vmem:[#allocation33_spill] sm:$0xff] %v4090_v23  ;;  %5083 = vst [vmem:[#allocation34_spill] sm:$0xff] %v4094_v24  ;;  %v4096_v25 = vld [vmem:[#allocation4 + $0x18] sm:$0xff]  ;;  %v4100_v26 = vld [vmem:[#allocation4] sm:$0xff] }
 0x218   :  { %2096 = vmatprep.subr.mxu0 %v4070_v27  ;;  %2173 = vmatprep.subr.mxu1 %v4072_v32  ;;  %5084 = vst [vmem:[#allocation35_spill] sm:$0xff] %v4096_v25  ;;  %5085 = vst [vmem:[#allocation36_spill] sm:$0xff] %v4100_v26  ;;  %v4104_v32 = vld [vmem:[#allocation4 + $0x10] sm:$0xff] }
 0x219   :  { %2097 = vmatpush1.msra.mxu0 %v4076_v20  ;;  %2174 = vmatpush1.msra.mxu1 %v4078_v41  ;;  %5086 = vst [vmem:[#allocation37_spill] sm:$0xff] %v4104_v32  ;;  %v5087_v41 = vmov 0.0   ;;  %v4140_v20 = vld [vmem:[#allocation6 + $0x1a8] sm:$0xff]  ;;  %v4148_v27 = vld [vmem:[#allocation6 + $0x1b0] sm:$0xff] }
 0x21a   :  { %2098 = vmatprep.subr.mxu0 %v4082_v19  ;;  %2175 = vmatprep.subr.mxu1 %v4084_v21  ;;  %v4136_v21 = vld [vmem:[#allocation6 + $0x1c0] sm:$0xff]  ;;  %v4138_v19 = vld [vmem:[#allocation6 + $0x1d0] sm:$0xff]  ;;  %5096 = vst [vmem:[#allocation46_spill] sm:$0xff] %v4140_v20  ;;  %5099 = vst [vmem:[#allocation49_spill] sm:$0xff] %v4148_v27 }
 0x21b   :  { %2099 = vmatpush1.msra.mxu0 %v4088_v22  ;;  %2176 = vmatpush1.msra.mxu1 %v4090_v23  ;;  %v4130_v23 = vld [vmem:[#allocation6 + $0x1c8] sm:$0xff]  ;;  %v4132_v22 = vld [vmem:[#allocation6 + $0x1d8] sm:$0xff]  ;;  %5094 = vst [vmem:[#allocation44_spill] sm:$0xff] %v4136_v21  ;;  %5095 = vst [vmem:[#allocation45_spill] sm:$0xff] %v4138_v19 }
 0x21c   :  { %2100 = vmatprep.subr.mxu0 %v4094_v24  ;;  %2177 = vmatprep.subr.mxu1 %v4096_v25  ;;  %v4124_v25 = vld [vmem:[#allocation6 + $0x1e0] sm:$0xff]  ;;  %v4128_v24 = vld [vmem:[#allocation6 + $0x1f0] sm:$0xff]  ;;  %5092 = vst [vmem:[#allocation42_spill] sm:$0xff] %v4130_v23  ;;  %5093 = vst [vmem:[#allocation43_spill] sm:$0xff] %v4132_v22 }
 0x21d   :  { %2101 = vmatpush1.msra.mxu0 %v4100_v26  ;;  %2134 = vmatprep.mubr.f32.mxu0 %v5087_v41  ;;  %v4120_v26 = vld [vmem:[#allocation6 + $0x1e8] sm:$0xff]  ;;  %5090 = vst [vmem:[#allocation40_spill] sm:$0xff] %v4124_v25  ;;  %5091 = vst [vmem:[#allocation41_spill] sm:$0xff] %v4128_v24 }
 0x21e   :  { %2178 = vmatpush1.msra.mxu1 %v4104_v32  ;;  %2211 = vmatprep.mubr.f32.mxu1 %v5087_v41  ;;  %5088 = vst [vmem:[#allocation38_spill] sm:$0xff] %v4120_v26  ;;  %v4122_v32 = vld [vmem:[#allocation6 + $0x1f8] sm:$0xff] }
 0x21f   :  { %2135 = vmatmul.mubr.f32.vlgmr.msra.gmra.mxu0 %v5087_v41  ;;  %2212 = vmatmul.mubr.f32.vlgmr.msra.gmra.mxu1 %v5087_v41  ;;  %5089 = vst [vmem:[#allocation39_spill] sm:$0xff] %v4122_v32 }
 0x220   :  { %2140 = vmatprep.mubr.f32.mxu0 %v5087_v41  ;;  %2217 = vmatprep.mubr.f32.mxu1 %v5087_v41 }
 0x221   :  { %2301 = vmatprep.subr.mxu0 %v4120_v26  ;;  %2378 = vmatprep.subr.mxu1 %v4122_v32  ;;  %v4144_v32 = vld [vmem:[#allocation6 + $0x1b8] sm:$0xff]  ;;  %v4146_v26 = vld [vmem:[#allocation6 + $0x1a0] sm:$0xff] }
 0x222   :  { %2302 = vmatpush1.msra.mxu0 %v4124_v25  ;;  %2379 = vmatpush1.msra.mxu1 %v4128_v24  ;;  %5097 = vst [vmem:[#allocation47_spill] sm:$0xff] %v4144_v32  ;;  %5098 = vst [vmem:[#allocation48_spill] sm:$0xff] %v4146_v26  ;;  %v4152_v24 = vld [vmem:[#allocation6 + $0x188] sm:$0xff]  ;;  %v4154_v25 = vld [vmem:[#allocation6 + $0x198] sm:$0xff] }
 0x223   :  { %2141 = vmatmul.mubr.f32.gmra.mxu0 %v5087_v41  ;;  %2218 = vmatmul.mubr.f32.gmra.mxu1 %v5087_v41  ;;  %5100 = vst [vmem:[#allocation50_spill] sm:$0xff] %v4152_v24  ;;  %5101 = vst [vmem:[#allocation51_spill] sm:$0xff] %v4154_v25 }
 0x224   :  { %2365 = vmatprep.mubr.f32.mxu0 %v5087_v41  ;;  %2442 = vmatprep.mubr.f32.mxu1 %v5087_v41 }
 0x225   :  { %2303 = vmatprep.subr.mxu0 %v4130_v23  ;;  %2380 = vmatprep.subr.mxu1 %v4132_v22  ;;  %v4158_v23 = vld [vmem:[#allocation6 + $0x180] sm:$0xff]  ;;  %v4160_v22 = vld [vmem:[#allocation6 + $0x190] sm:$0xff] }
 0x226   :  { %2304 = vmatpush1.msra.mxu0 %v4136_v21  ;;  %2381 = vmatpush1.msra.mxu1 %v4138_v19  ;;  %5102 = vst [vmem:[#allocation52_spill] sm:$0xff] %v4158_v23  ;;  %5103 = vst [vmem:[#allocation53_spill] sm:$0xff] %v4160_v22  ;;  %v4168_v19 = vld [vmem:[#allocation6 + $0x168] sm:$0xff]  ;;  %v4454_v21 = vld [vmem:[#allocation6 + $0x278] sm:$0xff] }
 0x227   :  { %2305 = vmatprep.subr.mxu0 %v4140_v20  ;;  %2382 = vmatprep.subr.mxu1 %v4144_v32  ;;  %5104 = vst [vmem:[#allocation54_spill] sm:$0xff] %v4168_v19  ;;  %v4170_v20 = vld [vmem:[#allocation6 + $0x178] sm:$0xff]  ;;  %v4174_v32 = vld [vmem:[#allocation6 + $0x160] sm:$0xff]  ;;  %5201 = vst [vmem:[#allocation151_spill] sm:$0xff] %v4454_v21 }
 0x228   :  { %2306 = vmatpush1.msra.mxu0 %v4146_v26  ;;  %2383 = vmatpush1.msra.mxu1 %v4148_v27  ;;  %5105 = vst [vmem:[#allocation55_spill] sm:$0xff] %v4170_v20  ;;  %5106 = vst [vmem:[#allocation56_spill] sm:$0xff] %v4174_v32  ;;  %v4176_v26 = vld [vmem:[#allocation6 + $0x170] sm:$0xff]  ;;  %v4446_v27 = vld [vmem:[#allocation6 + $0x280] sm:$0xff] }
 0x229   :  { %2307 = vmatprep.subr.mxu0 %v4152_v24  ;;  %2384 = vmatprep.subr.mxu1 %v4154_v25  ;;  %5107 = vst [vmem:[#allocation57_spill] sm:$0xff] %v4176_v26  ;;  %v4180_v25 = vld [vmem:[#allocation6 + $0x148] sm:$0xff]  ;;  %v4438_v24 = vld [vmem:[#allocation6 + $0x2b0] sm:$0xff]  ;;  %5198 = vst [vmem:[#allocation148_spill] sm:$0xff] %v4446_v27 }
 0x22a   :  { %2308 = vmatpush1.msra.mxu0 %v4158_v23  ;;  %2385 = vmatpush1.msra.mxu1 %v4160_v22  ;;  %5108 = vst [vmem:[#allocation58_spill] sm:$0xff] %v4180_v25  ;;  %v4182_v23 = vld [vmem:[#allocation6 + $0x158] sm:$0xff]  ;;  %v4186_v22 = vld [vmem:[#allocation6 + $0x140] sm:$0xff]  ;;  %5195 = vst [vmem:[#allocation145_spill] sm:$0xff] %v4438_v24 }
 0x22b   :  { %2309 = vmatprep.subr.mxu0 %v4168_v19  ;;  %2386 = vmatprep.subr.mxu1 %v4170_v20  ;;  %5109 = vst [vmem:[#allocation59_spill] sm:$0xff] %v4182_v23  ;;  %5110 = vst [vmem:[#allocation60_spill] sm:$0xff] %v4186_v22  ;;  %v4188_v19 = vld [vmem:[#allocation6 + $0x150] sm:$0xff]  ;;  %v4192_v20 = vld [vmem:[#allocation6 + $0x128] sm:$0xff] }
 0x22c   :  { %2310 = vmatpush1.msra.mxu0 %v4174_v32  ;;  %2387 = vmatpush1.msra.mxu1 %v4176_v26  ;;  %5111 = vst [vmem:[#allocation61_spill] sm:$0xff] %v4188_v19  ;;  %5112 = vst [vmem:[#allocation62_spill] sm:$0xff] %v4192_v20  ;;  %v4194_v32 = vld [vmem:[#allocation6 + $0x138] sm:$0xff]  ;;  %v4198_v26 = vld [vmem:[#allocation6 + $0x120] sm:$0xff] }
 0x22d   :  { %2311 = vmatprep.subr.mxu0 %v4180_v25  ;;  %2388 = vmatprep.subr.mxu1 %v4182_v23  ;;  %5113 = vst [vmem:[#allocation63_spill] sm:$0xff] %v4194_v32  ;;  %5114 = vst [vmem:[#allocation64_spill] sm:$0xff] %v4198_v26  ;;  %v4200_v25 = vld [vmem:[#allocation6 + $0x130] sm:$0xff]  ;;  %v4204_v23 = vld [vmem:[#allocation6 + $0x108] sm:$0xff] }
 0x22e   :  { %2312 = vmatpush1.msra.mxu0 %v4186_v22  ;;  %2389 = vmatpush1.msra.mxu1 %v4188_v19  ;;  %5115 = vst [vmem:[#allocation65_spill] sm:$0xff] %v4200_v25  ;;  %5116 = vst [vmem:[#allocation66_spill] sm:$0xff] %v4204_v23  ;;  %v4206_v22 = vld [vmem:[#allocation6 + $0x118] sm:$0xff]  ;;  %v4210_v19 = vld [vmem:[#allocation6 + $0x100] sm:$0xff] }
 0x22f   :  { %2313 = vmatprep.subr.mxu0 %v4192_v20  ;;  %2390 = vmatprep.subr.mxu1 %v4194_v32  ;;  %5117 = vst [vmem:[#allocation67_spill] sm:$0xff] %v4206_v22  ;;  %5118 = vst [vmem:[#allocation68_spill] sm:$0xff] %v4210_v19  ;;  %v4212_v20 = vld [vmem:[#allocation6 + $0x110] sm:$0xff]  ;;  %v4216_v32 = vld [vmem:[#allocation6 + $0xe8] sm:$0xff] }
 0x230   :  { %2314 = vmatpush1.msra.mxu0 %v4198_v26  ;;  %2391 = vmatpush1.msra.mxu1 %v4200_v25  ;;  %5119 = vst [vmem:[#allocation69_spill] sm:$0xff] %v4212_v20  ;;  %5120 = vst [vmem:[#allocation70_spill] sm:$0xff] %v4216_v32  ;;  %v4218_v26 = vld [vmem:[#allocation6 + $0xf8] sm:$0xff]  ;;  %v4222_v25 = vld [vmem:[#allocation6 + $0xe0] sm:$0xff] }
 0x231   :  { %2315 = vmatprep.subr.mxu0 %v4204_v23  ;;  %2392 = vmatprep.subr.mxu1 %v4206_v22  ;;  %5121 = vst [vmem:[#allocation71_spill] sm:$0xff] %v4218_v26  ;;  %5122 = vst [vmem:[#allocation72_spill] sm:$0xff] %v4222_v25  ;;  %v4224_v23 = vld [vmem:[#allocation6 + $0xf0] sm:$0xff]  ;;  %v4228_v22 = vld [vmem:[#allocation6 + $0xc8] sm:$0xff] }
 0x232   :  { %2316 = vmatpush1.msra.mxu0 %v4210_v19  ;;  %2393 = vmatpush1.msra.mxu1 %v4212_v20  ;;  %5123 = vst [vmem:[#allocation73_spill] sm:$0xff] %v4224_v23  ;;  %5124 = vst [vmem:[#allocation74_spill] sm:$0xff] %v4228_v22  ;;  %v4230_v19 = vld [vmem:[#allocation6 + $0xd8] sm:$0xff]  ;;  %v4234_v20 = vld [vmem:[#allocation6 + $0xc0] sm:$0xff] }
 0x233   :  { %2317 = vmatprep.subr.mxu0 %v4216_v32  ;;  %2394 = vmatprep.subr.mxu1 %v4218_v26  ;;  %5125 = vst [vmem:[#allocation75_spill] sm:$0xff] %v4230_v19  ;;  %5126 = vst [vmem:[#allocation76_spill] sm:$0xff] %v4234_v20  ;;  %v4236_v32 = vld [vmem:[#allocation6 + $0xd0] sm:$0xff]  ;;  %v4240_v26 = vld [vmem:[#allocation6 + $0xa8] sm:$0xff] }
 0x234   :  { %2318 = vmatpush1.msra.mxu0 %v4222_v25  ;;  %2395 = vmatpush1.msra.mxu1 %v4224_v23  ;;  %5127 = vst [vmem:[#allocation77_spill] sm:$0xff] %v4236_v32  ;;  %5128 = vst [vmem:[#allocation78_spill] sm:$0xff] %v4240_v26  ;;  %v4242_v25 = vld [vmem:[#allocation6 + $0xb8] sm:$0xff]  ;;  %v4246_v23 = vld [vmem:[#allocation6 + $0xa0] sm:$0xff] }
 0x235   :  { %2319 = vmatprep.subr.mxu0 %v4228_v22  ;;  %2396 = vmatprep.subr.mxu1 %v4230_v19  ;;  %5129 = vst [vmem:[#allocation79_spill] sm:$0xff] %v4242_v25  ;;  %5130 = vst [vmem:[#allocation80_spill] sm:$0xff] %v4246_v23  ;;  %v4248_v22 = vld [vmem:[#allocation6 + $0xb0] sm:$0xff]  ;;  %v4252_v19 = vld [vmem:[#allocation6 + $0x88] sm:$0xff] }
 0x236   :  { %2320 = vmatpush1.msra.mxu0 %v4234_v20  ;;  %2397 = vmatpush1.msra.mxu1 %v4236_v32  ;;  %5131 = vst [vmem:[#allocation81_spill] sm:$0xff] %v4248_v22  ;;  %5132 = vst [vmem:[#allocation82_spill] sm:$0xff] %v4252_v19  ;;  %v4254_v20 = vld [vmem:[#allocation6 + $0x98] sm:$0xff]  ;;  %v4258_v32 = vld [vmem:[#allocation6 + $0x80] sm:$0xff] }
 0x237   :  { %2321 = vmatprep.subr.mxu0 %v4240_v26  ;;  %2398 = vmatprep.subr.mxu1 %v4242_v25  ;;  %5133 = vst [vmem:[#allocation83_spill] sm:$0xff] %v4254_v20  ;;  %5134 = vst [vmem:[#allocation84_spill] sm:$0xff] %v4258_v32  ;;  %v4260_v26 = vld [vmem:[#allocation6 + $0x90] sm:$0xff]  ;;  %v4264_v25 = vld [vmem:[#allocation6 + $0x68] sm:$0xff] }
 0x238   :  { %2322 = vmatpush1.msra.mxu0 %v4246_v23  ;;  %2399 = vmatpush1.msra.mxu1 %v4248_v22  ;;  %5135 = vst [vmem:[#allocation85_spill] sm:$0xff] %v4260_v26  ;;  %5136 = vst [vmem:[#allocation86_spill] sm:$0xff] %v4264_v25  ;;  %v4266_v23 = vld [vmem:[#allocation6 + $0x78] sm:$0xff]  ;;  %v4270_v22 = vld [vmem:[#allocation6 + $0x60] sm:$0xff] }
 0x239   :  { %2323 = vmatprep.subr.mxu0 %v4252_v19  ;;  %2400 = vmatprep.subr.mxu1 %v4254_v20  ;;  %5137 = vst [vmem:[#allocation87_spill] sm:$0xff] %v4266_v23  ;;  %5138 = vst [vmem:[#allocation88_spill] sm:$0xff] %v4270_v22  ;;  %v4272_v19 = vld [vmem:[#allocation6 + $0x70] sm:$0xff]  ;;  %v4276_v20 = vld [vmem:[#allocation6 + $0x48] sm:$0xff] }
 0x23a   :  { %2324 = vmatpush1.msra.mxu0 %v4258_v32  ;;  %2401 = vmatpush1.msra.mxu1 %v4260_v26  ;;  %5139 = vst [vmem:[#allocation89_spill] sm:$0xff] %v4272_v19  ;;  %5140 = vst [vmem:[#allocation90_spill] sm:$0xff] %v4276_v20  ;;  %v4278_v32 = vld [vmem:[#allocation6 + $0x58] sm:$0xff]  ;;  %v4282_v26 = vld [vmem:[#allocation6 + $0x40] sm:$0xff] }
 0x23b   :  { %2325 = vmatprep.subr.mxu0 %v4264_v25  ;;  %2402 = vmatprep.subr.mxu1 %v4266_v23  ;;  %5141 = vst [vmem:[#allocation91_spill] sm:$0xff] %v4278_v32  ;;  %5142 = vst [vmem:[#allocation92_spill] sm:$0xff] %v4282_v26  ;;  %v4284_v25 = vld [vmem:[#allocation6 + $0x50] sm:$0xff]  ;;  %v4288_v23 = vld [vmem:[#allocation6 + $0x28] sm:$0xff] }
 0x23c   :  { %2326 = vmatpush1.msra.mxu0 %v4270_v22  ;;  %2403 = vmatpush1.msra.mxu1 %v4272_v19  ;;  %5143 = vst [vmem:[#allocation93_spill] sm:$0xff] %v4284_v25  ;;  %5144 = vst [vmem:[#allocation94_spill] sm:$0xff] %v4288_v23  ;;  %v4290_v22 = vld [vmem:[#allocation6 + $0x38] sm:$0xff]  ;;  %v4294_v19 = vld [vmem:[#allocation6 + $0x20] sm:$0xff] }
 0x23d   :  { %2327 = vmatprep.subr.mxu0 %v4276_v20  ;;  %2404 = vmatprep.subr.mxu1 %v4278_v32  ;;  %5145 = vst [vmem:[#allocation95_spill] sm:$0xff] %v4290_v22  ;;  %5146 = vst [vmem:[#allocation96_spill] sm:$0xff] %v4294_v19  ;;  %v4296_v20 = vld [vmem:[#allocation6 + $0x30] sm:$0xff]  ;;  %v4300_v32 = vld [vmem:[#allocation6 + $0x8] sm:$0xff] }
 0x23e   :  { %2328 = vmatpush1.msra.mxu0 %v4282_v26  ;;  %2405 = vmatpush1.msra.mxu1 %v4284_v25  ;;  %5147 = vst [vmem:[#allocation97_spill] sm:$0xff] %v4296_v20  ;;  %5148 = vst [vmem:[#allocation98_spill] sm:$0xff] %v4300_v32  ;;  %v4302_v26 = vld [vmem:[#allocation6 + $0x18] sm:$0xff]  ;;  %v4306_v25 = vld [vmem:[#allocation6] sm:$0xff] }
 0x23f   :  { %2329 = vmatprep.subr.mxu0 %v4288_v23  ;;  %2406 = vmatprep.subr.mxu1 %v4290_v22  ;;  %5149 = vst [vmem:[#allocation99_spill] sm:$0xff] %v4302_v26  ;;  %5150 = vst [vmem:[#allocation100_spill] sm:$0xff] %v4306_v25  ;;  %v4308_v23 = vld [vmem:[#allocation6 + $0x10] sm:$0xff]  ;;  %v4312_v22 = vld [vmem:[#allocation6 + $0x3e8] sm:$0xff] }
 0x240   :  { %2330 = vmatpush1.msra.mxu0 %v4294_v19  ;;  %2407 = vmatpush1.msra.mxu1 %v4296_v20  ;;  %5151 = vst [vmem:[#allocation101_spill] sm:$0xff] %v4308_v23  ;;  %5152 = vst [vmem:[#allocation102_spill] sm:$0xff] %v4312_v22  ;;  %v4314_v19 = vld [vmem:[#allocation6 + $0x3f8] sm:$0xff]  ;;  %v4318_v20 = vld [vmem:[#allocation6 + $0x3e0] sm:$0xff] }
 0x241   :  { %2331 = vmatprep.subr.mxu0 %v4300_v32  ;;  %2408 = vmatprep.subr.mxu1 %v4302_v26  ;;  %5153 = vst [vmem:[#allocation103_spill] sm:$0xff] %v4314_v19  ;;  %5154 = vst [vmem:[#allocation104_spill] sm:$0xff] %v4318_v20  ;;  %v4320_v32 = vld [vmem:[#allocation6 + $0x3f0] sm:$0xff]  ;;  %v4324_v26 = vld [vmem:[#allocation6 + $0x3c8] sm:$0xff] }
 0x242   :  { %2332 = vmatpush1.msra.mxu0 %v4306_v25  ;;  %2409 = vmatpush1.msra.mxu1 %v4308_v23  ;;  %5155 = vst [vmem:[#allocation105_spill] sm:$0xff] %v4320_v32  ;;  %5156 = vst [vmem:[#allocation106_spill] sm:$0xff] %v4324_v26  ;;  %v4326_v25 = vld [vmem:[#allocation6 + $0x3d8] sm:$0xff]  ;;  %v4330_v23 = vld [vmem:[#allocation6 + $0x3c0] sm:$0xff] }
 0x243   :  { %2333 = vmatprep.subr.mxu0 %v4312_v22  ;;  %2410 = vmatprep.subr.mxu1 %v4314_v19  ;;  %5157 = vst [vmem:[#allocation107_spill] sm:$0xff] %v4326_v25  ;;  %5158 = vst [vmem:[#allocation108_spill] sm:$0xff] %v4330_v23  ;;  %v4332_v22 = vld [vmem:[#allocation6 + $0x3d0] sm:$0xff]  ;;  %v4336_v19 = vld [vmem:[#allocation6 + $0x3a8] sm:$0xff] }
 0x244   :  { %2334 = vmatpush2.msra.mxu0 %v4318_v20  ;;  %2411 = vmatpush2.msra.mxu1 %v4320_v32  ;;  %5159 = vst [vmem:[#allocation109_spill] sm:$0xff] %v4332_v22  ;;  %5160 = vst [vmem:[#allocation110_spill] sm:$0xff] %v4336_v19  ;;  %v4338_v20 = vld [vmem:[#allocation6 + $0x3b8] sm:$0xff]  ;;  %v4342_v32 = vld [vmem:[#allocation6 + $0x3a0] sm:$0xff] }
 0x245   :  { %2335 = vmatprep.subr.mxu0 %v4324_v26  ;;  %2412 = vmatprep.subr.mxu1 %v4326_v25  ;;  %5161 = vst [vmem:[#allocation111_spill] sm:$0xff] %v4338_v20  ;;  %5162 = vst [vmem:[#allocation112_spill] sm:$0xff] %v4342_v32  ;;  %v4344_v26 = vld [vmem:[#allocation6 + $0x3b0] sm:$0xff]  ;;  %v4348_v25 = vld [vmem:[#allocation6 + $0x388] sm:$0xff] }
 0x246   :  { %2336 = vmatpush2.msra.mxu0 %v4330_v23  ;;  %2413 = vmatpush2.msra.mxu1 %v4332_v22  ;;  %5163 = vst [vmem:[#allocation113_spill] sm:$0xff] %v4344_v26  ;;  %5164 = vst [vmem:[#allocation114_spill] sm:$0xff] %v4348_v25  ;;  %v4350_v23 = vld [vmem:[#allocation6 + $0x398] sm:$0xff]  ;;  %v4354_v22 = vld [vmem:[#allocation6 + $0x380] sm:$0xff] }
 0x247   :  { %2337 = vmatprep.subr.mxu0 %v4336_v19  ;;  %2414 = vmatprep.subr.mxu1 %v4338_v20  ;;  %5165 = vst [vmem:[#allocation115_spill] sm:$0xff] %v4350_v23  ;;  %5166 = vst [vmem:[#allocation116_spill] sm:$0xff] %v4354_v22  ;;  %v4356_v19 = vld [vmem:[#allocation6 + $0x390] sm:$0xff]  ;;  %v4360_v20 = vld [vmem:[#allocation6 + $0x368] sm:$0xff] }
 0x248   :  { %2338 = vmatpush2.msra.mxu0 %v4342_v32  ;;  %2415 = vmatpush2.msra.mxu1 %v4344_v26  ;;  %5167 = vst [vmem:[#allocation117_spill] sm:$0xff] %v4356_v19  ;;  %5168 = vst [vmem:[#allocation118_spill] sm:$0xff] %v4360_v20  ;;  %v4362_v32 = vld [vmem:[#allocation6 + $0x378] sm:$0xff]  ;;  %v4366_v26 = vld [vmem:[#allocation6 + $0x360] sm:$0xff] }
 0x249   :  { %2339 = vmatprep.subr.mxu0 %v4348_v25  ;;  %2416 = vmatprep.subr.mxu1 %v4350_v23  ;;  %5169 = vst [vmem:[#allocation119_spill] sm:$0xff] %v4362_v32  ;;  %5170 = vst [vmem:[#allocation120_spill] sm:$0xff] %v4366_v26  ;;  %v4368_v25 = vld [vmem:[#allocation6 + $0x370] sm:$0xff]  ;;  %v4372_v23 = vld [vmem:[#allocation6 + $0x348] sm:$0xff] }
 0x24a   :  { %2340 = vmatpush2.msra.mxu0 %v4354_v22  ;;  %2417 = vmatpush2.msra.mxu1 %v4356_v19  ;;  %5171 = vst [vmem:[#allocation121_spill] sm:$0xff] %v4368_v25  ;;  %5172 = vst [vmem:[#allocation122_spill] sm:$0xff] %v4372_v23  ;;  %v4374_v22 = vld [vmem:[#allocation6 + $0x358] sm:$0xff]  ;;  %v4378_v19 = vld [vmem:[#allocation6 + $0x340] sm:$0xff] }
 0x24b   :  { %2341 = vmatprep.subr.mxu0 %v4360_v20  ;;  %2418 = vmatprep.subr.mxu1 %v4362_v32  ;;  %5173 = vst [vmem:[#allocation123_spill] sm:$0xff] %v4374_v22  ;;  %5174 = vst [vmem:[#allocation124_spill] sm:$0xff] %v4378_v19  ;;  %v4380_v20 = vld [vmem:[#allocation6 + $0x350] sm:$0xff]  ;;  %v4384_v32 = vld [vmem:[#allocation6 + $0x328] sm:$0xff] }
 0x24c   :  { %2342 = vmatpush2.msra.mxu0 %v4366_v26  ;;  %2419 = vmatpush2.msra.mxu1 %v4368_v25  ;;  %5175 = vst [vmem:[#allocation125_spill] sm:$0xff] %v4380_v20  ;;  %5176 = vst [vmem:[#allocation126_spill] sm:$0xff] %v4384_v32  ;;  %v4386_v26 = vld [vmem:[#allocation6 + $0x338] sm:$0xff]  ;;  %v4390_v25 = vld [vmem:[#allocation6 + $0x320] sm:$0xff] }
 0x24d   :  { %2343 = vmatprep.subr.mxu0 %v4372_v23  ;;  %2420 = vmatprep.subr.mxu1 %v4374_v22  ;;  %5177 = vst [vmem:[#allocation127_spill] sm:$0xff] %v4386_v26  ;;  %5178 = vst [vmem:[#allocation128_spill] sm:$0xff] %v4390_v25  ;;  %v4392_v23 = vld [vmem:[#allocation6 + $0x330] sm:$0xff]  ;;  %v4396_v22 = vld [vmem:[#allocation6 + $0x308] sm:$0xff] }
 0x24e   :  { %2344 = vmatpush2.msra.mxu0 %v4378_v19  ;;  %2421 = vmatpush2.msra.mxu1 %v4380_v20  ;;  %5179 = vst [vmem:[#allocation129_spill] sm:$0xff] %v4392_v23  ;;  %5180 = vst [vmem:[#allocation130_spill] sm:$0xff] %v4396_v22  ;;  %v4398_v19 = vld [vmem:[#allocation6 + $0x318] sm:$0xff]  ;;  %v4402_v20 = vld [vmem:[#allocation6 + $0x300] sm:$0xff] }
 0x24f   :  { %2345 = vmatprep.subr.mxu0 %v4384_v32  ;;  %2422 = vmatprep.subr.mxu1 %v4386_v26  ;;  %5181 = vst [vmem:[#allocation131_spill] sm:$0xff] %v4398_v19  ;;  %5182 = vst [vmem:[#allocation132_spill] sm:$0xff] %v4402_v20  ;;  %v4404_v32 = vld [vmem:[#allocation6 + $0x310] sm:$0xff]  ;;  %v4408_v26 = vld [vmem:[#allocation6 + $0x2e8] sm:$0xff] }
 0x250   :  { %2346 = vmatpush2.msra.mxu0 %v4390_v25  ;;  %2423 = vmatpush2.msra.mxu1 %v4392_v23  ;;  %5183 = vst [vmem:[#allocation133_spill] sm:$0xff] %v4404_v32  ;;  %5184 = vst [vmem:[#allocation134_spill] sm:$0xff] %v4408_v26  ;;  %v4410_v25 = vld [vmem:[#allocation6 + $0x2f8] sm:$0xff]  ;;  %v4414_v23 = vld [vmem:[#allocation6 + $0x2e0] sm:$0xff] }
 0x251   :  { %2347 = vmatprep.subr.mxu0 %v4396_v22  ;;  %2424 = vmatprep.subr.mxu1 %v4398_v19  ;;  %5185 = vst [vmem:[#allocation135_spill] sm:$0xff] %v4410_v25  ;;  %5186 = vst [vmem:[#allocation136_spill] sm:$0xff] %v4414_v23  ;;  %v4416_v22 = vld [vmem:[#allocation6 + $0x2f0] sm:$0xff]  ;;  %v4420_v19 = vld [vmem:[#allocation6 + $0x2c8] sm:$0xff] }
 0x252   :  { %2348 = vmatpush2.msra.mxu0 %v4402_v20  ;;  %2425 = vmatpush2.msra.mxu1 %v4404_v32  ;;  %5187 = vst [vmem:[#allocation137_spill] sm:$0xff] %v4416_v22  ;;  %5188 = vst [vmem:[#allocation138_spill] sm:$0xff] %v4420_v19  ;;  %v4422_v20 = vld [vmem:[#allocation6 + $0x2d8] sm:$0xff]  ;;  %v4426_v32 = vld [vmem:[#allocation6 + $0x2c0] sm:$0xff] }
 0x253   :  { %2349 = vmatprep.subr.mxu0 %v4408_v26  ;;  %2426 = vmatprep.subr.mxu1 %v4410_v25  ;;  %5189 = vst [vmem:[#allocation139_spill] sm:$0xff] %v4422_v20  ;;  %5190 = vst [vmem:[#allocation140_spill] sm:$0xff] %v4426_v32  ;;  %v4428_v26 = vld [vmem:[#allocation6 + $0x2d0] sm:$0xff]  ;;  %v4430_v25 = vld [vmem:[#allocation6 + $0x2a8] sm:$0xff] }
 0x254   :  { %2350 = vmatpush2.msra.mxu0 %v4414_v23  ;;  %2427 = vmatpush2.msra.mxu1 %v4416_v22  ;;  %5191 = vst [vmem:[#allocation141_spill] sm:$0xff] %v4428_v26  ;;  %5192 = vst [vmem:[#allocation142_spill] sm:$0xff] %v4430_v25  ;;  %v4434_v23 = vld [vmem:[#allocation6 + $0x2b8] sm:$0xff]  ;;  %v4436_v22 = vld [vmem:[#allocation6 + $0x2a0] sm:$0xff] }
 0x255   :  { %2351 = vmatprep.subr.mxu0 %v4420_v19  ;;  %2428 = vmatprep.subr.mxu1 %v4422_v20  ;;  %5193 = vst [vmem:[#allocation143_spill] sm:$0xff] %v4434_v23  ;;  %5194 = vst [vmem:[#allocation144_spill] sm:$0xff] %v4436_v22  ;;  %v4442_v20 = vld [vmem:[#allocation6 + $0x288] sm:$0xff]  ;;  %v4444_v19 = vld [vmem:[#allocation6 + $0x298] sm:$0xff] }
 0x256   :  { %2352 = vmatpush2.msra.mxu0 %v4426_v32  ;;  %2429 = vmatpush2.msra.mxu1 %v4428_v26  ;;  %5196 = vst [vmem:[#allocation146_spill] sm:$0xff] %v4442_v20  ;;  %5197 = vst [vmem:[#allocation147_spill] sm:$0xff] %v4444_v19  ;;  %v4450_v26 = vld [vmem:[#allocation6 + $0x290] sm:$0xff]  ;;  %v4452_v32 = vld [vmem:[#allocation6 + $0x268] sm:$0xff] }
 0x257   :  { %2353 = vmatprep.subr.mxu0 %v4430_v25  ;;  %2430 = vmatprep.subr.mxu1 %v4434_v23  ;;  %5199 = vst [vmem:[#allocation149_spill] sm:$0xff] %v4450_v26  ;;  %5200 = vst [vmem:[#allocation150_spill] sm:$0xff] %v4452_v32  ;;  %v4458_v23 = vld [vmem:[#allocation6 + $0x260] sm:$0xff]  ;;  %v4460_v25 = vld [vmem:[#allocation6 + $0x270] sm:$0xff] }
 0x258   :  { %2354 = vmatpush2.msra.mxu0 %v4436_v22  ;;  %2431 = vmatpush2.msra.mxu1 %v4438_v24  ;;  %5202 = vst [vmem:[#allocation152_spill] sm:$0xff] %v4458_v23  ;;  %5203 = vst [vmem:[#allocation153_spill] sm:$0xff] %v4460_v25  ;;  %v4464_v22 = vld [vmem:[#allocation6 + $0x248] sm:$0xff]  ;;  %v4466_v24 = vld [vmem:[#allocation6 + $0x258] sm:$0xff] }
 0x259   :  { %2355 = vmatprep.subr.mxu0 %v4442_v20  ;;  %2432 = vmatprep.subr.mxu1 %v4444_v19  ;;  %5204 = vst [vmem:[#allocation154_spill] sm:$0xff] %v4464_v22  ;;  %5205 = vst [vmem:[#allocation155_spill] sm:$0xff] %v4466_v24  ;;  %v4472_v20 = vld [vmem:[#allocation6 + $0x250] sm:$0xff]  ;;  %v4476_v19 = vld [vmem:[#allocation6 + $0x228] sm:$0xff] }
 0x25a   :  { %2356 = vmatpush2.msra.mxu0 %v4446_v27  ;;  %2433 = vmatpush2.msra.mxu1 %v4450_v26  ;;  %5207 = vst [vmem:[#allocation157_spill] sm:$0xff] %v4472_v20  ;;  %5208 = vst [vmem:[#allocation158_spill] sm:$0xff] %v4476_v19  ;;  %v4478_v27 = vld [vmem:[#allocation6 + $0x238] sm:$0xff]  ;;  %v4482_v26 = vld [vmem:[#allocation6 + $0x220] sm:$0xff] }
 0x25b   :  { %2357 = vmatprep.subr.mxu0 %v4452_v32  ;;  %2434 = vmatprep.subr.mxu1 %v4454_v21  ;;  %5209 = vst [vmem:[#allocation159_spill] sm:$0xff] %v4478_v27  ;;  %5210 = vst [vmem:[#allocation160_spill] sm:$0xff] %v4482_v26  ;;  %v4484_v32 = vld [vmem:[#allocation6 + $0x230] sm:$0xff]  ;;  %v4488_v21 = vld [vmem:[#allocation6 + $0x208] sm:$0xff] }
 0x25c   :  { %2358 = vmatpush2.msra.mxu0 %v4458_v23  ;;  %2435 = vmatpush2.msra.mxu1 %v4460_v25  ;;  %5211 = vst [vmem:[#allocation161_spill] sm:$0xff] %v4484_v32  ;;  %5212 = vst [vmem:[#allocation162_spill] sm:$0xff] %v4488_v21  ;;  %v4490_v23 = vld [vmem:[#allocation6 + $0x218] sm:$0xff]  ;;  %v4494_v25 = vld [vmem:[#allocation6 + $0x200] sm:$0xff] }
 0x25d   :  { %2359 = vmatprep.subr.mxu0 %v4464_v22  ;;  %2436 = vmatprep.subr.mxu1 %v4466_v24  ;;  %5213 = vst [vmem:[#allocation163_spill] sm:$0xff] %v4490_v23  ;;  %5214 = vst [vmem:[#allocation164_spill] sm:$0xff] %v4494_v25  ;;  %v4496_v22 = vld [vmem:[#allocation6 + $0x210] sm:$0xff] }
 0x25e   :  { %2360 = vmatpush2.msra.mxu0 %v4470_v17  ;;  %2437 = vmatpush2.msra.mxu1 %v4472_v20  ;;  %5215 = vst [vmem:[#allocation165_spill] sm:$0xff] %v4496_v22 }
 0x25f   :  { %2361 = vmatprep.subr.mxu0 %v4476_v19  ;;  %2438 = vmatprep.subr.mxu1 %v4478_v27  ;;  %v1048_v27 = vlaneseq }
 0x260   :  { %2362 = vmatpush2.msra.mxu0 %v4482_v26  ;;  %2439 = vmatpush2.msra.mxu1 %v4484_v32 }
 0x261   :  { %2363 = vmatprep.subr.mxu0 %v4488_v21  ;;  %2440 = vmatprep.subr.mxu1 %v4490_v23  ;;  %v4508_v20 = vshrl.u32 %v1048_v27, 7 }
 0x262   :  { %2364 = vmatpush2.msra.mxu0 %v4494_v25  ;;  %2441 = vmatpush2.msra.mxu1 %v4496_v22  ;;  %v190_v22 = vld [vmem:[%s4895_s5] sm:$0xf] }
 0x263   :  { %2503 = vmatprep.subr.mxu0 %v3894_v18  ;;  %2580 = vmatprep.subr.mxu1 %v3896_v40  ;;  %v5053_v21 = vsub.s32 0, %v4508_v20  ;;  %v5055_v18 = vsub.s32 1, %v4508_v20  ;;  %v1062_v16 = vsub.s32 3, %v4508_v20 }
 0x265   :  { %v4525_v27 = vrot.slane %v190_v22, %v5053_v21 }
 0x2bc   :  { %v4506_v19 = vpop.f32.mrf.mxu0  ;;  %v4510_v26 = vpop.f32.mrf.mxu1 }
 0x2bd   :  { %5216 = vst [vmem:[#allocation166_spill] sm:$0xff] %v4506_v19  ;;  %5217 = vst [vmem:[#allocation167_spill] sm:$0xff] %v4510_v26  ;;  %v4531_v26 = vrot.slane %v190_v22, %v5055_v18  ;;  %v1148_v18 = vadd.f32 %v3904_v50, %v4525_v27 }
 0x2be   :  { %v4512_v32 = vpop.f32.mrf.mxu0  ;;  %v4515_v23 = vpop.f32.mrf.mxu1 }
 0x2bf   :  { %5218 = vst [vmem:[#allocation168_spill] sm:$0xff] %v4512_v32  ;;  %5219 = vst [vmem:[#allocation169_spill] sm:$0xff] %v4515_v23  ;;  %v1142_v23 = vadd.f32 %v3900_v47, %v4525_v27  ;;  %v1150_v47 = vadd.f32 %v3906_v52, %v4531_v26 }
 0x2c2   :  { %v4521_v40 = vpop.f32.mrf.mxu0  ;;  %v4527_v19 = vpop.f32.mrf.mxu1 }
 0x2c3   :  { %5220 = vst [vmem:[#allocation170_spill] sm:$0xff] %v4521_v40  ;;  %5221 = vst [vmem:[#allocation171_spill] sm:$0xff] %v4527_v19  ;;  %v1144_v40 = vadd.f32 %v3902_v48, %v4531_v26 }
 0x2c4   :  { %v4533_v32 = vpop.f32.mrf.mxu0  ;;  %v4537_v25 = vpop.f32.mrf.mxu1 }
 0x2c5   :  { %5222 = vst [vmem:[#allocation172_spill] sm:$0xff] %v4533_v32  ;;  %5223 = vst [vmem:[#allocation173_spill] sm:$0xff] %v4537_v25  ;;  %v1058_v32 = vsub.s32 2, %v4508_v20 }
 0x2df   :  { %v2136_v17 = vpop.f32.mrf.mxu0  ;;  %v2213_v21 = vpop.f32.mrf.mxu1 }
 0x2e0   :  { %v2224_v24 = vadd.f32 %v2136_v17, %v1142_v23  ;;  %v4549_v17 = vrot.slane %v190_v22, %v1062_v16 }
 0x2e1   :  { %v2138_v19 = vpop.f32.mrf.mxu0  ;;  %v2215_v11 = vpop.f32.mrf.mxu1 }
 0x2e2   :  { %v3119_v15 = vmul.f32 -1.442695, %v2224_v24  ;;  %v2225_v14 = vadd.f32 %v2138_v19, %v1144_v40  ;;  %v4553_v19 = vrot.slane %v190_v22, %v1058_v32  ;;  %v1221_v52 = vadd.f32 %v3910_v55, %v4549_v17 }
 0x2e3   :  { %v2142_v13 = vpop.f32.mrf.mxu0  ;;  %v2219_v24 = vpop.f32.mrf.mxu1 }
 0x2e4   :  { %3338 = vpow2.f32 %v3119_v15  ;;  %v3120_v25 = vmul.f32 -1.442695, %v2225_v14  ;;  %v2228_v48 = vadd.f32 %v2142_v13, %v1148_v18  ;;  %v2227_v13 = vadd.f32 %v2215_v11, %v1221_v52 }
 0x2e5   :  { %v2144_v23 = vpop.f32.mrf.mxu0  ;;  %v1219_v14 = vadd.f32 %v3908_v53, %v4553_v19  ;;  %v2221_v15 = vpop.f32.mrf.mxu1  ;;  %v1225_v22 = vadd.f32 %v3912_v56, %v4553_v19 }
 0x2e6   :  { %3340 = vpow2.f32 %v3120_v25  ;;  %v3121_v10 = vmul.f32 -1.442695, %v2228_v48  ;;  %v2229_v50 = vadd.f32 %v2144_v23, %v1150_v47  ;;  %v1227_v25 = vadd.f32 %v3914_v58, %v4549_v17 }
 0x2e7   :  { %v2226_v18 = vadd.f32 %v2213_v21, %v1219_v14  ;;  %v3123_v47 = vmul.f32 -1.442695, %v2227_v13  ;;  %v2230_v23 = vadd.f32 %v2219_v24, %v1225_v22 }
 0x2e8   :  { %3342 = vpow2.f32 %v3121_v10  ;;  %v3122_v40 = vmul.f32 -1.442695, %v2229_v50  ;;  %v2231_v10 = vadd.f32 %v2221_v15, %v1227_v25 }
 0x2ea   :  { %3344 = vpow2.f32 %v3122_v40  ;;  %v3124_v11 = vmul.f32 -1.442695, %v2231_v10 }
 0x2eb   :  { %3346 = vtanh.f32 %v2226_v18 }
 0x2ec   :  { %3348 = vpow2.f32 %v3123_v47 }
 0x2f1   :  { %v3339_v48 = vpop.eup %3338 }
 0x2f2   :  { %v2244_v50 = vadd.f32 1.0, %v3339_v48 }
 0x2f3   :  { %v3341_v55 = vpop.eup %3340 }
 0x2f4   :  { %3350 = vrcp.f32 %v2244_v50  ;;  %v2245_v40 = vadd.f32 1.0, %v3341_v55 }
 0x2f5   :  { %v3343_v53 = vpop.eup %3342  ;;  %3352 = vtanh.f32 %v2230_v23 }
 0x2f6   :  { %3354 = vrcp.f32 %v2245_v40  ;;  %v2246_v52 = vadd.f32 1.0, %v3343_v53 }
 0x2f7   :  { %v3345_v58 = vpop.eup %3344  ;;  %3356 = vpow2.f32 %v3124_v11 }
 0x2f8   :  { %3358 = vrcp.f32 %v2246_v52  ;;  %v2247_v21 = vadd.f32 1.0, %v3345_v58  ;;  %v3347_v56 = vpop.eup %3346 }
 0x2f9   :  { %v3349_v13 = vpop.eup %3348 }
 0x2fa   :  { %3360 = vrcp.f32 %v2247_v21  ;;  %v2264_v18 = vadd.f32 1.0, %v3349_v13 }
 0x2fc   :  { %3362 = vrcp.f32 %v2264_v18  ;;  %v5264_v18 = vld [vmem:[#allocation52_spill] sm:$0xff] }
 0x301   :  { %v3351_v14 = vpop.eup %3350 }
 0x302   :  { %v3353_v24 = vpop.eup %3352  ;;  %v2272_v15 = vmul.f32 %v3351_v14, %v3347_v56  ;;  %v5260_v14 = vld [vmem:[#allocation48_spill] sm:$0xff] }
 0x303   :  { %v3355_v25 = vpop.eup %3354 }
 0x304   :  { %v3357_v22 = vpop.eup %3356  ;;  %v2270_v47 = vmul.f32 0.0, %v3355_v25  ;;  %v5263_v25 = vld [vmem:[#allocation51_spill] sm:$0xff] }
 0x305   :  { %v3359_v10 = vpop.eup %3358  ;;  %v2265_v55 = vadd.f32 1.0, %v3357_v22  ;;  %v5265_v22 = vld [vmem:[#allocation53_spill] sm:$0xff] }
 0x306   :  { %v4563_v48 = vadd.f32 %v2272_v15, %v2270_v47  ;;  %v2273_v23 = vmul.f32 %v3359_v10, %v3353_v24  ;;  %v5261_v24 = vld [vmem:[#allocation49_spill] sm:$0xff]  ;;  %v5262_v15 = vld [vmem:[#allocation50_spill] sm:$0xff]  ;;  %v5267_v10 = vld [vmem:[#allocation55_spill] sm:$0xff] }
 0x307   :  { %v3361_v50 = vpop.eup %3360  ;;  %v5266_v47 = vld [vmem:[#allocation54_spill] sm:$0xff] }
 0x308   :  { %3364 = vtanh.f32 %v4563_v48  ;;  %v2271_v11 = vmul.f32 0.0, %v3361_v50  ;;  %v5269_v50 = vld [vmem:[#allocation57_spill] sm:$0xff] }
 0x309   :  { %3366 = vrcp.f32 %v2265_v55  ;;  %v3363_v53 = vpop.eup %3362  ;;  %v5270_v55 = vld [vmem:[#allocation58_spill] sm:$0xff] }
 0x30a   :  { %v4566_v40 = vadd.f32 %v2273_v23, %v2271_v11  ;;  %v5268_v23 = vld [vmem:[#allocation56_spill] sm:$0xff]  ;;  %v5271_v11 = vld [vmem:[#allocation59_spill] sm:$0xff] }
 0x30c   :  { %3368 = vtanh.f32 %v4566_v40 }
 0x315   :  { %v3365_v52 = vpop.eup %3364 }
 0x316   :  { %v4569_v58 = vmul.f32 %v3365_v52, %v3363_v53  ;;  %v3367_v21 = vpop.eup %3366  ;;  %v5272_v53 = vld [vmem:[#allocation60_spill] sm:$0xff]  ;;  %v5273_v52 = vld [vmem:[#allocation61_spill] sm:$0xff] }
 0x318   :  { %2366 = vmatmul.mubr.f32.vlgmr.msra.gmra.mxu0 %v4569_v58  ;;  %2443 = vmatmul.mubr.f32.vlgmr.msra.gmra.mxu1 %v4569_v58 }
 0x319   :  { %v3369_v56 = vpop.eup %3368  ;;  %2504 = vmatpush1.msra.mxu0 %v3917_v28  ;;  %2581 = vmatpush1.msra.mxu1 %v3919_v29  ;;  %v5224_v28 = vld [vmem:[#allocation12_spill] sm:$0xff]  ;;  %v5225_v29 = vld [vmem:[#allocation13_spill] sm:$0xff] }
 0x31a   :  { %2505 = vmatprep.subr.mxu0 %v3921_v30  ;;  %2582 = vmatprep.subr.mxu1 %v3923_v31  ;;  %v4577_v13 = vmul.f32 %v3369_v56, %v3367_v21  ;;  %v5226_v30 = vld [vmem:[#allocation14_spill] sm:$0xff]  ;;  %v5227_v31 = vld [vmem:[#allocation15_spill] sm:$0xff]  ;;  %v5276_v56 = vld [vmem:[#allocation64_spill] sm:$0xff] }
 0x31b   :  { %2506 = vmatpush1.msra.mxu0 %v3928_v33  ;;  %2583 = vmatpush1.msra.mxu1 %v3930_v34  ;;  %v5228_v33 = vld [vmem:[#allocation16_spill] sm:$0xff]  ;;  %v5229_v34 = vld [vmem:[#allocation17_spill] sm:$0xff]  ;;  %v5275_v21 = vld [vmem:[#allocation63_spill] sm:$0xff] }
 0x31c   :  { %2371 = vmatprep.mubr.f32.mxu0 %v5087_v41  ;;  %2448 = vmatprep.mubr.f32.mxu1 %v5087_v41 }
 0x31d   :  { %2507 = vmatprep.subr.mxu0 %v3936_v35  ;;  %2584 = vmatprep.subr.mxu1 %v3938_v36  ;;  %v5230_v35 = vld [vmem:[#allocation18_spill] sm:$0xff]  ;;  %v5231_v36 = vld [vmem:[#allocation19_spill] sm:$0xff] }
 0x31e   :  { %2372 = vmatmul.mubr.f32.gmra.mxu0 %v4577_v13  ;;  %2449 = vmatmul.mubr.f32.gmra.mxu1 %v4577_v13 }
 0x31f   :  { %2508 = vmatpush1.msra.mxu0 %v3944_v37  ;;  %2585 = vmatpush1.msra.mxu1 %v3946_v38  ;;  %v5232_v37 = vld [vmem:[#allocation20_spill] sm:$0xff]  ;;  %v5233_v38 = vld [vmem:[#allocation21_spill] sm:$0xff] }
 0x320   :  { %2509 = vmatprep.subr.mxu0 %v3950_v39  ;;  %2586 = vmatprep.subr.mxu1 %v3952_v42  ;;  %v5234_v39 = vld [vmem:[#allocation22_spill] sm:$0xff]  ;;  %v5235_v42 = vld [vmem:[#allocation23_spill] sm:$0xff] }
 0x321   :  { %2510 = vmatpush1.msra.mxu0 %v3956_v43  ;;  %2587 = vmatpush1.msra.mxu1 %v3958_v3  ;;  %v5236_v43 = vld [vmem:[#allocation24_spill] sm:$0xff]  ;;  %v5237_v3 = vld [vmem:[#allocation25_spill] sm:$0xff] }
 0x322   :  { %2511 = vmatprep.subr.mxu0 %v3962_v44  ;;  %2588 = vmatprep.subr.mxu1 %v3964_v45  ;;  %v5238_v44 = vld [vmem:[#allocation26_spill] sm:$0xff]  ;;  %v5239_v45 = vld [vmem:[#allocation27_spill] sm:$0xff] }
 0x323   :  { %2512 = vmatpush1.msra.mxu0 %v3968_v6  ;;  %2589 = vmatpush1.msra.mxu1 %v3970_v46  ;;  %v5240_v6 = vld [vmem:[#allocation28_spill] sm:$0xff]  ;;  %v5241_v46 = vld [vmem:[#allocation29_spill] sm:$0xff] }
 0x324   :  { %2513 = vmatprep.subr.mxu0 %v3974_v12  ;;  %2590 = vmatprep.subr.mxu1 %v3976_v49  ;;  %v5242_v12 = vld [vmem:[#allocation30_spill] sm:$0xff]  ;;  %v5243_v49 = vld [vmem:[#allocation31_spill] sm:$0xff] }
 0x325   :  { %2514 = vmatpush1.msra.mxu0 %v3980_v51  ;;  %2591 = vmatpush1.msra.mxu1 %v3982_v54  ;;  %v5244_v51 = vld [vmem:[#allocation32_spill] sm:$0xff]  ;;  %v5245_v54 = vld [vmem:[#allocation33_spill] sm:$0xff] }
 0x326   :  { %2515 = vmatprep.subr.mxu0 %v3986_v57  ;;  %2592 = vmatprep.subr.mxu1 %v3988_v59  ;;  %v5246_v57 = vld [vmem:[#allocation34_spill] sm:$0xff]  ;;  %v5247_v59 = vld [vmem:[#allocation35_spill] sm:$0xff] }
 0x327   :  { %2516 = vmatpush1.msra.mxu0 %v3992_v60  ;;  %2593 = vmatpush1.msra.mxu1 %v3994_v61  ;;  %v5248_v60 = vld [vmem:[#allocation36_spill] sm:$0xff]  ;;  %v5249_v61 = vld [vmem:[#allocation37_spill] sm:$0xff] }
 0x328   :  { %2517 = vmatprep.subr.mxu0 %v3998_v62  ;;  %2594 = vmatprep.subr.mxu1 %v4000_v63  ;;  %v5250_v62 = vld [vmem:[#allocation38_spill] sm:$0xff]  ;;  %v5251_v63 = vld [vmem:[#allocation39_spill] sm:$0xff] }
 0x329   :  { %2518 = vmatpush1.msra.mxu0 %v4004_v0  ;;  %2595 = vmatpush1.msra.mxu1 %v4006_v1  ;;  %v5252_v0 = vld [vmem:[#allocation40_spill] sm:$0xff]  ;;  %v5253_v1 = vld [vmem:[#allocation41_spill] sm:$0xff] }
 0x32a   :  { %2519 = vmatprep.subr.mxu0 %v4010_v2  ;;  %2596 = vmatprep.subr.mxu1 %v4012_v4  ;;  %v5254_v2 = vld [vmem:[#allocation42_spill] sm:$0xff]  ;;  %v5255_v4 = vld [vmem:[#allocation43_spill] sm:$0xff] }
 0x32b   :  { %2520 = vmatpush1.msra.mxu0 %v4016_v5  ;;  %2597 = vmatpush1.msra.mxu1 %v4018_v7  ;;  %v5256_v5 = vld [vmem:[#allocation44_spill] sm:$0xff]  ;;  %v5257_v7 = vld [vmem:[#allocation45_spill] sm:$0xff] }
 0x32c   :  { %2521 = vmatprep.subr.mxu0 %v4022_v8  ;;  %2598 = vmatprep.subr.mxu1 %v4024_v9  ;;  %v5258_v8 = vld [vmem:[#allocation46_spill] sm:$0xff]  ;;  %v5259_v9 = vld [vmem:[#allocation47_spill] sm:$0xff] }
 0x32d   :  { %2522 = vmatpush1.msra.mxu0 %v5224_v28  ;;  %2599 = vmatpush1.msra.mxu1 %v5225_v29  ;;  %v5278_v28 = vld [vmem:[#allocation66_spill] sm:$0xff]  ;;  %v5279_v29 = vld [vmem:[#allocation67_spill] sm:$0xff] }
 0x32e   :  { %2523 = vmatprep.subr.mxu0 %v5226_v30  ;;  %2600 = vmatprep.subr.mxu1 %v5227_v31  ;;  %v5280_v30 = vld [vmem:[#allocation68_spill] sm:$0xff]  ;;  %v5281_v31 = vld [vmem:[#allocation69_spill] sm:$0xff] }
 0x32f   :  { %2524 = vmatpush1.msra.mxu0 %v5228_v33  ;;  %2601 = vmatpush1.msra.mxu1 %v5229_v34  ;;  %v5282_v33 = vld [vmem:[#allocation70_spill] sm:$0xff]  ;;  %v5283_v34 = vld [vmem:[#allocation71_spill] sm:$0xff] }
 0x330   :  { %2525 = vmatprep.subr.mxu0 %v5230_v35  ;;  %2602 = vmatprep.subr.mxu1 %v5231_v36  ;;  %v5284_v35 = vld [vmem:[#allocation72_spill] sm:$0xff]  ;;  %v5285_v36 = vld [vmem:[#allocation73_spill] sm:$0xff] }
 0x331   :  { %2526 = vmatpush1.msra.mxu0 %v5232_v37  ;;  %2603 = vmatpush1.msra.mxu1 %v5233_v38  ;;  %v5286_v37 = vld [vmem:[#allocation74_spill] sm:$0xff]  ;;  %v5287_v38 = vld [vmem:[#allocation75_spill] sm:$0xff] }
 0x332   :  { %2527 = vmatprep.subr.mxu0 %v5234_v39  ;;  %2604 = vmatprep.subr.mxu1 %v5235_v42  ;;  %v5288_v39 = vld [vmem:[#allocation76_spill] sm:$0xff]  ;;  %v5289_v42 = vld [vmem:[#allocation77_spill] sm:$0xff] }
 0x333   :  { %2528 = vmatpush1.msra.mxu0 %v5236_v43  ;;  %2605 = vmatpush1.msra.mxu1 %v5237_v3  ;;  %v5290_v43 = vld [vmem:[#allocation78_spill] sm:$0xff]  ;;  %v5291_v3 = vld [vmem:[#allocation79_spill] sm:$0xff] }
 0x334   :  { %2529 = vmatprep.subr.mxu0 %v5238_v44  ;;  %2606 = vmatprep.subr.mxu1 %v5239_v45  ;;  %v5292_v44 = vld [vmem:[#allocation80_spill] sm:$0xff]  ;;  %v5293_v45 = vld [vmem:[#allocation81_spill] sm:$0xff] }
 0x335   :  { %2530 = vmatpush1.msra.mxu0 %v5240_v6  ;;  %2607 = vmatpush1.msra.mxu1 %v5241_v46  ;;  %v5294_v6 = vld [vmem:[#allocation82_spill] sm:$0xff]  ;;  %v5295_v46 = vld [vmem:[#allocation83_spill] sm:$0xff] }
 0x336   :  { %2531 = vmatprep.subr.mxu0 %v5242_v12  ;;  %2608 = vmatprep.subr.mxu1 %v5243_v49  ;;  %v5296_v12 = vld [vmem:[#allocation84_spill] sm:$0xff]  ;;  %v5297_v49 = vld [vmem:[#allocation85_spill] sm:$0xff] }
 0x337   :  { %2532 = vmatpush1.msra.mxu0 %v5244_v51  ;;  %2609 = vmatpush1.msra.mxu1 %v5245_v54  ;;  %v5298_v51 = vld [vmem:[#allocation86_spill] sm:$0xff]  ;;  %v5299_v54 = vld [vmem:[#allocation87_spill] sm:$0xff] }
 0x338   :  { %2533 = vmatprep.subr.mxu0 %v5246_v57  ;;  %2610 = vmatprep.subr.mxu1 %v5247_v59  ;;  %v5300_v57 = vld [vmem:[#allocation88_spill] sm:$0xff]  ;;  %v5301_v59 = vld [vmem:[#allocation89_spill] sm:$0xff] }
 0x339   :  { %2534 = vmatpush1.msra.mxu0 %v5248_v60  ;;  %2567 = vmatprep.mubr.f32.mxu0 %v5087_v41  ;;  %v5302_v60 = vld [vmem:[#allocation90_spill] sm:$0xff] }
 0x33a   :  { %2611 = vmatpush1.msra.mxu1 %v5249_v61  ;;  %2644 = vmatprep.mubr.f32.mxu1 %v5087_v41  ;;  %v5303_v61 = vld [vmem:[#allocation91_spill] sm:$0xff] }
 0x33b   :  { %2568 = vmatmul.mubr.f32.vlgmr.msra.gmra.mxu0 %v4569_v58  ;;  %2645 = vmatmul.mubr.f32.vlgmr.msra.gmra.mxu1 %v4569_v58  ;;  %v5274_v58 = vld [vmem:[#allocation62_spill] sm:$0xff] }
 0x33c   :  { %2573 = vmatprep.mubr.f32.mxu0 %v5087_v41  ;;  %2650 = vmatprep.mubr.f32.mxu1 %v5087_v41 }
 0x33d   :  { %2713 = vmatprep.subr.mxu0 %v5250_v62  ;;  %2790 = vmatprep.subr.mxu1 %v5251_v63  ;;  %v5304_v62 = vld [vmem:[#allocation92_spill] sm:$0xff]  ;;  %v5305_v63 = vld [vmem:[#allocation93_spill] sm:$0xff] }
 0x33e   :  { %2714 = vmatpush1.msra.mxu0 %v5252_v0  ;;  %2791 = vmatpush1.msra.mxu1 %v5253_v1  ;;  %v5306_v0 = vld [vmem:[#allocation94_spill] sm:$0xff]  ;;  %v5307_v1 = vld [vmem:[#allocation95_spill] sm:$0xff] }
 0x33f   :  { %2574 = vmatmul.mubr.f32.gmra.mxu0 %v4577_v13  ;;  %2651 = vmatmul.mubr.f32.gmra.mxu1 %v4577_v13  ;;  %v5277_v13 = vld [vmem:[#allocation65_spill] sm:$0xff] }
 0x340   :  { %2715 = vmatprep.subr.mxu0 %v5254_v2  ;;  %2792 = vmatprep.subr.mxu1 %v5255_v4  ;;  %v5308_v2 = vld [vmem:[#allocation96_spill] sm:$0xff]  ;;  %v5309_v4 = vld [vmem:[#allocation97_spill] sm:$0xff] }
 0x341   :  { %2716 = vmatpush1.msra.mxu0 %v5256_v5  ;;  %2793 = vmatpush1.msra.mxu1 %v5257_v7  ;;  %v5310_v5 = vld [vmem:[#allocation98_spill] sm:$0xff]  ;;  %v5311_v7 = vld [vmem:[#allocation99_spill] sm:$0xff] }
 0x342   :  { %2717 = vmatprep.subr.mxu0 %v5258_v8  ;;  %2794 = vmatprep.subr.mxu1 %v5259_v9  ;;  %v5312_v8 = vld [vmem:[#allocation100_spill] sm:$0xff]  ;;  %v5313_v9 = vld [vmem:[#allocation101_spill] sm:$0xff] }
 0x343   :  { %2718 = vmatpush1.msra.mxu0 %v5260_v14  ;;  %2795 = vmatpush1.msra.mxu1 %v5261_v24  ;;  %v5314_v14 = vld [vmem:[#allocation102_spill] sm:$0xff]  ;;  %v5315_v24 = vld [vmem:[#allocation103_spill] sm:$0xff] }
 0x344   :  { %2719 = vmatprep.subr.mxu0 %v5262_v15  ;;  %2796 = vmatprep.subr.mxu1 %v5263_v25  ;;  %v5316_v15 = vld [vmem:[#allocation104_spill] sm:$0xff]  ;;  %v5317_v25 = vld [vmem:[#allocation105_spill] sm:$0xff] }
 0x345   :  { %2720 = vmatpush1.msra.mxu0 %v5264_v18  ;;  %2797 = vmatpush1.msra.mxu1 %v5265_v22  ;;  %v5318_v18 = vld [vmem:[#allocation106_spill] sm:$0xff]  ;;  %v5319_v22 = vld [vmem:[#allocation107_spill] sm:$0xff] }
 0x346   :  { %2721 = vmatprep.subr.mxu0 %v5266_v47  ;;  %2798 = vmatprep.subr.mxu1 %v5267_v10  ;;  %v5320_v47 = vld [vmem:[#allocation108_spill] sm:$0xff]  ;;  %v5321_v10 = vld [vmem:[#allocation109_spill] sm:$0xff] }
 0x347   :  { %2722 = vmatpush1.msra.mxu0 %v5268_v23  ;;  %2799 = vmatpush1.msra.mxu1 %v5269_v50  ;;  %v5322_v23 = vld [vmem:[#allocation110_spill] sm:$0xff]  ;;  %v5323_v50 = vld [vmem:[#allocation111_spill] sm:$0xff] }
 0x348   :  { %2723 = vmatprep.subr.mxu0 %v5270_v55  ;;  %2800 = vmatprep.subr.mxu1 %v5271_v11  ;;  %v5324_v55 = vld [vmem:[#allocation112_spill] sm:$0xff]  ;;  %v5325_v11 = vld [vmem:[#allocation113_spill] sm:$0xff] }
 0x349   :  { %2724 = vmatpush1.msra.mxu0 %v5272_v53  ;;  %2801 = vmatpush1.msra.mxu1 %v5273_v52  ;;  %v5326_v53 = vld [vmem:[#allocation114_spill] sm:$0xff]  ;;  %v5327_v52 = vld [vmem:[#allocation115_spill] sm:$0xff] }
 0x34a   :  { %2725 = vmatprep.subr.mxu0 %v5274_v58  ;;  %2802 = vmatprep.subr.mxu1 %v5275_v21  ;;  %v5328_v58 = vld [vmem:[#allocation116_spill] sm:$0xff]  ;;  %v5329_v21 = vld [vmem:[#allocation117_spill] sm:$0xff] }
 0x34b   :  { %2726 = vmatpush1.msra.mxu0 %v5276_v56  ;;  %2803 = vmatpush1.msra.mxu1 %v5277_v13  ;;  %v5330_v56 = vld [vmem:[#allocation118_spill] sm:$0xff]  ;;  %v5331_v13 = vld [vmem:[#allocation119_spill] sm:$0xff] }
 0x34c   :  { %2727 = vmatprep.subr.mxu0 %v5278_v28  ;;  %2804 = vmatprep.subr.mxu1 %v5279_v29  ;;  %v5332_v28 = vld [vmem:[#allocation120_spill] sm:$0xff]  ;;  %v5333_v29 = vld [vmem:[#allocation121_spill] sm:$0xff] }
 0x34d   :  { %2728 = vmatpush1.msra.mxu0 %v5280_v30  ;;  %2805 = vmatpush1.msra.mxu1 %v5281_v31  ;;  %v5334_v30 = vld [vmem:[#allocation122_spill] sm:$0xff]  ;;  %v5335_v31 = vld [vmem:[#allocation123_spill] sm:$0xff] }
 0x34e   :  { %2729 = vmatprep.subr.mxu0 %v5282_v33  ;;  %2806 = vmatprep.subr.mxu1 %v5283_v34  ;;  %v5336_v33 = vld [vmem:[#allocation124_spill] sm:$0xff]  ;;  %v5337_v34 = vld [vmem:[#allocation125_spill] sm:$0xff] }
 0x34f   :  { %2730 = vmatpush1.msra.mxu0 %v5284_v35  ;;  %2807 = vmatpush1.msra.mxu1 %v5285_v36  ;;  %v5338_v35 = vld [vmem:[#allocation126_spill] sm:$0xff]  ;;  %v5339_v36 = vld [vmem:[#allocation127_spill] sm:$0xff] }
 0x350   :  { %2731 = vmatprep.subr.mxu0 %v5286_v37  ;;  %2808 = vmatprep.subr.mxu1 %v5287_v38  ;;  %v5340_v37 = vld [vmem:[#allocation128_spill] sm:$0xff]  ;;  %v5341_v38 = vld [vmem:[#allocation129_spill] sm:$0xff] }
 0x351   :  { %2732 = vmatpush1.msra.mxu0 %v5288_v39  ;;  %2809 = vmatpush1.msra.mxu1 %v5289_v42  ;;  %v5342_v39 = vld [vmem:[#allocation130_spill] sm:$0xff]  ;;  %v5343_v42 = vld [vmem:[#allocation131_spill] sm:$0xff] }
 0x352   :  { %2733 = vmatprep.subr.mxu0 %v5290_v43  ;;  %2810 = vmatprep.subr.mxu1 %v5291_v3  ;;  %v5344_v43 = vld [vmem:[#allocation132_spill] sm:$0xff]  ;;  %v5345_v3 = vld [vmem:[#allocation133_spill] sm:$0xff] }
 0x353   :  { %2734 = vmatpush1.msra.mxu0 %v5292_v44  ;;  %2811 = vmatpush1.msra.mxu1 %v5293_v45  ;;  %v5346_v44 = vld [vmem:[#allocation134_spill] sm:$0xff]  ;;  %v5347_v45 = vld [vmem:[#allocation135_spill] sm:$0xff] }
 0x354   :  { %2735 = vmatprep.subr.mxu0 %v5294_v6  ;;  %2812 = vmatprep.subr.mxu1 %v5295_v46  ;;  %v5348_v6 = vld [vmem:[#allocation136_spill] sm:$0xff]  ;;  %v5349_v46 = vld [vmem:[#allocation137_spill] sm:$0xff] }
 0x355   :  { %2736 = vmatpush1.msra.mxu0 %v5296_v12  ;;  %2813 = vmatpush1.msra.mxu1 %v5297_v49  ;;  %v5350_v12 = vld [vmem:[#allocation138_spill] sm:$0xff]  ;;  %v5351_v49 = vld [vmem:[#allocation139_spill] sm:$0xff] }
 0x356   :  { %2737 = vmatprep.subr.mxu0 %v5298_v51  ;;  %2814 = vmatprep.subr.mxu1 %v5299_v54  ;;  %v5352_v51 = vld [vmem:[#allocation140_spill] sm:$0xff]  ;;  %v5353_v54 = vld [vmem:[#allocation141_spill] sm:$0xff] }
 0x357   :  { %2738 = vmatpush1.msra.mxu0 %v5300_v57  ;;  %2815 = vmatpush1.msra.mxu1 %v5301_v59  ;;  %v5354_v57 = vld [vmem:[#allocation142_spill] sm:$0xff]  ;;  %v5355_v59 = vld [vmem:[#allocation143_spill] sm:$0xff] }
 0x358   :  { %2739 = vmatprep.subr.mxu0 %v5302_v60  ;;  %2816 = vmatprep.subr.mxu1 %v5303_v61  ;;  %v5356_v60 = vld [vmem:[#allocation144_spill] sm:$0xff]  ;;  %v5357_v61 = vld [vmem:[#allocation145_spill] sm:$0xff] }
 0x359   :  { %2740 = vmatpush1.msra.mxu0 %v5304_v62  ;;  %2817 = vmatpush1.msra.mxu1 %v5305_v63  ;;  %v5358_v62 = vld [vmem:[#allocation146_spill] sm:$0xff]  ;;  %v5359_v63 = vld [vmem:[#allocation147_spill] sm:$0xff] }
 0x35a   :  { %2741 = vmatprep.subr.mxu0 %v5306_v0  ;;  %2818 = vmatprep.subr.mxu1 %v5307_v1  ;;  %v5360_v0 = vld [vmem:[#allocation148_spill] sm:$0xff]  ;;  %v5361_v1 = vld [vmem:[#allocation149_spill] sm:$0xff] }
 0x35b   :  { %2742 = vmatpush1.msra.mxu0 %v5308_v2  ;;  %2819 = vmatpush1.msra.mxu1 %v5309_v4  ;;  %v5362_v2 = vld [vmem:[#allocation150_spill] sm:$0xff]  ;;  %v5363_v4 = vld [vmem:[#allocation151_spill] sm:$0xff] }
 0x35c   :  { %2743 = vmatprep.subr.mxu0 %v5310_v5  ;;  %2820 = vmatprep.subr.mxu1 %v5311_v7  ;;  %v5364_v5 = vld [vmem:[#allocation152_spill] sm:$0xff]  ;;  %v5365_v7 = vld [vmem:[#allocation153_spill] sm:$0xff] }
 0x35d   :  { %2744 = vmatpush1.msra.mxu0 %v5312_v8  ;;  %2821 = vmatpush1.msra.mxu1 %v5313_v9  ;;  %v5366_v8 = vld [vmem:[#allocation154_spill] sm:$0xff]  ;;  %v5367_v9 = vld [vmem:[#allocation155_spill] sm:$0xff] }
 0x35e   :  { %2745 = vmatprep.subr.mxu0 %v5314_v14  ;;  %2822 = vmatprep.subr.mxu1 %v5315_v24  ;;  %v5368_v14 = vld [vmem:[#allocation156_spill] sm:$0xff]  ;;  %v5369_v24 = vld [vmem:[#allocation157_spill] sm:$0xff] }
 0x35f   :  { %2746 = vmatpush2.msra.mxu0 %v5316_v15  ;;  %2823 = vmatpush2.msra.mxu1 %v5317_v25  ;;  %v5370_v15 = vld [vmem:[#allocation158_spill] sm:$0xff]  ;;  %v5371_v25 = vld [vmem:[#allocation159_spill] sm:$0xff] }
 0x360   :  { %2747 = vmatprep.subr.mxu0 %v5318_v18  ;;  %2824 = vmatprep.subr.mxu1 %v5319_v22  ;;  %v5372_v18 = vld [vmem:[#allocation160_spill] sm:$0xff]  ;;  %v5373_v22 = vld [vmem:[#allocation161_spill] sm:$0xff] }
 0x361   :  { %2748 = vmatpush2.msra.mxu0 %v5320_v47  ;;  %2825 = vmatpush2.msra.mxu1 %v5321_v10  ;;  %v5374_v47 = vld [vmem:[#allocation162_spill] sm:$0xff]  ;;  %v5375_v10 = vld [vmem:[#allocation163_spill] sm:$0xff] }
 0x362   :  { %2749 = vmatprep.subr.mxu0 %v5322_v23  ;;  %2826 = vmatprep.subr.mxu1 %v5323_v50  ;;  %v5376_v23 = vld [vmem:[#allocation164_spill] sm:$0xff]  ;;  %v5377_v50 = vld [vmem:[#allocation165_spill] sm:$0xff] }
 0x363   :  { %2750 = vmatpush2.msra.mxu0 %v5324_v55  ;;  %2827 = vmatpush2.msra.mxu1 %v5325_v11  ;;  %v319_v55 = vld [vmem:[%s4897_s7] sm:$0xf]  ;;  %v5378_v11 = vsub.s32 0, %v4508_v20 }
 0x364   :  { %2751 = vmatprep.subr.mxu0 %v5326_v53  ;;  %2828 = vmatprep.subr.mxu1 %v5327_v52  ;;  %v5379_v52 = vsub.s32 1, %v4508_v20 }
 0x365   :  { %2752 = vmatpush2.msra.mxu0 %v5328_v58  ;;  %2829 = vmatpush2.msra.mxu1 %v5329_v21  ;;  %v4783_v53 = vrot.slane %v319_v55, %v5378_v11 }
 0x366   :  { %2753 = vmatprep.subr.mxu0 %v5330_v56  ;;  %2830 = vmatprep.subr.mxu1 %v5331_v13  ;;  %v4787_v58 = vrot.slane %v319_v55, %v5379_v52 }
 0x367   :  { %2754 = vmatpush2.msra.mxu0 %v5332_v28  ;;  %2831 = vmatpush2.msra.mxu1 %v5333_v29 }
 0x368   :  { %2755 = vmatprep.subr.mxu0 %v5334_v30  ;;  %2832 = vmatprep.subr.mxu1 %v5335_v31 }
 0x369   :  { %2756 = vmatpush2.msra.mxu0 %v5336_v33  ;;  %2833 = vmatpush2.msra.mxu1 %v5337_v34  ;;  %v4793_v33 = vrot.slane %v319_v55, %v1062_v16 }
 0x36a   :  { %2757 = vmatprep.subr.mxu0 %v5338_v35  ;;  %2834 = vmatprep.subr.mxu1 %v5339_v36  ;;  %v4798_v36 = vrot.slane %v319_v55, %v1058_v32 }
 0x36b   :  { %2758 = vmatpush2.msra.mxu0 %v5340_v37  ;;  %2835 = vmatpush2.msra.mxu1 %v5341_v38 }
 0x36c   :  { %2759 = vmatprep.subr.mxu0 %v5342_v39  ;;  %2836 = vmatprep.subr.mxu1 %v5343_v42 }
 0x36d   :  { %2760 = vmatpush2.msra.mxu0 %v5344_v43  ;;  %2837 = vmatpush2.msra.mxu1 %v5345_v3 }
 0x36e   :  { %2761 = vmatprep.subr.mxu0 %v5346_v44  ;;  %2838 = vmatprep.subr.mxu1 %v5347_v45 }
 0x36f   :  { %2762 = vmatpush2.msra.mxu0 %v5348_v6  ;;  %2839 = vmatpush2.msra.mxu1 %v5349_v46 }
 0x370   :  { %2763 = vmatprep.subr.mxu0 %v5350_v12  ;;  %2840 = vmatprep.subr.mxu1 %v5351_v49 }
 0x371   :  { %2764 = vmatpush2.msra.mxu0 %v5352_v51  ;;  %2841 = vmatpush2.msra.mxu1 %v5353_v54  ;;  %v5380_v51 = vld [vmem:[#allocation166_spill] sm:$0xff] }
 0x372   :  { %2765 = vmatprep.subr.mxu0 %v5354_v57  ;;  %2842 = vmatprep.subr.mxu1 %v5355_v59  ;;  %v1983_v54 = vadd.f32 %v5380_v51, %v4525_v27 }
 0x373   :  { %2766 = vmatpush2.msra.mxu0 %v5356_v60  ;;  %2843 = vmatpush2.msra.mxu1 %v5357_v61 }
 0x374   :  { %2767 = vmatprep.subr.mxu0 %v5358_v62  ;;  %2844 = vmatprep.subr.mxu1 %v5359_v63  ;;  %v5381_v63 = vld [vmem:[#allocation168_spill] sm:$0xff] }
 0x375   :  { %2768 = vmatpush2.msra.mxu0 %v5360_v0  ;;  %2845 = vmatpush2.msra.mxu1 %v5361_v1  ;;  %v1985_v0 = vadd.f32 %v5381_v63, %v4531_v26 }
 0x376   :  { %2769 = vmatprep.subr.mxu0 %v5362_v2  ;;  %2846 = vmatprep.subr.mxu1 %v5363_v4 }
 0x377   :  { %2770 = vmatpush2.msra.mxu0 %v5364_v5  ;;  %2847 = vmatpush2.msra.mxu1 %v5365_v7 }
 0x378   :  { %2771 = vmatprep.subr.mxu0 %v5366_v8  ;;  %2848 = vmatprep.subr.mxu1 %v5367_v9  ;;  %v5382_v8 = vld [vmem:[#allocation170_spill] sm:$0xff] }
 0x379   :  { %2772 = vmatpush2.msra.mxu0 %v5368_v14  ;;  %2849 = vmatpush2.msra.mxu1 %v5369_v24  ;;  %v1989_v9 = vadd.f32 %v5382_v8, %v4525_v27 }
 0x37a   :  { %2773 = vmatprep.subr.mxu0 %v5370_v15  ;;  %2850 = vmatprep.subr.mxu1 %v5371_v25 }
 0x37b   :  { %2774 = vmatpush2.msra.mxu0 %v5372_v18  ;;  %2851 = vmatpush2.msra.mxu1 %v5373_v22  ;;  %v5383_v18 = vld [vmem:[#allocation172_spill] sm:$0xff] }
 0x37c   :  { %2775 = vmatprep.subr.mxu0 %v5374_v47  ;;  %2852 = vmatprep.subr.mxu1 %v5375_v10  ;;  %v1991_v22 = vadd.f32 %v5383_v18, %v4531_v26 }
 0x37d   :  { %2776 = vmatpush2.msra.mxu0 %v5376_v23  ;;  %2853 = vmatpush2.msra.mxu1 %v5377_v50 }
 0x37e   :  { %3293 = vmatprep.subr.mxu0 %v5087_v41 }
 0x3d8   :  { %v2367_v21 = vpop.f32.mrf.mxu0  ;;  %v2444_v30 = vpop.f32.mrf.mxu1 }
 0x3d9   :  { %v2368_v56 = vadd.f32 %v2367_v21, %v4783_v53  ;;  %v2445_v42 = vadd.f32 %v2444_v30, %v4798_v36 }
 0x3da   :  { %v2369_v13 = vpop.f32.mrf.mxu0  ;;  %v2446_v34 = vpop.f32.mrf.mxu1 }
 0x3db   :  { %v3125_v28 = vmul.f32 -1.442695, %v2368_v56  ;;  %v2370_v29 = vadd.f32 %v2369_v13, %v4787_v58  ;;  %v2447_v35 = vadd.f32 %v2446_v34, %v4793_v33  ;;  %v5384_v13 = vld [vmem:[#allocation169_spill] sm:$0xff]  ;;  %v5385_v34 = vld [vmem:[#allocation167_spill] sm:$0xff] }
 0x3dd   :  { %3370 = vpow2.f32 %v3125_v28  ;;  %v3126_v31 = vmul.f32 -1.442695, %v2370_v29  ;;  %v3129_v37 = vmul.f32 -1.442695, %v2447_v35  ;;  %v2062_v28 = vadd.f32 %v5384_v13, %v4549_v17 }
 0x3de   :  { %v2373_v38 = vpop.f32.mrf.mxu0  ;;  %v2450_v46 = vpop.f32.mrf.mxu1  ;;  %v2060_v35 = vadd.f32 %v5385_v34, %v4553_v19  ;;  %v2935_v34 = vld [vmem:[#allocation7 + $0x78] sm:$0xff] }
 0x3df   :  { %3372 = vpow2.f32 %v3126_v31  ;;  %v2374_v6 = vadd.f32 %v2373_v38, %v4783_v53  ;;  %v2451_v30 = vadd.f32 %v2450_v46, %v4798_v36 }
 0x3e0   :  { %3374 = vpow2.f32 %v3129_v37  ;;  %v2375_v3 = vpop.f32.mrf.mxu0  ;;  %v2452_v57 = vpop.f32.mrf.mxu1 }
 0x3e1   :  { %v2376_v16 = vadd.f32 %v2375_v3, %v4787_v58  ;;  %v3127_v32 = vmul.f32 -1.442695, %v2374_v6  ;;  %v2453_v26 = vadd.f32 %v2452_v57, %v4793_v33 }
 0x3e3   :  { %v3128_v20 = vmul.f32 -1.442695, %v2376_v16 }
 0x3ea   :  { %v3371_v39 = vpop.eup %3370 }
 0x3eb   :  { %v2467_v43 = vadd.f32 1.0, %v3371_v39  ;;  %v5386_v39 = vld [vmem:[#allocation173_spill] sm:$0xff] }
 0x3ec   :  { %v3373_v44 = vpop.eup %3372 }
 0x3ed   :  { %3376 = vrcp.f32 %v2467_v43  ;;  %v2468_v45 = vadd.f32 1.0, %v3373_v44  ;;  %v3375_v12 = vpop.eup %3374  ;;  %v3130_v43 = vmul.f32 -1.442695, %v2453_v26  ;;  %v5387_v44 = vld [vmem:[#allocation171_spill] sm:$0xff] }
 0x3ee   :  { %3378 = vtanh.f32 %v2445_v42  ;;  %v2487_v60 = vadd.f32 1.0, %v3375_v12  ;;  %v2068_v42 = vadd.f32 %v5386_v39, %v4549_v17  ;;  %v2931_v39 = vld [vmem:[#allocation7 + $0x58] sm:$0xff] }
 0x3ef   :  { %3380 = vrcp.f32 %v2468_v45  ;;  %v2066_v45 = vadd.f32 %v5387_v44, %v4553_v19  ;;  %v2927_v44 = vld [vmem:[#allocation7 + $0x38] sm:$0xff] }
 0x3f0   :  { %3382 = vpow2.f32 %v3128_v20 }
 0x3f1   :  { %3384 = vpow2.f32 %v3127_v32 }
 0x3f2   :  { %3386 = vrcp.f32 %v2487_v60 }
 0x3fa   :  { %v3377_v49 = vpop.eup %3376 }
 0x3fb   :  { %v3379_v59 = vpop.eup %3378  ;;  %v2569_v61 = vpop.f32.mrf.mxu0 }
 0x3fc   :  { %v3381_v62 = vpop.eup %3380  ;;  %v2657_v1 = vadd.f32 %v2569_v61, %v1983_v54  ;;  %v2646_v2 = vpop.f32.mrf.mxu1  ;;  %v2495_v5 = vmul.f32 %v3379_v59, %v3377_v49 }
 0x3fd   :  { %v2493_v4 = vmul.f32 0.0, %v3381_v62  ;;  %v2571_v7 = vpop.f32.mrf.mxu0  ;;  %v3383_v27 = vpop.eup %3382  ;;  %v2659_v3 = vadd.f32 %v2646_v2, %v2060_v35  ;;  %v2934_v35 = vld [vmem:[#allocation7 + $0x70] sm:$0xff] }
 0x3fe   :  { %v3131_v14 = vmul.f32 -1.442695, %v2657_v1  ;;  %v2658_v24 = vadd.f32 %v2571_v7, %v1985_v0  ;;  %v2648_v10 = vpop.f32.mrf.mxu1  ;;  %v3385_v56 = vpop.eup %3384  ;;  %v2470_v29 = vadd.f32 1.0, %v3383_v27 }
 0x3ff   :  { %v4809_v15 = vadd.f32 %v2495_v5, %v2493_v4  ;;  %v2575_v25 = vpop.f32.mrf.mxu0  ;;  %v2660_v31 = vadd.f32 %v2648_v10, %v2062_v28  ;;  %v2469_v37 = vadd.f32 1.0, %v3385_v56  ;;  %v3387_v20 = vpop.eup %3386 }
 0x400   :  { %3388 = vpow2.f32 %v3131_v14  ;;  %v3132_v47 = vmul.f32 -1.442695, %v2658_v24  ;;  %v2661_v23 = vadd.f32 %v2575_v25, %v1989_v9  ;;  %v2652_v52 = vpop.f32.mrf.mxu1 }
 0x401   :  { %3390 = vtanh.f32 %v4809_v15  ;;  %v2577_v50 = vpop.f32.mrf.mxu0  ;;  %v3135_v16 = vmul.f32 -1.442695, %v2660_v31  ;;  %v2663_v46 = vadd.f32 %v2652_v52, %v2066_v45  ;;  %v2926_v45 = vld [vmem:[#allocation7 + $0x30] sm:$0xff] }
 0x402   :  { %3392 = vpow2.f32 %v3132_v47  ;;  %v3133_v55 = vmul.f32 -1.442695, %v2661_v23  ;;  %v2662_v11 = vadd.f32 %v2577_v50, %v1991_v22  ;;  %v2654_v38 = vpop.f32.mrf.mxu1 }
 0x403   :  { %v2664_v6 = vadd.f32 %v2654_v38, %v2068_v42  ;;  %v2932_v38 = vld [vmem:[#allocation7 + $0x60] sm:$0xff]  ;;  %v2930_v42 = vld [vmem:[#allocation7 + $0x50] sm:$0xff] }
 0x404   :  { %3394 = vpow2.f32 %v3133_v55  ;;  %v3134_v21 = vmul.f32 -1.442695, %v2662_v11 }
 0x405   :  { %v3136_v17 = vmul.f32 -1.442695, %v2664_v6  ;;  %v2924_v6 = vld [vmem:[#allocation7 + $0x20] sm:$0xff] }
 0x406   :  { %3396 = vpow2.f32 %v3134_v21 }
 0x407   :  { %3398 = vrcp.f32 %v2470_v29 }
 0x408   :  { %3400 = vtanh.f32 %v2451_v30 }
 0x409   :  { %3402 = vrcp.f32 %v2469_v37  ;;  %v2933_v37 = vld [vmem:[#allocation7 + $0x68] sm:$0xff] }
 0x40a   :  { %3404 = vpow2.f32 %v3130_v43  ;;  %v2929_v43 = vld [vmem:[#allocation7 + $0x48] sm:$0xff] }
 0x40b   :  { %3406 = vtanh.f32 %v2659_v3  ;;  %v2928_v3 = vld [vmem:[#allocation7 + $0x40] sm:$0xff] }
 0x40c   :  { %3408 = vpow2.f32 %v3135_v16  ;;  %v2925_v16 = vld [vmem:[#allocation7 + $0x28] sm:$0xff] }
 0x40d   :  { %v3389_v32 = vpop.eup %3388 }
 0x40e   :  { %v3391_v12 = vpop.eup %3390  ;;  %v2677_v49 = vadd.f32 1.0, %v3389_v32  ;;  %v2922_v32 = vld [vmem:[#allocation7 + $0x10] sm:$0xff] }
 0x40f   :  { %v3393_v51 = vpop.eup %3392  ;;  %v2501_v54 = vmul.f32 %v3391_v12, %v3387_v20  ;;  %v2923_v20 = vld [vmem:[#allocation7 + $0x18] sm:$0xff]  ;;  %v2920_v12 = vld [vmem:[#allocation7] sm:$0xff] }
 0x410   :  { %3410 = vrcp.f32 %v2677_v49  ;;  %v2678_v57 = vadd.f32 1.0, %v3393_v51 }
 0x411   :  { %v3395_v59 = vpop.eup %3394  ;;  %3412 = vtanh.f32 %v2663_v46  ;;  %2777 = vmatprep.mubr.f32.mxu0 %v2501_v54  ;;  %2854 = vmatprep.mubr.f32.mxu1 %v2501_v54  ;;  %v2921_v46 = vld [vmem:[#allocation7 + $0x8] sm:$0xff] }
 0x412   :  { %3414 = vrcp.f32 %v2678_v57  ;;  %v2679_v19 = vadd.f32 1.0, %v3395_v59 }
 0x413   :  { %v3397_v60 = vpop.eup %3396  ;;  %3416 = vpow2.f32 %v3136_v17 }
 0x414   :  { %3418 = vrcp.f32 %v2679_v19  ;;  %v2680_v61 = vadd.f32 1.0, %v3397_v60  ;;  %v3399_v62 = vpop.eup %3398 }
 0x415   :  { %v3401_v63 = vpop.eup %3400  ;;  %v2494_v2 = vmul.f32 0.0, %v3399_v62 }
 0x416   :  { %3420 = vrcp.f32 %v2680_v61  ;;  %v3403_v0 = vpop.eup %3402 }
 0x417   :  { %v3405_v1 = vpop.eup %3404  ;;  %v2496_v7 = vmul.f32 %v3403_v0, %v3401_v63 }
 0x418   :  { %v3407_v4 = vpop.eup %3406  ;;  %v2488_v23 = vadd.f32 1.0, %v3405_v1 }
 0x419   :  { %v3409_v5 = vpop.eup %3408  ;;  %v4824_v14 = vadd.f32 %v2496_v7, %v2494_v2 }
 0x41a   :  { %v2697_v18 = vadd.f32 1.0, %v3409_v5 }
 0x41b   :  { %3422 = vtanh.f32 %v4824_v14 }
 0x41c   :  { %3424 = vrcp.f32 %v2697_v18 }
 0x41d   :  { %v3411_v8 = vpop.eup %3410 }
 0x41e   :  { %v3413_v9 = vpop.eup %3412  ;;  %v2705_v24 = vmul.f32 %v3411_v8, %v3407_v4 }
 0x41f   :  { %v3415_v25 = vpop.eup %3414 }
 0x420   :  { %v3417_v22 = vpop.eup %3416  ;;  %v2703_v47 = vmul.f32 %v3415_v25, %v4563_v48 }
 0x421   :  { %v3419_v10 = vpop.eup %3418  ;;  %v2698_v27 = vadd.f32 1.0, %v3417_v22 }
 0x422   :  { %v2707_v50 = vadd.f32 %v2705_v24, %v2703_v47  ;;  %v2706_v55 = vmul.f32 %v3419_v10, %v3413_v9 }
 0x423   :  { %v3421_v11 = vpop.eup %3420 }
 0x424   :  { %3426 = vtanh.f32 %v2707_v50  ;;  %3019 = vst [vmem:[%s4902_s12] sm:$0xff] %v2707_v50  ;;  %v2704_v52 = vmul.f32 %v3421_v11, %v4566_v40 }
 0x425   :  { %3428 = vrcp.f32 %v2488_v23 }
 0x426   :  { %v2708_v21 = vadd.f32 %v2706_v55, %v2704_v52  ;;  %3430 = vrcp.f32 %v2698_v27 }
 0x428   :  { %3432 = vtanh.f32 %v2708_v21  ;;  %3020 = vst [vmem:[%s4902_s12 + $0x8] sm:$0x1] %v2708_v21  ;;  %v3423_v48 = vpop.eup %3422 }
 0x429   :  { %v3425_v56 = vpop.eup %3424 }
 0x431   :  { %v3427_v13 = vpop.eup %3426 }
 0x432   :  { %v3429_v28 = vpop.eup %3428  ;;  %v2711_v26 = vmul.f32 %v3427_v13, %v3425_v56 }
 0x433   :  { %v4835_v29 = vmul.f32 %v3429_v28, %v3423_v48  ;;  %v3431_v30 = vpop.eup %3430 }
 0x434   :  { %2778 = vmatmul.mubr.f32.vlgmr.msra.gmra.mxu0 %v2711_v26  ;;  %3014 = vst [vmem:[%s4901_s11] sm:$0xff] %v2711_v26  ;;  %2855 = vmatmul.mubr.f32.vlgmr.msra.gmra.mxu1 %v2711_v26 }
 0x435   :  { %v3433_v40 = vpop.eup %3432  ;;  %2783 = vmatprep.mubr.f32.mxu0 %v4835_v29  ;;  %2860 = vmatprep.mubr.f32.mxu1 %v4835_v29 }
 0x436   :  { %v2712_v31 = vmul.f32 %v3433_v40, %v3431_v30  ;;  %3294 = vmatpush3.msra.mxu0 %v2935_v34 }
 0x437   :  { %3295 = vmatprep.subr.mxu0 %v5087_v41 }
 0x438   :  { %2784 = vmatmul.mubr.f32.gmra.mxu0 %v2712_v31  ;;  %3015 = vst [vmem:[%s4901_s11 + $0x8] sm:$0x1] %v2712_v31  ;;  %2861 = vmatmul.mubr.f32.gmra.mxu1 %v2712_v31 }
 0x439   :  { %3296 = vmatpush3.msra.mxu0 %v2934_v35  ;;  %3325 = vmatprep.mubr.msk.f32.mxu0 %vm3561_vm3, %v5087_v41 }
 0x43a   :  { %3297 = vmatprep.subr.mxu0 %v5087_v41 }
 0x43b   :  { %3298 = vmatpush3.msra.mxu0 %v2933_v37 }
 0x43c   :  { %3299 = vmatprep.subr.mxu0 %v5087_v41 }
 0x43d   :  { %3300 = vmatpush3.msra.mxu0 %v2932_v38 }
 0x43e   :  { %3301 = vmatprep.subr.mxu0 %v5087_v41 }
 0x43f   :  { %3302 = vmatpush3.msra.mxu0 %v2931_v39 }
 0x440   :  { %3303 = vmatprep.subr.mxu0 %v5087_v41 }
 0x441   :  { %3304 = vmatpush3.msra.mxu0 %v2930_v42 }
 0x442   :  { %3305 = vmatprep.subr.mxu0 %v5087_v41 }
 0x443   :  { %3306 = vmatpush3.msra.mxu0 %v2929_v43 }
 0x444   :  { %3307 = vmatprep.subr.mxu0 %v5087_v41 }
 0x445   :  { %3308 = vmatpush3.msra.mxu0 %v2928_v3  ;;  %v3143_v3 = vld [vmem:[%s4899_s9] ss:$0 sm:$0xff] }
 0x446   :  { %3309 = vmatprep.subr.mxu0 %v5087_v41 }
 0x447   :  { %3310 = vmatpush3.msra.mxu0 %v2927_v44 }
 0x448   :  { %3311 = vmatprep.subr.mxu0 %v5087_v41 }
 0x449   :  { %3312 = vmatpush3.msra.mxu0 %v2926_v45 }
 0x44a   :  { %3313 = vmatprep.subr.mxu0 %v5087_v41 }
 0x44b   :  { %3314 = vmatpush3.msra.mxu0 %v2925_v16 }
 0x44c   :  { %3315 = vmatprep.subr.mxu0 %v5087_v41 }
 0x44d   :  { %3316 = vmatpush3.msra.mxu0 %v2924_v6 }
 0x44e   :  { %3317 = vmatprep.subr.mxu0 %v5087_v41 }
 0x44f   :  { %3318 = vmatpush3.msra.mxu0 %v2923_v20 }
 0x450   :  { %3319 = vmatprep.subr.mxu0 %v5087_v41 }
 0x451   :  { %3320 = vmatpush3.msra.mxu0 %v2922_v32 }
 0x452   :  { %3321 = vmatprep.subr.mxu0 %v5087_v41 }
 0x453   :  { %3322 = vmatpush3.msra.mxu0 %v2921_v46 }
 0x454   :  { %3323 = vmatprep.subr.mxu0 %v5087_v41 }
 0x455   :  { %3324 = vmatpush3.msra.mxu0 %v2920_v12 }
 0x4f4   :  { %v2779_v49 = vpop.f32.mrf.mxu0  ;;  %v2856_v17 = vpop.f32.mrf.mxu1 }
 0x4f5   :  { %v2780_v51 = vadd.f32 %v2779_v49, %v4783_v53  ;;  %v2857_v24 = vadd.f32 %v2856_v17, %v4798_v36 }
 0x4f6   :  { %v2781_v54 = vpop.f32.mrf.mxu0  ;;  %v2858_v61 = vpop.f32.mrf.mxu1 }
 0x4f7   :  { %v3137_v57 = vmul.f32 -1.442695, %v2780_v51  ;;  %v2782_v59 = vadd.f32 %v2781_v54, %v4787_v58  ;;  %v2859_v4 = vadd.f32 %v2858_v61, %v4793_v33 }
 0x4f8   :  { %v2785_v19 = vpop.f32.mrf.mxu0  ;;  %v2862_v1 = vpop.f32.mrf.mxu1 }
 0x4f9   :  { %3434 = vpow2.f32 %v3137_v57  ;;  %v3138_v60 = vmul.f32 -1.442695, %v2782_v59  ;;  %v2786_v62 = vadd.f32 %v2785_v19, %v4783_v53  ;;  %v3141_v7 = vmul.f32 -1.442695, %v2859_v4 }
 0x4fa   :  { %v2787_v63 = vpop.f32.mrf.mxu0  ;;  %v2864_v5 = vpop.f32.mrf.mxu1  ;;  %v2863_v47 = vadd.f32 %v2862_v1, %v4798_v36 }
 0x4fb   :  { %3436 = vpow2.f32 %v3138_v60  ;;  %v3139_v0 = vmul.f32 -1.442695, %v2786_v62  ;;  %v2788_v41 = vadd.f32 %v2787_v63, %v4787_v58  ;;  %v2865_v8 = vadd.f32 %v2864_v5, %v4793_v33 }
 0x4fd   :  { %3438 = vpow2.f32 %v3139_v0  ;;  %v3140_v2 = vmul.f32 -1.442695, %v2788_v41  ;;  %v3142_v18 = vmul.f32 -1.442695, %v2865_v8 }
 0x4ff   :  { %3440 = vpow2.f32 %v3140_v2 }
 0x500   :  { %3442 = vpow2.f32 %v3141_v7 }
 0x506   :  { %v3435_v9 = vpop.eup %3434 }
 0x507   :  { %v2879_v25 = vadd.f32 1.0, %v3435_v9 }
 0x508   :  { %v3437_v53 = vpop.eup %3436 }
 0x509   :  { %3444 = vrcp.f32 %v2879_v25  ;;  %v2880_v22 = vadd.f32 1.0, %v3437_v53 }
 0x50a   :  { %v3439_v58 = vpop.eup %3438  ;;  %3446 = vtanh.f32 %v2857_v24 }
 0x50b   :  { %3448 = vrcp.f32 %v2880_v22  ;;  %v2881_v10 = vadd.f32 1.0, %v3439_v58 }
 0x50c   :  { %v3441_v23 = vpop.eup %3440  ;;  %3450 = vpow2.f32 %v3142_v18 }
 0x50d   :  { %3452 = vrcp.f32 %v2881_v10  ;;  %v2882_v50 = vadd.f32 1.0, %v3441_v23  ;;  %v3443_v33 = vpop.eup %3442 }
 0x50e   :  { %3454 = vtanh.f32 %v2863_v47  ;;  %v2899_v52 = vadd.f32 1.0, %v3443_v33 }
 0x50f   :  { %3456 = vrcp.f32 %v2882_v50 }
 0x510   :  { %3458 = vrcp.f32 %v2899_v52 }
 0x516   :  { %v3445_v55 = vpop.eup %3444 }
 0x517   :  { %v3447_v11 = vpop.eup %3446 }
 0x518   :  { %v3449_v27 = vpop.eup %3448  ;;  %v2907_v48 = vmul.f32 %v3447_v11, %v3445_v55 }
 0x519   :  { %v3451_v21 = vpop.eup %3450  ;;  %v2905_v56 = vmul.f32 %v3449_v27, %v4809_v15 }
 0x51a   :  { %v3453_v13 = vpop.eup %3452  ;;  %v2900_v30 = vadd.f32 1.0, %v3451_v21 }
 0x51b   :  { %v3455_v28 = vpop.eup %3454  ;;  %v2909_v36 = vadd.f32 %v2907_v48, %v2905_v56 }
 0x51c   :  { %v3457_v26 = vpop.eup %3456  ;;  %v2908_v40 = vmul.f32 %v3455_v28, %v3453_v13 }
 0x51d   :  { %3460 = vtanh.f32 %v2909_v36  ;;  %3146 = vst [vmem:[%s4902_s12 + $0x10] sm:$0xff] %v2909_v36  ;;  %v2906_v31 = vmul.f32 %v3457_v26, %v4824_v14  ;;  %v3459_v15 = vpop.eup %3458 }
 0x51e   :  { %3462 = vrcp.f32 %v2900_v30 }
 0x51f   :  { %v2910_v34 = vadd.f32 %v2908_v40, %v2906_v31 }
 0x521   :  { %3464 = vtanh.f32 %v2910_v34  ;;  %3147 = vst [vmem:[%s4902_s12 + $0x18] sm:$0x1] %v2910_v34 }
 0x52a   :  { %v3461_v35 = vpop.eup %3460 }
 0x52b   :  { %v2913_v37 = vmul.f32 %v3461_v35, %v3459_v15  ;;  %v3463_v38 = vpop.eup %3462 }
 0x52d   :  { %3144 = vst [vmem:[%s4901_s11 + $0x10] sm:$0xff] %v2913_v37 }
 0x52e   :  { %v3465_v39 = vpop.eup %3464 }
 0x52f   :  { %v2914_v42 = vmul.f32 %v3465_v39, %v3463_v38 }
 0x531   :  { %v2916_v43 = vrot.slane %v2914_v42, 7  ;;  %3145 = vst [vmem:[%s4901_s11 + $0x18] sm:$0x1] %v2914_v42 }
 0x533   :  { %v2919_v14 = vsel %vm2918_vm4, %v4835_v29, %v2916_v43 }
 0x534   :  { %3326 = vmatmul.mubr.f32.vlgmr.msra.gmra.mxu0 %v2919_v14 }
 0x5f4   :  { %v3009_v44 = vpop.f32.mrf.mxu0 }
 0x5f5   :  { %v3010_v45 = vadd.f32 %v3143_v3, %v3009_v44 }
 0x5f6   :  { %v3327_v16 = vpop.f32.mrf.mxu0 }
 0x5f7   :  { %3013 = vst [vmem:[%s4900_s10] sm:$0x3] %v3010_v45 }
 0x5f8   :  { %3036 = vsyncpa [#allocation3], 1 }
 0x5f9   :  { %3037 = vsyncpa [#allocation5], 1 }
 0x5fa   :  { %3038 = vsyncpa [#allocation8], 1 }

</bundles_post_ra>
